<compile_context>
chip_gen: v6e
topology: v6e:2x2x1
jax: 0.10.0
libtpu: 0.0.40
codegen_flags: <defaults>
</compile_context>

<pallas_src>
import jax
import jax.numpy as jnp
from jax import lax
from jax.experimental import pallas as pl
from jax.experimental.pallas import tpu as pltpu

EPS = 1e-5    # nn.InstanceNorm2d default eps
LANES = 128   # TPU lane width


def _reflect_pad_into(xp_ref, x_hwc, H, W):
    """Write ReflectionPad2d(1) of x_hwc (H, W, C) into VMEM scratch xp_ref (H+2, W+2, C)."""
    xp_ref[1:H + 1, 1:W + 1, :] = x_hwc
    xp_ref[0:1, 1:W + 1, :] = x_hwc[1:2, :, :]
    xp_ref[H + 1:H + 2, 1:W + 1, :] = x_hwc[H - 2:H - 1, :, :]
    # Left/right columns (incl. corners) reflect from already-written columns.
    xp_ref[:, 0:1, :] = xp_ref[:, 2:3, :]
    xp_ref[:, W + 1:W + 2, :] = xp_ref[:, W - 1:W, :]


def _conv3x3_into(acc_ref, xp_ref, w_ref, H, W, C):
    """3x3 valid conv over the padded scratch: 9 direct MXU matmuls (K = C >= 128).

    xp_ref: (H+2, W+2, C) f32 padded input scratch.
    w_ref:  (9*C, C) bf16 folded taps, row index = dy*3*C + dx*C + ci, col = co.
    acc_ref:(H*W, C) f32 accumulator scratch (overwritten).
    """
    acc = None
    for dy in range(3):
        for dx in range(3):
            tap = xp_ref[dy:dy + H, dx:dx + W, :].reshape(H * W, C)
            t = dy * 3 + dx
            part = jnp.dot(tap.astype(jnp.bfloat16),        # bf16 MXU inputs
                           w_ref[t * C:(t + 1) * C, :],
                           preferred_element_type=jnp.float32)
            acc = part if acc is None else acc + part
    acc_ref[...] = acc


def _in_affine(y, hw):
    """Per-channel InstanceNorm affine: scale = rsqrt(var+eps), shift = -mean*scale."""
    inv_hw = 1.0 / hw
    mean = jnp.sum(y, axis=0, keepdims=True) * inv_hw
    ex2 = jnp.sum(y * y, axis=0, keepdims=True) * inv_hw
    var = jnp.maximum(ex2 - mean * mean, 0.0)
    scale = lax.rsqrt(var + EPS)
    return scale, -mean * scale


def reset_block_kernel(x_ref, w1_ref, w2_ref, o_ref, xp_ref, acc_ref):
    """Fused ResetBlock forward for one image (NHWC block, channel-padded)."""
    H, W, C = o_ref.shape
    hw = float(H * W)

    # Stage 1: ReflectionPad -> Conv3x3 -> InstanceNorm -> ReLU -> Dropout(eval).
    _reflect_pad_into(xp_ref, x_ref[...].astype(jnp.float32), H, W)
    _conv3x3_into(acc_ref, xp_ref, w1_ref, H, W, C)
    scale, shift = _in_affine(acc_ref[...], hw)
    # Fused normalize + ReLU sweep doubles as the stage-2 pad-interior write.
    y1 = jnp.maximum(acc_ref[...] * scale + shift, 0.0)
    # TODO(synk): nn.Dropout(0.5) is treated as eval-mode identity (train-mode
    # stochastic mask is not reproduced here).
    _reflect_pad_into(xp_ref, y1.reshape(H, W, C), H, W)

    # Stage 2: ReflectionPad -> Conv3x3 -> InstanceNorm + residual add,
    # normalize and residual folded into one affine sweep.
    _conv3x3_into(acc_ref, xp_ref, w2_ref, H, W, C)
    scale, shift = _in_affine(acc_ref[...], hw)
    x_res = x_ref[...].reshape(H * W, C).astype(jnp.float32)
    out = acc_ref[...] * scale + shift + x_res
    o_ref[...] = out.reshape(H, W, C).astype(o_ref.dtype)


def _round_up(v, m):
    return (v + m - 1) // m * m


def _fold_weight(w_oihw, c_pad):
    """(Cout, Cin, 3, 3) -> bf16 (9*c_pad, c_pad), row = dy*3*c_pad + dx*c_pad + ci, col = co."""
    co, ci = w_oihw.shape[0], w_oihw.shape[1]
    w = jnp.transpose(w_oihw, (2, 3, 1, 0))                     # (3, 3, ci, co)
    w = jnp.pad(w, ((0, 0), (0, 0), (0, c_pad - ci), (0, c_pad - co)))
    return w.reshape(9 * c_pad, c_pad).astype(jnp.bfloat16)


def reset_block(x_nchw, w1_oihw, w2_oihw):
    """Forward pass of ResetBlock. x: (N, C, H, W), weights: (C, C, 3, 3)."""
    N, C, H, W = x_nchw.shape
    # Lane-dense channels: pad to a multiple of 128 (padded channels stay exactly
    # zero through conv / IN / ReLU / residual; sliced off below).
    C_pad = _round_up(max(C, LANES), LANES)

    x = jnp.transpose(x_nchw, (0, 2, 3, 1))                     # NHWC: channels on lanes
    if C_pad != C:
        x = jnp.pad(x, ((0, 0), (0, 0), (0, 0), (0, C_pad - C)))
    w1 = _fold_weight(w1_oihw, C_pad)
    w2 = _fold_weight(w2_oihw, C_pad)

    # Explicit VMEM budget (working set + headroom for compiler temporaries).
    blk = H * W * C_pad
    itemsize = x.dtype.itemsize
    need = (
        2 * blk * itemsize                  # input block, double-buffered
        + 2 * blk * itemsize                # output block, double-buffered
        + 2 * 2 * 9 * C_pad * C_pad * 2     # two bf16 weights, double-buffered
        + (H + 2) * (W + 2) * C_pad * 4     # padded-activation scratch (f32)
        + blk * 4                           # f32 conv accumulator scratch
        + 4 * blk * 4                       # headroom for compiler temporaries
    )
    vmem_limit = int(min(max(need, 16 * 2 ** 20), 48 * 2 ** 20))

    out = pl.pallas_call(
        reset_block_kernel,
        out_shape=jax.ShapeDtypeStruct((N, H, W, C_pad), x.dtype),
        grid=(N,),
        in_specs=[
            pl.BlockSpec((None, H, W, C_pad), lambda n: (n, 0, 0, 0)),
            # Weight index maps are constant across the grid; at large C,
            # pipeline_mode=pl.Buffered(1) here would save one buffer per weight.
            pl.BlockSpec((9 * C_pad, C_pad), lambda n: (0, 0)),
            pl.BlockSpec((9 * C_pad, C_pad), lambda n: (0, 0)),
        ],
        out_specs=pl.BlockSpec((None, H, W, C_pad), lambda n: (n, 0, 0, 0)),
        scratch_shapes=[
            pltpu.VMEM((H + 2, W + 2, C_pad), jnp.float32),     # padded activation
            pltpu.VMEM((H * W, C_pad), jnp.float32),            # conv accumulator
        ],
        compiler_params=pltpu.CompilerParams(
            dimension_semantics=("parallel",),                  # N>=2 feeds both v7x TCs
            vmem_limit_bytes=vmem_limit),
    )(x, w1, w2)

    if C_pad != C:
        out = out[..., :C]
    return jnp.transpose(out, (0, 3, 1, 2))                     # back to NCHW


def reset_block_ref(x_nchw, w1, w2):
    """Pure-JAX reference (matches PyTorch eval-mode semantics)."""
    def conv_in(x, w):
        xp = jnp.pad(x, ((0, 0), (0, 0), (1, 1), (1, 1)), mode="reflect")
        y = lax.conv_general_dilated(
            xp, w, (1, 1), "VALID",
            dimension_numbers=("NCHW", "OIHW", "NCHW"),
            precision=lax.Precision.HIGHEST)
        mean = jnp.mean(y, axis=(2, 3), keepdims=True)
        var = jnp.mean((y - mean) ** 2, axis=(2, 3), keepdims=True)
        return (y - mean) * lax.rsqrt(var + EPS)

    y1 = jnp.maximum(conv_in(x_nchw, w1), 0.0)
    return conv_in(y1, w2) + x_nchw


if __name__ == "__main__":
    N, C, H, W = 2, 4, 16, 16
    key = jax.random.PRNGKey(0)
    kx, kw1, kw2 = jax.random.split(key, 3)
    x = jax.random.normal(kx, (N, C, H, W), jnp.float32)
    # Deterministic synthetic conv weights (nn.Conv2d(dim, dim, 3, bias=False)).
    w1 = 0.1 * jax.random.normal(kw1, (C, C, 3, 3), jnp.float32)
    w2 = 0.1 * jax.random.normal(kw2, (C, C, 3, 3), jnp.float32)

    out = jax.block_until_ready(reset_block(x, w1, w2))
    ref = jax.block_until_ready(reset_block_ref(x, w1, w2))

    assert out.shape == x.shape and out.dtype == x.dtype
    max_err = float(jnp.max(jnp.abs(out - ref)))
    # bf16 MXU operands with f32 accumulation (reference is f32 HIGHEST).
    assert jnp.allclose(out, ref, atol=3e-2, rtol=3e-2), f"max_err={max_err}"
    print("KERNEL_OK")
</pallas_src>

<mosaic_0001>
module attributes {stable_mosaic.version = 11 : i64} {
  func.func @reset_block_kernel(%arg0: i32, %arg1: memref<1x16x16x128xf32, #tpu.memory_space<vmem>>, %arg2: memref<1152x128xbf16, #tpu.memory_space<vmem>>, %arg3: memref<1152x128xbf16, #tpu.memory_space<vmem>>, %arg4: memref<1x16x16x128xf32, #tpu.memory_space<vmem>>, %arg5: memref<18x18x128xf32, #tpu.memory_space<vmem>>, %arg6: memref<256x128xf32, #tpu.memory_space<vmem>>) attributes {dimension_semantics = [#tpu.dimension_semantics<parallel>], iteration_bounds = array<i64: 2>, scalar_prefetch = 0 : i64, scratch_operands = 2 : i64, tpu.core_type = #tpu.core_type<tc>, window_params = [{transform_indices = @transform_0, window_bounds = array<i64: 1, 16, 16, 128>}, {pipeline_mode = #tpu.pipeline_mode<synchronous>, transform_indices = @transform_1, window_bounds = array<i64: 1152, 128>}, {pipeline_mode = #tpu.pipeline_mode<synchronous>, transform_indices = @transform_2, window_bounds = array<i64: 1152, 128>}, {transform_indices = @transform_3, window_bounds = array<i64: 1, 16, 16, 128>}]} {
    %c0 = arith.constant 0 : index
    %c0_0 = arith.constant 0 : index
    %c0_1 = arith.constant 0 : index
    %c0_2 = arith.constant 0 : index
    %0 = vector.load %arg1[%c0, %c0_0, %c0_1, %c0_2] : memref<1x16x16x128xf32, #tpu.memory_space<vmem>>, vector<1x16x16x128xf32>
    %1 = vector.shape_cast %0 : vector<1x16x16x128xf32> to vector<16x16x128xf32>
    %c1 = arith.constant 1 : index
    %c1_3 = arith.constant 1 : index
    %c0_4 = arith.constant 0 : index
    %2 = vector.load %arg5[%c1, %c1_3, %c0_4] : memref<18x18x128xf32, #tpu.memory_space<vmem>>, vector<16x16x128xf32>
    tpu.vector_store %arg5[%c1, %c1_3, %c0_4], %1 {strides = array<i32>} : memref<18x18x128xf32, #tpu.memory_space<vmem>>, vector<16x16x128xf32>,
    %3 = vector.extract_strided_slice %1 {offsets = [1, 0, 0], sizes = [1, 16, 128], strides = [1, 1, 1]} : vector<16x16x128xf32> to vector<1x16x128xf32>
    %c0_5 = arith.constant 0 : index
    %c1_6 = arith.constant 1 : index
    %c0_7 = arith.constant 0 : index
    %4 = vector.load %arg5[%c0_5, %c1_6, %c0_7] : memref<18x18x128xf32, #tpu.memory_space<vmem>>, vector<1x16x128xf32>
    tpu.vector_store %arg5[%c0_5, %c1_6, %c0_7], %3 {strides = array<i32>} : memref<18x18x128xf32, #tpu.memory_space<vmem>>, vector<1x16x128xf32>,
    %5 = vector.extract_strided_slice %1 {offsets = [14, 0, 0], sizes = [1, 16, 128], strides = [1, 1, 1]} : vector<16x16x128xf32> to vector<1x16x128xf32>
    %c17 = arith.constant 17 : index
    %c1_8 = arith.constant 1 : index
    %c0_9 = arith.constant 0 : index
    %6 = vector.load %arg5[%c17, %c1_8, %c0_9] : memref<18x18x128xf32, #tpu.memory_space<vmem>>, vector<1x16x128xf32>
    tpu.vector_store %arg5[%c17, %c1_8, %c0_9], %5 {strides = array<i32>} : memref<18x18x128xf32, #tpu.memory_space<vmem>>, vector<1x16x128xf32>,
    %c0_10 = arith.constant 0 : index
    %c2 = arith.constant 2 : index
    %c0_11 = arith.constant 0 : index
    %7 = vector.load %arg5[%c0_10, %c2, %c0_11] : memref<18x18x128xf32, #tpu.memory_space<vmem>>, vector<18x1x128xf32>
    %c0_12 = arith.constant 0 : index
    %c0_13 = arith.constant 0 : index
    %c0_14 = arith.constant 0 : index
    %8 = vector.load %arg5[%c0_12, %c0_13, %c0_14] : memref<18x18x128xf32, #tpu.memory_space<vmem>>, vector<18x1x128xf32>
    tpu.vector_store %arg5[%c0_12, %c0_13, %c0_14], %7 {strides = array<i32>} : memref<18x18x128xf32, #tpu.memory_space<vmem>>, vector<18x1x128xf32>,
    %c0_15 = arith.constant 0 : index
    %c15 = arith.constant 15 : index
    %c0_16 = arith.constant 0 : index
    %9 = vector.load %arg5[%c0_15, %c15, %c0_16] : memref<18x18x128xf32, #tpu.memory_space<vmem>>, vector<18x1x128xf32>
    %c0_17 = arith.constant 0 : index
    %c17_18 = arith.constant 17 : index
    %c0_19 = arith.constant 0 : index
    %10 = vector.load %arg5[%c0_17, %c17_18, %c0_19] : memref<18x18x128xf32, #tpu.memory_space<vmem>>, vector<18x1x128xf32>
    tpu.vector_store %arg5[%c0_17, %c17_18, %c0_19], %9 {strides = array<i32>} : memref<18x18x128xf32, #tpu.memory_space<vmem>>, vector<18x1x128xf32>,
    %c0_20 = arith.constant 0 : index
    %c0_21 = arith.constant 0 : index
    %c0_22 = arith.constant 0 : index
    %11 = vector.load %arg5[%c0_20, %c0_21, %c0_22] : memref<18x18x128xf32, #tpu.memory_space<vmem>>, vector<16x16x128xf32>
    %12 = vector.shape_cast %11 : vector<16x16x128xf32> to vector<256x128xf32>
    %13 = arith.truncf %12 : vector<256x128xf32> to vector<256x128xbf16>
    %c0_23 = arith.constant 0 : index
    %c0_24 = arith.constant 0 : index
    %14 = vector.load %arg2[%c0_23, %c0_24] : memref<1152x128xbf16, #tpu.memory_space<vmem>>, vector<128x128xbf16>
    %cst = arith.constant dense<0.000000e+00> : vector<256x128xf32>
    %15 = tpu.matmul %13, %14, %cst {dimension_numbers = #tpu.dot_dimension_numbers<[1], [0], [0], [1], [0, 0, 1, 1], [], []>} : vector<256x128xbf16>, vector<128x128xbf16>, vector<256x128xf32> -> vector<256x128xf32>
    %c0_25 = arith.constant 0 : index
    %c1_26 = arith.constant 1 : index
    %c0_27 = arith.constant 0 : index
    %16 = vector.load %arg5[%c0_25, %c1_26, %c0_27] : memref<18x18x128xf32, #tpu.memory_space<vmem>>, vector<16x16x128xf32>
    %17 = vector.shape_cast %16 : vector<16x16x128xf32> to vector<256x128xf32>
    %18 = arith.truncf %17 : vector<256x128xf32> to vector<256x128xbf16>
    %c128 = arith.constant 128 : index
    %c0_28 = arith.constant 0 : index
    %19 = vector.load %arg2[%c128, %c0_28] : memref<1152x128xbf16, #tpu.memory_space<vmem>>, vector<128x128xbf16>
    %cst_29 = arith.constant dense<0.000000e+00> : vector<256x128xf32>
    %20 = tpu.matmul %18, %19, %cst_29 {dimension_numbers = #tpu.dot_dimension_numbers<[1], [0], [0], [1], [0, 0, 1, 1], [], []>} : vector<256x128xbf16>, vector<128x128xbf16>, vector<256x128xf32> -> vector<256x128xf32>
    %21 = arith.addf %15, %20 : vector<256x128xf32>
    %c0_30 = arith.constant 0 : index
    %c2_31 = arith.constant 2 : index
    %c0_32 = arith.constant 0 : index
    %22 = vector.load %arg5[%c0_30, %c2_31, %c0_32] : memref<18x18x128xf32, #tpu.memory_space<vmem>>, vector<16x16x128xf32>
    %23 = vector.shape_cast %22 : vector<16x16x128xf32> to vector<256x128xf32>
    %24 = arith.truncf %23 : vector<256x128xf32> to vector<256x128xbf16>
    %c256 = arith.constant 256 : index
    %c0_33 = arith.constant 0 : index
    %25 = vector.load %arg2[%c256, %c0_33] : memref<1152x128xbf16, #tpu.memory_space<vmem>>, vector<128x128xbf16>
    %cst_34 = arith.constant dense<0.000000e+00> : vector<256x128xf32>
    %26 = tpu.matmul %24, %25, %cst_34 {dimension_numbers = #tpu.dot_dimension_numbers<[1], [0], [0], [1], [0, 0, 1, 1], [], []>} : vector<256x128xbf16>, vector<128x128xbf16>, vector<256x128xf32> -> vector<256x128xf32>
    %27 = arith.addf %21, %26 : vector<256x128xf32>
    %c1_35 = arith.constant 1 : index
    %c0_36 = arith.constant 0 : index
    %c0_37 = arith.constant 0 : index
    %28 = vector.load %arg5[%c1_35, %c0_36, %c0_37] : memref<18x18x128xf32, #tpu.memory_space<vmem>>, vector<16x16x128xf32>
    %29 = vector.shape_cast %28 : vector<16x16x128xf32> to vector<256x128xf32>
    %30 = arith.truncf %29 : vector<256x128xf32> to vector<256x128xbf16>
    %c384 = arith.constant 384 : index
    %c0_38 = arith.constant 0 : index
    %31 = vector.load %arg2[%c384, %c0_38] : memref<1152x128xbf16, #tpu.memory_space<vmem>>, vector<128x128xbf16>
    %cst_39 = arith.constant dense<0.000000e+00> : vector<256x128xf32>
    %32 = tpu.matmul %30, %31, %cst_39 {dimension_numbers = #tpu.dot_dimension_numbers<[1], [0], [0], [1], [0, 0, 1, 1], [], []>} : vector<256x128xbf16>, vector<128x128xbf16>, vector<256x128xf32> -> vector<256x128xf32>
    %33 = arith.addf %27, %32 : vector<256x128xf32>
    %c1_40 = arith.constant 1 : index
    %c1_41 = arith.constant 1 : index
    %c0_42 = arith.constant 0 : index
    %34 = vector.load %arg5[%c1_40, %c1_41, %c0_42] : memref<18x18x128xf32, #tpu.memory_space<vmem>>, vector<16x16x128xf32>
    %35 = vector.shape_cast %34 : vector<16x16x128xf32> to vector<256x128xf32>
    %36 = arith.truncf %35 : vector<256x128xf32> to vector<256x128xbf16>
    %c512 = arith.constant 512 : index
    %c0_43 = arith.constant 0 : index
    %37 = vector.load %arg2[%c512, %c0_43] : memref<1152x128xbf16, #tpu.memory_space<vmem>>, vector<128x128xbf16>
    %cst_44 = arith.constant dense<0.000000e+00> : vector<256x128xf32>
    %38 = tpu.matmul %36, %37, %cst_44 {dimension_numbers = #tpu.dot_dimension_numbers<[1], [0], [0], [1], [0, 0, 1, 1], [], []>} : vector<256x128xbf16>, vector<128x128xbf16>, vector<256x128xf32> -> vector<256x128xf32>
    %39 = arith.addf %33, %38 : vector<256x128xf32>
    %c1_45 = arith.constant 1 : index
    %c2_46 = arith.constant 2 : index
    %c0_47 = arith.constant 0 : index
    %40 = vector.load %arg5[%c1_45, %c2_46, %c0_47] : memref<18x18x128xf32, #tpu.memory_space<vmem>>, vector<16x16x128xf32>
    %41 = vector.shape_cast %40 : vector<16x16x128xf32> to vector<256x128xf32>
    %42 = arith.truncf %41 : vector<256x128xf32> to vector<256x128xbf16>
    %c640 = arith.constant 640 : index
    %c0_48 = arith.constant 0 : index
    %43 = vector.load %arg2[%c640, %c0_48] : memref<1152x128xbf16, #tpu.memory_space<vmem>>, vector<128x128xbf16>
    %cst_49 = arith.constant dense<0.000000e+00> : vector<256x128xf32>
    %44 = tpu.matmul %42, %43, %cst_49 {dimension_numbers = #tpu.dot_dimension_numbers<[1], [0], [0], [1], [0, 0, 1, 1], [], []>} : vector<256x128xbf16>, vector<128x128xbf16>, vector<256x128xf32> -> vector<256x128xf32>
    %45 = arith.addf %39, %44 : vector<256x128xf32>
    %c2_50 = arith.constant 2 : index
    %c0_51 = arith.constant 0 : index
    %c0_52 = arith.constant 0 : index
    %46 = vector.load %arg5[%c2_50, %c0_51, %c0_52] : memref<18x18x128xf32, #tpu.memory_space<vmem>>, vector<16x16x128xf32>
    %47 = vector.shape_cast %46 : vector<16x16x128xf32> to vector<256x128xf32>
    %48 = arith.truncf %47 : vector<256x128xf32> to vector<256x128xbf16>
    %c768 = arith.constant 768 : index
    %c0_53 = arith.constant 0 : index
    %49 = vector.load %arg2[%c768, %c0_53] : memref<1152x128xbf16, #tpu.memory_space<vmem>>, vector<128x128xbf16>
    %cst_54 = arith.constant dense<0.000000e+00> : vector<256x128xf32>
    %50 = tpu.matmul %48, %49, %cst_54 {dimension_numbers = #tpu.dot_dimension_numbers<[1], [0], [0], [1], [0, 0, 1, 1], [], []>} : vector<256x128xbf16>, vector<128x128xbf16>, vector<256x128xf32> -> vector<256x128xf32>
    %51 = arith.addf %45, %50 : vector<256x128xf32>
    %c2_55 = arith.constant 2 : index
    %c1_56 = arith.constant 1 : index
    %c0_57 = arith.constant 0 : index
    %52 = vector.load %arg5[%c2_55, %c1_56, %c0_57] : memref<18x18x128xf32, #tpu.memory_space<vmem>>, vector<16x16x128xf32>
    %53 = vector.shape_cast %52 : vector<16x16x128xf32> to vector<256x128xf32>
    %54 = arith.truncf %53 : vector<256x128xf32> to vector<256x128xbf16>
    %c896 = arith.constant 896 : index
    %c0_58 = arith.constant 0 : index
    %55 = vector.load %arg2[%c896, %c0_58] : memref<1152x128xbf16, #tpu.memory_space<vmem>>, vector<128x128xbf16>
    %cst_59 = arith.constant dense<0.000000e+00> : vector<256x128xf32>
    %56 = tpu.matmul %54, %55, %cst_59 {dimension_numbers = #tpu.dot_dimension_numbers<[1], [0], [0], [1], [0, 0, 1, 1], [], []>} : vector<256x128xbf16>, vector<128x128xbf16>, vector<256x128xf32> -> vector<256x128xf32>
    %57 = arith.addf %51, %56 : vector<256x128xf32>
    %c2_60 = arith.constant 2 : index
    %c2_61 = arith.constant 2 : index
    %c0_62 = arith.constant 0 : index
    %58 = vector.load %arg5[%c2_60, %c2_61, %c0_62] : memref<18x18x128xf32, #tpu.memory_space<vmem>>, vector<16x16x128xf32>
    %59 = vector.shape_cast %58 : vector<16x16x128xf32> to vector<256x128xf32>
    %60 = arith.truncf %59 : vector<256x128xf32> to vector<256x128xbf16>
    %c1024 = arith.constant 1024 : index
    %c0_63 = arith.constant 0 : index
    %61 = vector.load %arg2[%c1024, %c0_63] : memref<1152x128xbf16, #tpu.memory_space<vmem>>, vector<128x128xbf16>
    %cst_64 = arith.constant dense<0.000000e+00> : vector<256x128xf32>
    %62 = tpu.matmul %60, %61, %cst_64 {dimension_numbers = #tpu.dot_dimension_numbers<[1], [0], [0], [1], [0, 0, 1, 1], [], []>} : vector<256x128xbf16>, vector<128x128xbf16>, vector<256x128xf32> -> vector<256x128xf32>
    %63 = arith.addf %57, %62 : vector<256x128xf32>
    %c0_65 = arith.constant 0 : index
    %c0_66 = arith.constant 0 : index
    %64 = vector.load %arg6[%c0_65, %c0_66] : memref<256x128xf32, #tpu.memory_space<vmem>>, vector<256x128xf32>
    tpu.vector_store %arg6[%c0_65, %c0_66], %63 {strides = array<i32>} : memref<256x128xf32, #tpu.memory_space<vmem>>, vector<256x128xf32>,
    %c0_67 = arith.constant 0 : index
    %c0_68 = arith.constant 0 : index
    %65 = vector.load %arg6[%c0_67, %c0_68] : memref<256x128xf32, #tpu.memory_space<vmem>>, vector<256x128xf32>
    %cst_69 = arith.constant dense<0.000000e+00> : vector<128xf32>
    %66 = vector.multi_reduction <add>, %65, %cst_69 [0] : vector<256x128xf32> to vector<128xf32>
    %67 = vector.shape_cast %66 : vector<128xf32> to vector<1x128xf32>
    %cst_70 = arith.constant 3.906250e-03 : f32
    %68 = vector.broadcast %cst_70 : f32 to vector<1x128xf32>
    %69 = arith.mulf %67, %68 : vector<1x128xf32>
    %70 = arith.mulf %65, %65 : vector<256x128xf32>
    %cst_71 = arith.constant dense<0.000000e+00> : vector<128xf32>
    %71 = vector.multi_reduction <add>, %70, %cst_71 [0] : vector<256x128xf32> to vector<128xf32>
    %72 = vector.shape_cast %71 : vector<128xf32> to vector<1x128xf32>
    %cst_72 = arith.constant 3.906250e-03 : f32
    %73 = vector.broadcast %cst_72 : f32 to vector<1x128xf32>
    %74 = arith.mulf %72, %73 : vector<1x128xf32>
    %75 = arith.mulf %69, %69 : vector<1x128xf32>
    %76 = arith.subf %74, %75 : vector<1x128xf32>
    %cst_73 = arith.constant 0.000000e+00 : f32
    %77 = vector.broadcast %cst_73 : f32 to vector<1x128xf32>
    %78 = arith.maximumf %76, %77 : vector<1x128xf32>
    %cst_74 = arith.constant 9.99999974E-6 : f32
    %79 = vector.broadcast %cst_74 : f32 to vector<1x128xf32>
    %80 = arith.addf %78, %79 : vector<1x128xf32>
    %81 = math.rsqrt %80 : vector<1x128xf32>
    %cst_75 = arith.constant 0.000000e+00 : f32
    %82 = vector.broadcast %cst_75 : f32 to vector<1x128xf32>
    %83 = arith.subf %82, %69 : vector<1x128xf32>
    %84 = arith.mulf %83, %81 : vector<1x128xf32>
    %c0_76 = arith.constant 0 : index
    %c0_77 = arith.constant 0 : index
    %85 = vector.load %arg6[%c0_76, %c0_77] : memref<256x128xf32, #tpu.memory_space<vmem>>, vector<256x128xf32>
    %86 = vector.broadcast %81 : vector<1x128xf32> to vector<256x128xf32>
    %87 = arith.mulf %85, %86 : vector<256x128xf32>
    %88 = vector.broadcast %84 : vector<1x128xf32> to vector<256x128xf32>
    %89 = arith.addf %87, %88 : vector<256x128xf32>
    %cst_78 = arith.constant 0.000000e+00 : f32
    %90 = vector.broadcast %cst_78 : f32 to vector<256x128xf32>
    %91 = arith.maximumf %89, %90 : vector<256x128xf32>
    %92 = vector.shape_cast %91 : vector<256x128xf32> to vector<16x16x128xf32>
    %c1_79 = arith.constant 1 : index
    %c1_80 = arith.constant 1 : index
    %c0_81 = arith.constant 0 : index
    %93 = vector.load %arg5[%c1_79, %c1_80, %c0_81] : memref<18x18x128xf32, #tpu.memory_space<vmem>>, vector<16x16x128xf32>
    tpu.vector_store %arg5[%c1_79, %c1_80, %c0_81], %92 {strides = array<i32>} : memref<18x18x128xf32, #tpu.memory_space<vmem>>, vector<16x16x128xf32>,
    %94 = vector.extract_strided_slice %92 {offsets = [1, 0, 0], sizes = [1, 16, 128], strides = [1, 1, 1]} : vector<16x16x128xf32> to vector<1x16x128xf32>
    %c0_82 = arith.constant 0 : index
    %c1_83 = arith.constant 1 : index
    %c0_84 = arith.constant 0 : index
    %95 = vector.load %arg5[%c0_82, %c1_83, %c0_84] : memref<18x18x128xf32, #tpu.memory_space<vmem>>, vector<1x16x128xf32>
    tpu.vector_store %arg5[%c0_82, %c1_83, %c0_84], %94 {strides = array<i32>} : memref<18x18x128xf32, #tpu.memory_space<vmem>>, vector<1x16x128xf32>,
    %96 = vector.extract_strided_slice %92 {offsets = [14, 0, 0], sizes = [1, 16, 128], strides = [1, 1, 1]} : vector<16x16x128xf32> to vector<1x16x128xf32>
    %c17_85 = arith.constant 17 : index
    %c1_86 = arith.constant 1 : index
    %c0_87 = arith.constant 0 : index
    %97 = vector.load %arg5[%c17_85, %c1_86, %c0_87] : memref<18x18x128xf32, #tpu.memory_space<vmem>>, vector<1x16x128xf32>
    tpu.vector_store %arg5[%c17_85, %c1_86, %c0_87], %96 {strides = array<i32>} : memref<18x18x128xf32, #tpu.memory_space<vmem>>, vector<1x16x128xf32>,
    %c0_88 = arith.constant 0 : index
    %c2_89 = arith.constant 2 : index
    %c0_90 = arith.constant 0 : index
    %98 = vector.load %arg5[%c0_88, %c2_89, %c0_90] : memref<18x18x128xf32, #tpu.memory_space<vmem>>, vector<18x1x128xf32>
    %c0_91 = arith.constant 0 : index
    %c0_92 = arith.constant 0 : index
    %c0_93 = arith.constant 0 : index
    %99 = vector.load %arg5[%c0_91, %c0_92, %c0_93] : memref<18x18x128xf32, #tpu.memory_space<vmem>>, vector<18x1x128xf32>
    tpu.vector_store %arg5[%c0_91, %c0_92, %c0_93], %98 {strides = array<i32>} : memref<18x18x128xf32, #tpu.memory_space<vmem>>, vector<18x1x128xf32>,
    %c0_94 = arith.constant 0 : index
    %c15_95 = arith.constant 15 : index
    %c0_96 = arith.constant 0 : index
    %100 = vector.load %arg5[%c0_94, %c15_95, %c0_96] : memref<18x18x128xf32, #tpu.memory_space<vmem>>, vector<18x1x128xf32>
    %c0_97 = arith.constant 0 : index
    %c17_98 = arith.constant 17 : index
    %c0_99 = arith.constant 0 : index
    %101 = vector.load %arg5[%c0_97, %c17_98, %c0_99] : memref<18x18x128xf32, #tpu.memory_space<vmem>>, vector<18x1x128xf32>
    tpu.vector_store %arg5[%c0_97, %c17_98, %c0_99], %100 {strides = array<i32>} : memref<18x18x128xf32, #tpu.memory_space<vmem>>, vector<18x1x128xf32>,
    %c0_100 = arith.constant 0 : index
    %c0_101 = arith.constant 0 : index
    %c0_102 = arith.constant 0 : index
    %102 = vector.load %arg5[%c0_100, %c0_101, %c0_102] : memref<18x18x128xf32, #tpu.memory_space<vmem>>, vector<16x16x128xf32>
    %103 = vector.shape_cast %102 : vector<16x16x128xf32> to vector<256x128xf32>
    %104 = arith.truncf %103 : vector<256x128xf32> to vector<256x128xbf16>
    %c0_103 = arith.constant 0 : index
    %c0_104 = arith.constant 0 : index
    %105 = vector.load %arg3[%c0_103, %c0_104] : memref<1152x128xbf16, #tpu.memory_space<vmem>>, vector<128x128xbf16>
    %cst_105 = arith.constant dense<0.000000e+00> : vector<256x128xf32>
    %106 = tpu.matmul %104, %105, %cst_105 {dimension_numbers = #tpu.dot_dimension_numbers<[1], [0], [0], [1], [0, 0, 1, 1], [], []>} : vector<256x128xbf16>, vector<128x128xbf16>, vector<256x128xf32> -> vector<256x128xf32>
    %c0_106 = arith.constant 0 : index
    %c1_107 = arith.constant 1 : index
    %c0_108 = arith.constant 0 : index
    %107 = vector.load %arg5[%c0_106, %c1_107, %c0_108] : memref<18x18x128xf32, #tpu.memory_space<vmem>>, vector<16x16x128xf32>
    %108 = vector.shape_cast %107 : vector<16x16x128xf32> to vector<256x128xf32>
    %109 = arith.truncf %108 : vector<256x128xf32> to vector<256x128xbf16>
    %c128_109 = arith.constant 128 : index
    %c0_110 = arith.constant 0 : index
    %110 = vector.load %arg3[%c128_109, %c0_110] : memref<1152x128xbf16, #tpu.memory_space<vmem>>, vector<128x128xbf16>
    %cst_111 = arith.constant dense<0.000000e+00> : vector<256x128xf32>
    %111 = tpu.matmul %109, %110, %cst_111 {dimension_numbers = #tpu.dot_dimension_numbers<[1], [0], [0], [1], [0, 0, 1, 1], [], []>} : vector<256x128xbf16>, vector<128x128xbf16>, vector<256x128xf32> -> vector<256x128xf32>
    %112 = arith.addf %106, %111 : vector<256x128xf32>
    %c0_112 = arith.constant 0 : index
    %c2_113 = arith.constant 2 : index
    %c0_114 = arith.constant 0 : index
    %113 = vector.load %arg5[%c0_112, %c2_113, %c0_114] : memref<18x18x128xf32, #tpu.memory_space<vmem>>, vector<16x16x128xf32>
    %114 = vector.shape_cast %113 : vector<16x16x128xf32> to vector<256x128xf32>
    %115 = arith.truncf %114 : vector<256x128xf32> to vector<256x128xbf16>
    %c256_115 = arith.constant 256 : index
    %c0_116 = arith.constant 0 : index
    %116 = vector.load %arg3[%c256_115, %c0_116] : memref<1152x128xbf16, #tpu.memory_space<vmem>>, vector<128x128xbf16>
    %cst_117 = arith.constant dense<0.000000e+00> : vector<256x128xf32>
    %117 = tpu.matmul %115, %116, %cst_117 {dimension_numbers = #tpu.dot_dimension_numbers<[1], [0], [0], [1], [0, 0, 1, 1], [], []>} : vector<256x128xbf16>, vector<128x128xbf16>, vector<256x128xf32> -> vector<256x128xf32>
    %118 = arith.addf %112, %117 : vector<256x128xf32>
    %c1_118 = arith.constant 1 : index
    %c0_119 = arith.constant 0 : index
    %c0_120 = arith.constant 0 : index
    %119 = vector.load %arg5[%c1_118, %c0_119, %c0_120] : memref<18x18x128xf32, #tpu.memory_space<vmem>>, vector<16x16x128xf32>
    %120 = vector.shape_cast %119 : vector<16x16x128xf32> to vector<256x128xf32>
    %121 = arith.truncf %120 : vector<256x128xf32> to vector<256x128xbf16>
    %c384_121 = arith.constant 384 : index
    %c0_122 = arith.constant 0 : index
    %122 = vector.load %arg3[%c384_121, %c0_122] : memref<1152x128xbf16, #tpu.memory_space<vmem>>, vector<128x128xbf16>
    %cst_123 = arith.constant dense<0.000000e+00> : vector<256x128xf32>
    %123 = tpu.matmul %121, %122, %cst_123 {dimension_numbers = #tpu.dot_dimension_numbers<[1], [0], [0], [1], [0, 0, 1, 1], [], []>} : vector<256x128xbf16>, vector<128x128xbf16>, vector<256x128xf32> -> vector<256x128xf32>
    %124 = arith.addf %118, %123 : vector<256x128xf32>
    %c1_124 = arith.constant 1 : index
    %c1_125 = arith.constant 1 : index
    %c0_126 = arith.constant 0 : index
    %125 = vector.load %arg5[%c1_124, %c1_125, %c0_126] : memref<18x18x128xf32, #tpu.memory_space<vmem>>, vector<16x16x128xf32>
    %126 = vector.shape_cast %125 : vector<16x16x128xf32> to vector<256x128xf32>
    %127 = arith.truncf %126 : vector<256x128xf32> to vector<256x128xbf16>
    %c512_127 = arith.constant 512 : index
    %c0_128 = arith.constant 0 : index
    %128 = vector.load %arg3[%c512_127, %c0_128] : memref<1152x128xbf16, #tpu.memory_space<vmem>>, vector<128x128xbf16>
    %cst_129 = arith.constant dense<0.000000e+00> : vector<256x128xf32>
    %129 = tpu.matmul %127, %128, %cst_129 {dimension_numbers = #tpu.dot_dimension_numbers<[1], [0], [0], [1], [0, 0, 1, 1], [], []>} : vector<256x128xbf16>, vector<128x128xbf16>, vector<256x128xf32> -> vector<256x128xf32>
    %130 = arith.addf %124, %129 : vector<256x128xf32>
    %c1_130 = arith.constant 1 : index
    %c2_131 = arith.constant 2 : index
    %c0_132 = arith.constant 0 : index
    %131 = vector.load %arg5[%c1_130, %c2_131, %c0_132] : memref<18x18x128xf32, #tpu.memory_space<vmem>>, vector<16x16x128xf32>
    %132 = vector.shape_cast %131 : vector<16x16x128xf32> to vector<256x128xf32>
    %133 = arith.truncf %132 : vector<256x128xf32> to vector<256x128xbf16>
    %c640_133 = arith.constant 640 : index
    %c0_134 = arith.constant 0 : index
    %134 = vector.load %arg3[%c640_133, %c0_134] : memref<1152x128xbf16, #tpu.memory_space<vmem>>, vector<128x128xbf16>
    %cst_135 = arith.constant dense<0.000000e+00> : vector<256x128xf32>
    %135 = tpu.matmul %133, %134, %cst_135 {dimension_numbers = #tpu.dot_dimension_numbers<[1], [0], [0], [1], [0, 0, 1, 1], [], []>} : vector<256x128xbf16>, vector<128x128xbf16>, vector<256x128xf32> -> vector<256x128xf32>
    %136 = arith.addf %130, %135 : vector<256x128xf32>
    %c2_136 = arith.constant 2 : index
    %c0_137 = arith.constant 0 : index
    %c0_138 = arith.constant 0 : index
    %137 = vector.load %arg5[%c2_136, %c0_137, %c0_138] : memref<18x18x128xf32, #tpu.memory_space<vmem>>, vector<16x16x128xf32>
    %138 = vector.shape_cast %137 : vector<16x16x128xf32> to vector<256x128xf32>
    %139 = arith.truncf %138 : vector<256x128xf32> to vector<256x128xbf16>
    %c768_139 = arith.constant 768 : index
    %c0_140 = arith.constant 0 : index
    %140 = vector.load %arg3[%c768_139, %c0_140] : memref<1152x128xbf16, #tpu.memory_space<vmem>>, vector<128x128xbf16>
    %cst_141 = arith.constant dense<0.000000e+00> : vector<256x128xf32>
    %141 = tpu.matmul %139, %140, %cst_141 {dimension_numbers = #tpu.dot_dimension_numbers<[1], [0], [0], [1], [0, 0, 1, 1], [], []>} : vector<256x128xbf16>, vector<128x128xbf16>, vector<256x128xf32> -> vector<256x128xf32>
    %142 = arith.addf %136, %141 : vector<256x128xf32>
    %c2_142 = arith.constant 2 : index
    %c1_143 = arith.constant 1 : index
    %c0_144 = arith.constant 0 : index
    %143 = vector.load %arg5[%c2_142, %c1_143, %c0_144] : memref<18x18x128xf32, #tpu.memory_space<vmem>>, vector<16x16x128xf32>
    %144 = vector.shape_cast %143 : vector<16x16x128xf32> to vector<256x128xf32>
    %145 = arith.truncf %144 : vector<256x128xf32> to vector<256x128xbf16>
    %c896_145 = arith.constant 896 : index
    %c0_146 = arith.constant 0 : index
    %146 = vector.load %arg3[%c896_145, %c0_146] : memref<1152x128xbf16, #tpu.memory_space<vmem>>, vector<128x128xbf16>
    %cst_147 = arith.constant dense<0.000000e+00> : vector<256x128xf32>
    %147 = tpu.matmul %145, %146, %cst_147 {dimension_numbers = #tpu.dot_dimension_numbers<[1], [0], [0], [1], [0, 0, 1, 1], [], []>} : vector<256x128xbf16>, vector<128x128xbf16>, vector<256x128xf32> -> vector<256x128xf32>
    %148 = arith.addf %142, %147 : vector<256x128xf32>
    %c2_148 = arith.constant 2 : index
    %c2_149 = arith.constant 2 : index
    %c0_150 = arith.constant 0 : index
    %149 = vector.load %arg5[%c2_148, %c2_149, %c0_150] : memref<18x18x128xf32, #tpu.memory_space<vmem>>, vector<16x16x128xf32>
    %150 = vector.shape_cast %149 : vector<16x16x128xf32> to vector<256x128xf32>
    %151 = arith.truncf %150 : vector<256x128xf32> to vector<256x128xbf16>
    %c1024_151 = arith.constant 1024 : index
    %c0_152 = arith.constant 0 : index
    %152 = vector.load %arg3[%c1024_151, %c0_152] : memref<1152x128xbf16, #tpu.memory_space<vmem>>, vector<128x128xbf16>
    %cst_153 = arith.constant dense<0.000000e+00> : vector<256x128xf32>
    %153 = tpu.matmul %151, %152, %cst_153 {dimension_numbers = #tpu.dot_dimension_numbers<[1], [0], [0], [1], [0, 0, 1, 1], [], []>} : vector<256x128xbf16>, vector<128x128xbf16>, vector<256x128xf32> -> vector<256x128xf32>
    %154 = arith.addf %148, %153 : vector<256x128xf32>
    %c0_154 = arith.constant 0 : index
    %c0_155 = arith.constant 0 : index
    %155 = vector.load %arg6[%c0_154, %c0_155] : memref<256x128xf32, #tpu.memory_space<vmem>>, vector<256x128xf32>
    tpu.vector_store %arg6[%c0_154, %c0_155], %154 {strides = array<i32>} : memref<256x128xf32, #tpu.memory_space<vmem>>, vector<256x128xf32>,
    %c0_156 = arith.constant 0 : index
    %c0_157 = arith.constant 0 : index
    %156 = vector.load %arg6[%c0_156, %c0_157] : memref<256x128xf32, #tpu.memory_space<vmem>>, vector<256x128xf32>
    %cst_158 = arith.constant dense<0.000000e+00> : vector<128xf32>
    %157 = vector.multi_reduction <add>, %156, %cst_158 [0] : vector<256x128xf32> to vector<128xf32>
    %158 = vector.shape_cast %157 : vector<128xf32> to vector<1x128xf32>
    %cst_159 = arith.constant 3.906250e-03 : f32
    %159 = vector.broadcast %cst_159 : f32 to vector<1x128xf32>
    %160 = arith.mulf %158, %159 : vector<1x128xf32>
    %161 = arith.mulf %156, %156 : vector<256x128xf32>
    %cst_160 = arith.constant dense<0.000000e+00> : vector<128xf32>
    %162 = vector.multi_reduction <add>, %161, %cst_160 [0] : vector<256x128xf32> to vector<128xf32>
    %163 = vector.shape_cast %162 : vector<128xf32> to vector<1x128xf32>
    %cst_161 = arith.constant 3.906250e-03 : f32
    %164 = vector.broadcast %cst_161 : f32 to vector<1x128xf32>
    %165 = arith.mulf %163, %164 : vector<1x128xf32>
    %166 = arith.mulf %160, %160 : vector<1x128xf32>
    %167 = arith.subf %165, %166 : vector<1x128xf32>
    %cst_162 = arith.constant 0.000000e+00 : f32
    %168 = vector.broadcast %cst_162 : f32 to vector<1x128xf32>
    %169 = arith.maximumf %167, %168 : vector<1x128xf32>
    %cst_163 = arith.constant 9.99999974E-6 : f32
    %170 = vector.broadcast %cst_163 : f32 to vector<1x128xf32>
    %171 = arith.addf %169, %170 : vector<1x128xf32>
    %172 = math.rsqrt %171 : vector<1x128xf32>
    %cst_164 = arith.constant 0.000000e+00 : f32
    %173 = vector.broadcast %cst_164 : f32 to vector<1x128xf32>
    %174 = arith.subf %173, %160 : vector<1x128xf32>
    %175 = arith.mulf %174, %172 : vector<1x128xf32>
    %c0_165 = arith.constant 0 : index
    %c0_166 = arith.constant 0 : index
    %c0_167 = arith.constant 0 : index
    %c0_168 = arith.constant 0 : index
    %176 = vector.load %arg1[%c0_165, %c0_166, %c0_167, %c0_168] : memref<1x16x16x128xf32, #tpu.memory_space<vmem>>, vector<1x16x16x128xf32>
    %177 = vector.shape_cast %176 : vector<1x16x16x128xf32> to vector<16x16x128xf32>
    %178 = vector.shape_cast %177 : vector<16x16x128xf32> to vector<256x128xf32>
    %c0_169 = arith.constant 0 : index
    %c0_170 = arith.constant 0 : index
    %179 = vector.load %arg6[%c0_169, %c0_170] : memref<256x128xf32, #tpu.memory_space<vmem>>, vector<256x128xf32>
    %180 = vector.broadcast %172 : vector<1x128xf32> to vector<256x128xf32>
    %181 = arith.mulf %179, %180 : vector<256x128xf32>
    %182 = vector.broadcast %175 : vector<1x128xf32> to vector<256x128xf32>
    %183 = arith.addf %181, %182 : vector<256x128xf32>
    %184 = arith.addf %183, %178 : vector<256x128xf32>
    %185 = vector.shape_cast %184 : vector<256x128xf32> to vector<16x16x128xf32>
    %c0_171 = arith.constant 0 : index
    %c0_172 = arith.constant 0 : index
    %c0_173 = arith.constant 0 : index
    %c0_174 = arith.constant 0 : index
    %186 = vector.load %arg4[%c0_171, %c0_172, %c0_173, %c0_174] : memref<1x16x16x128xf32, #tpu.memory_space<vmem>>, vector<1x16x16x128xf32>
    %187 = vector.shape_cast %186 : vector<1x16x16x128xf32> to vector<16x16x128xf32>
    %188 = vector.shape_cast %185 : vector<16x16x128xf32> to vector<1x16x16x128xf32>
    tpu.vector_store %arg4[%c0_171, %c0_172, %c0_173, %c0_174], %188 {strides = array<i32>} : memref<1x16x16x128xf32, #tpu.memory_space<vmem>>, vector<1x16x16x128xf32>,
    return
  }
  func.func @transform_0(%arg0: i32) -> (i32, i32, i32, i32) {
    %c0_i32 = arith.constant 0 : i32
    %c0_i32_0 = arith.constant 0 : i32
    %c0_i32_1 = arith.constant 0 : i32
    %c0_i32_2 = arith.constant 0 : i32
    return %arg0, %c0_i32, %c0_i32_0, %c0_i32_1 : i32, i32, i32, i32
  }
  func.func @transform_1(%arg0: i32) -> (i32, i32) {
    %c0_i32 = arith.constant 0 : i32
    %c0_i32_0 = arith.constant 0 : i32
    %c0_i32_1 = arith.constant 0 : i32
    return %c0_i32, %c0_i32_0 : i32, i32
  }
  func.func @transform_2(%arg0: i32) -> (i32, i32) {
    %c0_i32 = arith.constant 0 : i32
    %c0_i32_0 = arith.constant 0 : i32
    %c0_i32_1 = arith.constant 0 : i32
    return %c0_i32, %c0_i32_0 : i32, i32
  }
  func.func @transform_3(%arg0: i32) -> (i32, i32, i32, i32) {
    %c0_i32 = arith.constant 0 : i32
    %c0_i32_0 = arith.constant 0 : i32
    %c0_i32_1 = arith.constant 0 : i32
    %c0_i32_2 = arith.constant 0 : i32
    return %arg0, %c0_i32, %c0_i32_0, %c0_i32_1 : i32, i32, i32, i32
  }
}

</mosaic_0001>

<bundles_post_ra>
// kernel: tpu_custom_call.1
= control target key start
LH: loop header
LB: loop body
LE: loop exit
PB: predicated region body
PF: predicated region fallthrough
CT: control target
= control target key end

     0   :  { %8 = vsyncpa [#allocation5], 0  ;;  %s10887_s0 = inlined_call_operand.hbm [shape: f32[2,16,16,128], index: 0, kind: input, shape index: {}]   ;;  %s10888_s1 = inlined_call_operand.hbm [shape: bf16[1152,128], index: 1, kind: input, shape index: {}]   ;;  %s10889_s2 = inlined_call_operand.hbm [shape: bf16[1152,128], index: 2, kind: input, shape index: {}]   ;;  %s10890_s3 = inlined_call_operand.hbm [shape: f32[2,16,16,128], index: 3, kind: output, shape index: {}]  }
   0x1   :  { %10 = vsyncpa [#allocation5 + $0x1], 0 }
   0x2   :  { %11 = vsyncpa [#allocation8], 0 }
   0x3   :  { %12 = vsyncpa [#allocation6], 0 }
   0x4   :  { %14 = vsyncpa [#allocation6 + $0x1], 0  ;;  %s8413_s12 = smov 0   ;;  %s8415_s13 = smov 0  }
   0x5   :  { %s8417_s14 = smov 0   ;;  %s8419_s15 = smov 0  }
   0x6 LB: > { %s8434_s16 = sadd.s32 4294967295, %s8381_s15   ;;  %s6552_s17 = sadd.s32 4294967294, %s8381_s15   ;;  %s8381_s15 = sphi %s8419_s15, %s11062_s15   ;;  %s8377_s14 = sphi %s8417_s14, %s11061_s14   ;;  %s8373_s13 = sphi %s8415_s13, %s11060_s13   ;;  %s8369_s12 = sphi %s8413_s12, %s11059_s12  }
   0x7   : > { %p40_p0 = scmp.ne.s32.totalorder %s8373_s13, %s8369_s12  ;;  %p10891_p1 = scmp.eq.s32.totalorder %s8434_s16, 0 }
   0x8   : > { %p112_p3 = scmp.eq.s32.totalorder %s6552_s17, 1  ;;  %p6553_p5 = scmp.ge.s32.totalorder %s8381_s15, 1 }
   0x9   : > { %p8443_p4 = por %p10891_p1, %p40_p0  ;;  %p119_p7 = scmp.lt.s32.totalorder %s8381_s15, 3 }
   0xa   : > { %p8448_p6 = por %p112_p3, %p40_p0  ;;  %s8383_s21 = smov [#allocation7]  }
   0xb   : > { %s10895_s18 = scalar_select %p8443_p4, 1, 0 }
   0xc   : > { %s10896_s19 = scalar_select %p8448_p6, 1, 0 }
   0xd   : > { %p8453_p8 = pnand %p6553_p5, %p119_p7  ;;  %s131_s22 = sshll.u32 %s8383_s21, 4  ;;  %s132_s22 = int_to_ptr.vmem [resolvable:$true] %s131_s22 }
   0xe   : > { %s8384_s24 = smov [#allocation9]   ;;  %s8244_s26 = scalar_lea.vmem %s132_s22, 9216 }
   0xf   : > { %s10897_s20 = scalar_select %p8453_p8, 1, 0 }
  0x10   : > { %p8024_p9 = pneg %p8453_p8  ;;  %s144_s25 = sshll.u32 %s8384_s24, 4  ;;  %s145_s25 = int_to_ptr.vmem [resolvable:$true] %s144_s25 }
  0x11   : > { %p8245_p13 = scmp.ne.s32.totalorder %s132_s22, %s8244_s26  ;;  %p8252_p5 = scmp.lt.s32.totalorder %s132_s22, %s132_s22 }
  0x12   : > { %p8462_p11 = pnand %p8024_p9, %p10891_p1  ;;  %p8253_p7 = scmp.lt.s32.totalorder %s8244_s26, %s8244_s26 }
  0x14   : > { %p8235_p12 = pneg %p8462_p11  ;;  %p8254_p10 = por %p8253_p7, %p8252_p5 }
  0x16   : > { %p8247_p0 = pnand %p8245_p13, %p8235_p12 }
  0x18   : > { %p8248_p3 = pneg %p8247_p0 }
  0x1a   : > { %p8255_p9 = pnand %p8254_p10, %p8248_p3 }
  0x1c   : > { %8258 = shalt.err (!%p8255_p9)
}
  0x1d   : > { %s8385_s27 = smov 64   ;;  %s8386_s28 = smov 4  }
  0x1e   : > { %8027 = dma.hbm_to_vmem [thread:$0]  (!%p8462_p11), %s10888_s1, 9216, %s132_s22, [#allocation8], %s8385_s27, %s8385_s27, %s8386_s28  }
  0x1f   : > { %s8270_s4 = scalar_lea.vmem %s145_s25, 9216  ;;  %p8278_p2 = scmp.lt.s32.totalorder %s145_s25, %s145_s25 }
  0x20   : > { %p8271_p1 = scmp.ne.s32.totalorder %s145_s25, %s8270_s4  ;;  %p8279_p6 = scmp.lt.s32.totalorder %s8270_s4, %s8270_s4 }
  0x22   : > { %p8273_p13 = pnand %p8271_p1, %p8235_p12  ;;  %p8280_p5 = por %p8279_p6, %p8278_p2 }
  0x24   : > { %p8274_p0 = pneg %p8273_p13 }
  0x26   : > { %p8281_p10 = pnand %p8280_p5, %p8274_p0 }
  0x28   : > { %8284 = shalt.err (!%p8281_p10)
}
  0x29   : > { %8030 = dma.hbm_to_vmem [thread:$0]  (!%p8462_p11), %s10889_s2, 9216, %s145_s25, [#allocation8], %s8385_s27, %s8385_s27, %s8386_s28  }
  0x2a   : > { %s8485_s7 = sadd.s32 1, %s8381_s15   ;;  %s27_s8 = sadd.s32 1, %s8377_s14 }
  0x2b   : > { %s24_s9 = ssub.s32 %s8381_s15, %s8485_s7  ;;  %p34_p1 = scmp.ne.s32.totalorder %s8377_s14, %s8373_s13 }
  0x2c   : > { %p25_p2 = scmp.eq.s32.totalorder %s24_s9, 0  ;;  %p35_p6 = scmp.eq.s32.totalorder %s8381_s15, 0 }
  0x2d   : > { %p10899_p12 = scmp.eq.s32.totalorder %s8434_s16, 1  ;;  %p8041_p7 = scmp.lt.s32.totalorder %s8381_s15, 2 }
  0x2e   : > { %s8501_s11 = scalar_select %p25_p2, %s8377_s14, %s27_s8  }
  0x2f   : > { %p8495_p3 = por %p10899_p12, %p34_p1  ;;  %p36_p9 = por %p35_p6, %p34_p1 }
  0x30   : > { %s158_s17 = sand.u32 1, %s8377_s14   ;;  %s6714_s22 = sshll.u32 %s8381_s15, 12 }
  0x31   : > { %s10900_s10 = scalar_select %p8495_p3, 1, 0 }
  0x32   : > { %s6557_s21 = sshll.u32 %s158_s17, 8  ;;  %s8508_s25 = scalar_lea.hbm %s10887_s0, %s6714_s22 }
  0x33   : > { %s162_s26 = scalar_lea.vmem [#allocation4], %s6557_s21  ;;  %p8512_p11 = pnand %p8041_p7, %p36_p9 }
  0x34   : > { %s169_s27 = sshll.u32 %s162_s26, 4  ;;  %s8516_s29 = scalar_lea.sflag [#allocation5], %s158_s17  ;;  %s8510_s27 = int_to_ptr.vmem [resolvable:$true] %s169_s27 }
  0x35   : > { %s8285_s30 = scalar_lea.hbm %s8508_s25, 4096  ;;  %p8287_p0 = pneg %p8512_p11 }
  0x36   : > { %p8286_p13 = scmp.ne.s32.totalorder %s8508_s25, %s8285_s30  ;;  %s8290_s6 = scalar_lea.hbm %s10887_s0, 8192 }
  0x37   : > { %p8291_p1 = scmp.lt.s32.totalorder %s8508_s25, %s10887_s0  ;;  %p8292_p2 = scmp.lt.s32.totalorder %s8290_s6, %s8285_s30 }
  0x38   : > { %p8288_p5 = pnand %p8287_p0, %p8286_p13 }
  0x39   : > { %p8293_p6 = por %p8292_p2, %p8291_p1 }
  0x3a   : > { %p8289_p10 = pneg %p8288_p5 }
  0x3c   : > { %p8294_p12 = pnand %p8293_p6, %p8289_p10 }
  0x3e   : > { %8297 = shalt.err (!%p8294_p12)
}
  0x3f   : > { %s8298_s17 = scalar_lea.vmem %s8510_s27, 4096  ;;  %s8387_s21 = smov [#allocation4]  }
  0x40   : > { %p8299_p7 = scmp.ne.s32.totalorder %s8510_s27, %s8298_s17  ;;  %s8303_s22 = sshll.u32 %s8387_s21, 4  ;;  %s8304_s22 = int_to_ptr.vmem [resolvable:$false] %s8303_s22 }
  0x41   : > { %s8305_s23 = scalar_lea.vmem %s8304_s22, 8192  ;;  %p8306_p5 = scmp.lt.s32.totalorder %s8510_s27, %s8304_s22 }
  0x42   : > { %p8301_p9 = pnand %p8299_p7, %p8287_p0  ;;  %p8307_p3 = scmp.lt.s32.totalorder %s8305_s23, %s8298_s17 }
  0x44   : > { %p8302_p13 = pneg %p8301_p9  ;;  %p8308_p4 = por %p8307_p3, %p8306_p5 }
  0x46   : > { %p8309_p8 = pnand %p8308_p4, %p8302_p13 }
  0x48   : > { %8312 = shalt.err (!%p8309_p8)
}
  0x49   : > { %s8388_s24 = smov 128   ;;  %s8389_s26 = smov 8  }
  0x4a   : > { %8034 = dma.hbm_to_vmem [thread:$0]  (!%p8512_p11), %s8508_s25, 4096, %s8510_s27, %s8516_s29, %s8388_s24, %s8388_s24, %s8389_s26  }
  0x4b   : > { %p10902_p0 = scmp.ne.s32.totalorder %s10897_s20, 0 }
  0x4d   : > { %181 = sbr.rel (%p10902_p0) target bundleno = 1311 (0x51f), region = 32 }
  0x52   : > { %s8540_s30 = sand.u32 1, %s8373_s13   ;;  %p10903_p4 = scmp.ne.s32.totalorder %s10895_s18, 0 }
  0x53   : > { %s6561_s4 = sshll.u32 %s8540_s30, 8  ;;  %s184_s5 = scalar_lea.sflag [#allocation5], %s8540_s30 }
  0x54   : > { %s8546_s6 = scalar_lea.vmem [#allocation4], %s6561_s4 }
  0x55   : > { %8356 = dma.done.wait (%p10903_p4), %s184_s5, 4096  }
  0x56   : > { %8358 = vsyncadd (%p10903_p4), %s184_s5, 4294963200  ;;  %p10904_p8 = scmp.eq.s32.totalorder %s8434_s16, 0 }
  0x58   : > { %8360 = dma.done.wait (%p10904_p8), [#allocation8], 18432   ;;  %p10905_p3 = pmov %p10904_p8 }
  0x59   : > { %v8085_v0 = vld [vmem:[#allocation7 + $0x78] sm:$0xff]   ;;  %v8087_v2 = vld [vmem:[#allocation7 + $0x70] sm:$0xff]   ;;  %v8089_v4 = vld [vmem:[#allocation7 + $0x68] sm:$0xff]   ;;  %s10685_s18 = scalar_lea.vmem [#allocation10], %s6561_s4  ;;  %s6715_s20 = sshll.u32 %s8434_s16, 12 }
  0x5a   : > { %8362 = vsyncadd (%p10905_p3), [#allocation8], 4294948864  ;;  %v8086_v1 = vld [vmem:[#allocation7 + $0x38] sm:$0xff]   ;;  %7148 = vmatprep.subr.bf16.mxu0 %v8085_v0  ;;  %v8088_v3 = vld [vmem:[#allocation7 + $0x30] sm:$0xff]   ;;  %s6460_s25 = sshll.u32 %s10685_s18, 4  ;;  %s10832_s28 = scalar_lea.hbm %s10890_s3, %s6715_s20  ;;  %s10834_s25 = int_to_ptr.vmem [resolvable:$true] %s6460_s25 }
  0x5b   : > { %7196 = vmatprep.subr.bf16.mxu1 %v8086_v1  ;;  %7149 = vmatpush3.bf16.msra.mxu0 %v8085_v0  ;;  %v8090_v5 = vld [vmem:[#allocation7 + $0x28] sm:$0xff]   ;;  %v8091_v6 = vld [vmem:[#allocation7 + $0x60] sm:$0xff]   ;;  %v8093_v8 = vld [vmem:[#allocation7 + $0x58] sm:$0xff]   ;;  %s6447_s29 = scalar_lea.sflag [#allocation6], %s8540_s30  ;;  %s8313_s8 = scalar_lea.vmem %s10834_s25, 4096 }
  0x5c   : > { %7197 = vmatpush3.bf16.msra.mxu1 %v8086_v1  ;;  %7150 = vmatprep.subr.bf16.mxu0 %v8087_v2  ;;  %v8092_v7 = vld [vmem:[#allocation7 + $0x20] sm:$0xff]   ;;  %v8094_v9 = vld [vmem:[#allocation7 + $0x18] sm:$0xff]   ;;  %v8095_v10 = vld [vmem:[#allocation7 + $0x50] sm:$0xff]   ;;  %p8314_p11 = scmp.ne.s32.totalorder %s10834_s25, %s8313_s8  ;;  %p11056_p10 = scmp.ne.s32.totalorder %s10900_s10, 0 }
  0x5d   : > { %7198 = vmatprep.subr.bf16.mxu1 %v8088_v3  ;;  %v8096_v11 = vld [vmem:[#allocation7 + $0x10] sm:$0xff]   ;;  %v222_v13 = vld [vmem:[%s8546_s6 + $0x18] sm:$0xff]  ;;  %v8559_v14 = vld [vmem:[%s8546_s6] sm:$0xff]  ;;  %s8390_s9 = smov [#allocation10]  }
  0x5e   : > { %v221_v12 = vld [vmem:[%s8546_s6 + $0x10] sm:$0xff]  ;;  %255 = vst [vmem:[#allocation2 + $0x39] sm:$0xff] %v222_v13  ;;  %285 = vst [vmem:[#allocation2 + $0x9] sm:$0xff] %v222_v13  ;;  %v8564_v16 = vld [vmem:[%s8546_s6 + $0x8] sm:$0xff]  ;;  %p8315_p1 = pnand %p8314_p11, %p11056_p10  ;;  %s8317_s17 = sshll.u32 %s8390_s9, 4  ;;  %s8318_s17 = int_to_ptr.vmem [resolvable:$false] %s8317_s17 }
  0x5f   : > { %7151 = vmatpush3.bf16.msra.mxu0 %v8087_v2  ;;  %254 = vst [vmem:[#allocation2 + $0x31] sm:$0xff] %v221_v12  ;;  %284 = vst [vmem:[#allocation2 + $0x1] sm:$0xff] %v221_v12  ;;  %v8561_v15 = vpack.c.bf16 %v222_v13, %v221_v12  ;;  %v8097_v17 = vld [vmem:[#allocation7 + $0x48] sm:$0xff]   ;;  %v8569_v18 = vld [vmem:[%s8546_s6 + $0x20] sm:$0xff]  ;;  %v458_v43 = vpack.c.bf16 %v8564_v16, %v8559_v14  ;;  %s8319_s21 = scalar_lea.vmem %s8318_s17, 8192  ;;  %p8320_p6 = scmp.lt.s32.totalorder %s10834_s25, %s8318_s17 }
  0x60   : > { %7199 = vmatpush3.bf16.msra.mxu1 %v8088_v3  ;;  %7152 = vmatprep.subr.bf16.mxu0 %v8089_v4  ;;  %252 = vst [vmem:[#allocation2 + $0x19] sm:$0xff] %v8559_v14  ;;  %253 = vst [vmem:[#allocation2 + $0x21] sm:$0xff] %v8564_v16  ;;  %v8572_v19 = vld [vmem:[%s8546_s6 + $0x28] sm:$0xff]  ;;  %v8578_v21 = vld [vmem:[%s8546_s6 + $0x30] sm:$0xff]  ;;  %p8316_p2 = pneg %p8315_p1  ;;  %p8321_p12 = scmp.lt.s32.totalorder %s8319_s21, %s8313_s8 }
  0x61   : > { %7200 = vmatprep.subr.bf16.mxu1 %v8090_v5  ;;  %v8098_v20 = vld [vmem:[#allocation7 + $0x8] sm:$0xff]   ;;  %7164 = vmatprep.mubr.bf16.mxu0 %v8561_v15  ;;  %256 = vst [vmem:[#allocation2 + $0x49] sm:$0xff] %v8569_v18  ;;  %257 = vst [vmem:[#allocation2 + $0x51] sm:$0xff] %v8572_v19  ;;  %v8581_v22 = vld [vmem:[%s8546_s6 + $0x38] sm:$0xff]  ;;  %v460_v0 = vpack.c.bf16 %v8572_v19, %v8569_v18 }
  0x62   : > { %v8584_v23 = vld [vmem:[%s8546_s6 + $0x40] sm:$0xff]  ;;  %258 = vst [vmem:[#allocation2 + $0x61] sm:$0xff] %v8578_v21  ;;  %259 = vst [vmem:[#allocation2 + $0x69] sm:$0xff] %v8581_v22  ;;  %v8589_v24 = vld [vmem:[%s8546_s6 + $0x48] sm:$0xff]  ;;  %p8322_p7 = por %p8321_p12, %p8320_p6 }
  0x63   : > { %7153 = vmatpush3.bf16.msra.mxu0 %v8089_v4  ;;  %260 = vst [vmem:[#allocation2 + $0x79] sm:$0xff] %v8584_v23  ;;  %261 = vst [vmem:[#allocation2 + $0x81] sm:$0xff] %v8589_v24  ;;  %v8594_v25 = vld [vmem:[%s8546_s6 + $0x50] sm:$0xff]  ;;  %v8597_v26 = vld [vmem:[%s8546_s6 + $0x58] sm:$0xff]  ;;  %v8648_v4 = vpack.c.bf16 %v8581_v22, %v8578_v21 }
  0x64   : > { %7201 = vmatpush3.bf16.msra.mxu1 %v8090_v5  ;;  %7154 = vmatprep.subr.bf16.mxu0 %v8091_v6  ;;  %262 = vst [vmem:[#allocation2 + $0x91] sm:$0xff] %v8594_v25  ;;  %263 = vst [vmem:[#allocation2 + $0x99] sm:$0xff] %v8597_v26  ;;  %v8602_v27 = vld [vmem:[%s8546_s6 + $0x60] sm:$0xff]  ;;  %v8605_v28 = vld [vmem:[%s8546_s6 + $0x68] sm:$0xff]  ;;  %p8323_p9 = pnand %p8322_p7, %p8316_p2 }
  0x65   : > { %7202 = vmatprep.subr.bf16.mxu1 %v8092_v7  ;;  %v8099_v29 = vld [vmem:[#allocation7 + $0x40] sm:$0xff]   ;;  %264 = vst [vmem:[#allocation2 + $0xa9] sm:$0xff] %v8602_v27  ;;  %265 = vst [vmem:[#allocation2 + $0xb1] sm:$0xff] %v8605_v28  ;;  %v8610_v35 = vld [vmem:[%s8546_s6 + $0x70] sm:$0xff] }
  0x66   : > { %v289_v30 = vld [vmem:[#allocation2 + $0x2] sm:$0x1]  ;;  %v8100_v32 = vld [vmem:[#allocation7] sm:$0xff]   ;;  %v8613_v36 = vld [vmem:[%s8546_s6 + $0x78] sm:$0xff]  ;;  %266 = vst [vmem:[#allocation2 + $0xc1] sm:$0xff] %v8610_v35 }
  0x67   : > { %7155 = vmatpush3.bf16.msra.mxu0 %v8091_v6  ;;  %v290_v31 = vld [vmem:[#allocation2 + $0x1a] sm:$0x1]  ;;  %307 = vst [vmem:[#allocation2] sm:$0x1] %v289_v30  ;;  %v291_v33 = vld [vmem:[#allocation2 + $0x32] sm:$0x1] }
  0x68   : > { %7203 = vmatpush3.bf16.msra.mxu1 %v8092_v7  ;;  %7156 = vmatprep.subr.bf16.mxu0 %v8093_v8  ;;  %308 = vst [vmem:[#allocation2 + $0x18] sm:$0x1] %v290_v31  ;;  %309 = vst [vmem:[#allocation2 + $0x30] sm:$0x1] %v291_v33  ;;  %v292_v34 = vld [vmem:[#allocation2 + $0x4a] sm:$0x1] }
  0x69   : > { %7204 = vmatprep.subr.bf16.mxu1 %v8094_v9  ;;  %310 = vst [vmem:[#allocation2 + $0x48] sm:$0x1] %v292_v34  ;;  %v8101_v37 = vld [vmem:[#allocation7 + $0xb8] sm:$0xff]   ;;  %v293_v38 = vld [vmem:[#allocation2 + $0x62] sm:$0x1]  ;;  %267 = vst [vmem:[#allocation2 + $0xc9] sm:$0xff] %v8613_v36 }
  0x6a   : > { %v294_v39 = vld [vmem:[#allocation2 + $0x7a] sm:$0x1]  ;;  %v362_v40 = vld [vmem:[#allocation2 + $0x8] sm:$0xff]  ;;  %311 = vst [vmem:[#allocation2 + $0x60] sm:$0x1] %v293_v38  ;;  %v8618_v41 = vld [vmem:[%s8546_s6 + $0x80] sm:$0xff] }
  0x6b   : > { %7157 = vmatpush3.bf16.msra.mxu0 %v8093_v8  ;;  %312 = vst [vmem:[#allocation2 + $0x78] sm:$0x1] %v294_v39  ;;  %v8621_v42 = vld [vmem:[%s8546_s6 + $0x88] sm:$0xff]  ;;  %v364_v44 = vld [vmem:[#allocation2 + $0x20] sm:$0xff]  ;;  %v295_v45 = vld [vmem:[#allocation2 + $0x92] sm:$0x1] }
  0x6c   : > { %7205 = vmatpush3.bf16.msra.mxu1 %v8094_v9  ;;  %7158 = vmatprep.subr.bf16.mxu0 %v8095_v10  ;;  %268 = vst [vmem:[#allocation2 + $0xd9] sm:$0xff] %v8618_v41  ;;  %269 = vst [vmem:[#allocation2 + $0xe1] sm:$0xff] %v8621_v42  ;;  %v366_v46 = vld [vmem:[#allocation2 + $0x38] sm:$0xff]  ;;  %v296_v47 = vld [vmem:[#allocation2 + $0xaa] sm:$0x1] }
  0x6d   : > { %7206 = vmatprep.subr.bf16.mxu1 %v8096_v11  ;;  %313 = vst [vmem:[#allocation2 + $0x90] sm:$0x1] %v295_v45  ;;  %v8102_v50 = vld [vmem:[#allocation7 + $0xb0] sm:$0xff]   ;;  %314 = vst [vmem:[#allocation2 + $0xa8] sm:$0x1] %v296_v47  ;;  %v8106_v55 = vld [vmem:[#allocation7 + $0xf8] sm:$0xff]   ;;  %v8715_v45 = vpack.c.bf16 %v8605_v28, %v8602_v27  ;;  %v8719_v47 = vpack.c.bf16 %v8613_v36, %v8610_v35 }
  0x6e   : > { %v361_v48 = vld [vmem:[#allocation2] sm:$0xff]  ;;  %v8103_v56 = vld [vmem:[#allocation7 + $0xa8] sm:$0xff]   ;;  %v368_v58 = vld [vmem:[#allocation2 + $0x50] sm:$0xff] }
  0x6f   : > { %7159 = vmatpush3.bf16.msra.mxu0 %v8095_v10  ;;  %v363_v49 = vld [vmem:[#allocation2 + $0x18] sm:$0xff]  ;;  %v393_v51 = vpack.c.bf16 %v362_v40, %v361_v48  ;;  %v365_v53 = vld [vmem:[#allocation2 + $0x30] sm:$0xff]  ;;  %v297_v57 = vld [vmem:[#allocation2 + $0xc2] sm:$0x1] }
  0x70   : > { %7207 = vmatpush3.bf16.msra.mxu1 %v8096_v11  ;;  %7160 = vmatprep.subr.bf16.mxu0 %v8097_v17  ;;  %v8627_v52 = vpack.c.bf16 %v364_v44, %v363_v49  ;;  %v8629_v54 = vpack.c.bf16 %v366_v46, %v365_v53  ;;  %v370_v59 = vld [vmem:[#allocation2 + $0x68] sm:$0xff]  ;;  %315 = vst [vmem:[#allocation2 + $0xc0] sm:$0x1] %v297_v57  ;;  %v8107_v60 = vld [vmem:[#allocation7 + $0xf0] sm:$0xff]   ;;  %v8644_v3 = vld [vmem:[%s8546_s6 + $0xa0] sm:$0xff] }
  0x71   : > { %7208 = vmatprep.subr.bf16.mxu1 %v8098_v20  ;;  %7212 = vmatprep.mubr.bf16.mxu1 %v393_v51  ;;  %v367_v61 = vld [vmem:[#allocation2 + $0x48] sm:$0xff]  ;;  %v8635_v63 = vld [vmem:[%s8546_s6 + $0x90] sm:$0xff]  ;;  %v8652_v5 = vld [vmem:[%s8546_s6 + $0xa8] sm:$0xff]  ;;  %272 = vst [vmem:[#allocation2 + $0x109] sm:$0xff] %v8644_v3 }
  0x72   : > { %v369_v1 = vld [vmem:[#allocation2 + $0x60] sm:$0xff]  ;;  %v8640_v2 = vld [vmem:[%s8546_s6 + $0x98] sm:$0xff]  ;;  %270 = vst [vmem:[#allocation2 + $0xf1] sm:$0xff] %v8635_v63  ;;  %v8655_v6 = vpack.c.bf16 %v368_v58, %v367_v61  ;;  %v8104_v7 = vld [vmem:[#allocation7 + $0xa0] sm:$0xff]   ;;  %v8733_v61 = vpack.c.bf16 %v8621_v42, %v8618_v41 }
  0x73   : > { %7161 = vmatpush3.bf16.msra.mxu0 %v8097_v17  ;;  %v298_v62 = vld [vmem:[#allocation2 + $0xda] sm:$0x1]  ;;  %271 = vst [vmem:[#allocation2 + $0xf9] sm:$0xff] %v8640_v2  ;;  %273 = vst [vmem:[#allocation2 + $0x111] sm:$0xff] %v8652_v5  ;;  %v8658_v8 = vpack.c.bf16 %v370_v59, %v369_v1  ;;  %v8661_v10 = vld [vmem:[%s8546_s6 + $0xb0] sm:$0xff] }
  0x74   : > { %7209 = vmatpush3.bf16.msra.mxu1 %v8098_v20  ;;  %7162 = vmatprep.subr.bf16.mxu0 %v8099_v29  ;;  %316 = vst [vmem:[#allocation2 + $0xd8] sm:$0x1] %v298_v62  ;;  %v8109_v9 = vld [vmem:[#allocation7 + $0xe8] sm:$0xff]   ;;  %v372_v11 = vld [vmem:[#allocation2 + $0x80] sm:$0xff]  ;;  %v8105_v12 = vld [vmem:[#allocation7 + $0x98] sm:$0xff]   ;;  %v8681_v20 = vpack.c.bf16 %v8589_v24, %v8584_v23 }
  0x75   : > { %7210 = vmatprep.subr.bf16.mxu1 %v8100_v32  ;;  %v8665_v13 = vld [vmem:[%s8546_s6 + $0xb8] sm:$0xff]  ;;  %274 = vst [vmem:[#allocation2 + $0x121] sm:$0xff] %v8661_v10  ;;  %v8669_v14 = vld [vmem:[%s8546_s6 + $0xc0] sm:$0xff]  ;;  %v8674_v16 = vld [vmem:[%s8546_s6 + $0xc8] sm:$0xff] }
  0x76   : > { %275 = vst [vmem:[#allocation2 + $0x129] sm:$0xff] %v8665_v13  ;;  %276 = vst [vmem:[#allocation2 + $0x139] sm:$0xff] %v8669_v14  ;;  %v371_v17 = vld [vmem:[#allocation2 + $0x78] sm:$0xff]  ;;  %v373_v18 = vld [vmem:[#allocation2 + $0x90] sm:$0xff] }
  0x77   : > { %7163 = vmatpush3.bf16.msra.mxu0 %v8099_v29  ;;  %277 = vst [vmem:[#allocation2 + $0x141] sm:$0xff] %v8674_v16  ;;  %v8110_v22 = vld [vmem:[#allocation7 + $0xe0] sm:$0xff]   ;;  %v8685_v29 = vpack.c.bf16 %v8597_v26, %v8594_v25  ;;  %v8108_v30 = vld [vmem:[#allocation7 + $0x90] sm:$0xff]   ;;  %v8687_v31 = vpack.c.bf16 %v372_v11, %v371_v17  ;;  %v8695_v24 = vld [vmem:[%s8546_s6 + $0xd8] sm:$0xff]  ;;  %v8750_v17 = vpack.c.bf16 %v8652_v5, %v8644_v3 }
  0x78   : > { %7211 = vmatpush3.bf16.msra.mxu1 %v8100_v32  ;;  %7244 = vmatprep.subr.bf16.mxu0 %v8101_v37  ;;  %v300_v21 = vld [vmem:[#allocation2 + $0x10a] sm:$0x1]  ;;  %v8692_v23 = vld [vmem:[%s8546_s6 + $0xd0] sm:$0xff]  ;;  %v8698_v34 = vld [vmem:[%s8546_s6 + $0xe0] sm:$0xff]  ;;  %279 = vst [vmem:[#allocation2 + $0x159] sm:$0xff] %v8695_v24 }
  0x79   : > { %7292 = vmatprep.subr.bf16.mxu1 %v8106_v55  ;;  %v299_v19 = vld [vmem:[#allocation2 + $0xf2] sm:$0x1]  ;;  %318 = vst [vmem:[#allocation2 + $0x108] sm:$0x1] %v300_v21  ;;  %v8112_v32 = vld [vmem:[#allocation7 + $0xd8] sm:$0xff]   ;;  %278 = vst [vmem:[#allocation2 + $0x151] sm:$0xff] %v8692_v23  ;;  %v8754_v21 = vpack.c.bf16 %v8665_v13, %v8661_v10 }
  0x7a   : > { %7165 = vmatmul.mubr.bf16.vlgmr.msra.gmra.mxu0 %v458_v43  ;;  %317 = vst [vmem:[#allocation2 + $0xf0] sm:$0x1] %v299_v19  ;;  %v8704_v26 = vld [vmem:[%s8546_s6 + $0xe8] sm:$0xff]  ;;  %280 = vst [vmem:[#allocation2 + $0x169] sm:$0xff] %v8698_v34  ;;  %v378_v39 = vld [vmem:[#allocation2 + $0xc8] sm:$0xff] }
  0x7b   : > { %7245 = vmatpush3.bf16.msra.mxu0 %v8101_v37  ;;  %7213 = vmatmul.mubr.bf16.vlgmr.msra.gmra.mxu1 %v8627_v52  ;;  %287 = vst [vmem:[#allocation2 + $0x199] sm:$0xff] %v8698_v34  ;;  %v376_v37 = vld [vmem:[#allocation2 + $0xb0] sm:$0xff]  ;;  %281 = vst [vmem:[#allocation2 + $0x171] sm:$0xff] %v8704_v26  ;;  %v8111_v40 = vld [vmem:[#allocation7 + $0x88] sm:$0xff]  }
  0x7c   : > { %7168 = vmatprep.mubr.bf16.mxu0 %v8561_v15  ;;  %7216 = vmatprep.mubr.bf16.mxu1 %v8629_v54  ;;  %v374_v15 = vld [vmem:[#allocation2 + $0x98] sm:$0xff]  ;;  %v301_v25 = vld [vmem:[#allocation2 + $0x122] sm:$0x1]  ;;  %288 = vst [vmem:[#allocation2 + $0x1a1] sm:$0xff] %v8704_v26  ;;  %v375_v43 = vld [vmem:[#allocation2 + $0xa8] sm:$0xff] }
  0x7d   : > { %7246 = vmatprep.subr.bf16.mxu0 %v8102_v50  ;;  %7293 = vmatpush3.bf16.msra.mxu1 %v8106_v55  ;;  %v8689_v33 = vpack.c.bf16 %v374_v15, %v373_v18  ;;  %319 = vst [vmem:[#allocation2 + $0x120] sm:$0x1] %v301_v25  ;;  %v302_v38 = vld [vmem:[#allocation2 + $0x13a] sm:$0x1]  ;;  %v377_v44 = vld [vmem:[#allocation2 + $0xc0] sm:$0xff]  ;;  %v8721_v49 = vpack.c.bf16 %v376_v37, %v375_v43  ;;  %v8728_v58 = vld [vmem:[#allocation7 + $0x138] sm:$0xff]  }
  0x7e   : > { %7294 = vmatprep.subr.bf16.mxu1 %v8107_v60  ;;  %320 = vst [vmem:[#allocation2 + $0x138] sm:$0x1] %v302_v38  ;;  %v8113_v46 = vld [vmem:[#allocation7 + $0xd0] sm:$0xff]   ;;  %v325_v48 = vld [vmem:[#allocation2 + $0xf] sm:$0x1]  ;;  %v8723_v53 = vpack.c.bf16 %v378_v39, %v377_v44  ;;  %v8115_v28 = vld [vmem:[#allocation7 + $0xc8] sm:$0xff]   ;;  %v8769_v37 = vpack.c.bf16 %v8674_v16, %v8669_v14  ;;  %v8773_v39 = vpack.c.bf16 %v8695_v24, %v8692_v23 }
  0x7f   : > { %7247 = vmatpush3.bf16.msra.mxu0 %v8102_v50  ;;  %v8114_v50 = vld [vmem:[#allocation7 + $0x80] sm:$0xff]   ;;  %343 = vst [vmem:[#allocation2 + $0x11] sm:$0x1] %v325_v48  ;;  %v326_v51 = vld [vmem:[#allocation2 + $0x27] sm:$0x1]  ;;  %v379_v35 = vld [vmem:[#allocation2 + $0xd8] sm:$0xff] }
  0x80   : > { %7248 = vmatprep.subr.bf16.mxu0 %v8103_v56  ;;  %v303_v55 = vld [vmem:[#allocation2 + $0x152] sm:$0x1]  ;;  %344 = vst [vmem:[#allocation2 + $0x29] sm:$0x1] %v326_v51  ;;  %v380_v36 = vld [vmem:[#allocation2 + $0xe0] sm:$0xff]  ;;  %v382_v57 = vld [vmem:[#allocation2 + $0xf8] sm:$0xff]  ;;  %v8785_v51 = vpack.c.bf16 %v8704_v26, %v8698_v34 }
  0x81   : > { %7295 = vmatpush3.bf16.msra.mxu1 %v8107_v60  ;;  %v304_v27 = vld [vmem:[#allocation2 + $0x16a] sm:$0x1]  ;;  %321 = vst [vmem:[#allocation2 + $0x150] sm:$0x1] %v303_v55  ;;  %v328_v59 = vld [vmem:[#allocation2 + $0x57] sm:$0x1] }
  0x82   : > { %7169 = vmatmul.mubr.bf16.gmra.mxu0 %v460_v0  ;;  %7296 = vmatprep.subr.bf16.mxu1 %v8109_v9  ;;  %322 = vst [vmem:[#allocation2 + $0x168] sm:$0x1] %v304_v27  ;;  %v381_v60 = vld [vmem:[#allocation2 + $0xf0] sm:$0xff]  ;;  %346 = vst [vmem:[#allocation2 + $0x59] sm:$0x1] %v328_v59  ;;  %v386_v19 = vld [vmem:[#allocation2 + $0x128] sm:$0xff] }
  0x83   : > { %7172 = vmatprep.mubr.bf16.mxu0 %v8648_v4  ;;  %7249 = vmatpush3.bf16.msra.mxu0 %v8103_v56  ;;  %v327_v56 = vld [vmem:[#allocation2 + $0x3f] sm:$0x1]  ;;  %v8116_v62 = vld [vmem:[#allocation7 + $0xc0] sm:$0xff]   ;;  %v329_v0 = vld [vmem:[#allocation2 + $0x6f] sm:$0x1]  ;;  %v8742_v11 = vpack.c.bf16 %v382_v57, %v381_v60 }
  0x84   : > { %7217 = vmatmul.mubr.bf16.gmra.mxu1 %v8655_v6  ;;  %7250 = vmatprep.subr.bf16.mxu0 %v8104_v7  ;;  %345 = vst [vmem:[#allocation2 + $0x41] sm:$0x1] %v327_v56  ;;  %v330_v1 = vld [vmem:[#allocation2 + $0x87] sm:$0x1]  ;;  %347 = vst [vmem:[#allocation2 + $0x71] sm:$0x1] %v329_v0 }
  0x85   : > { %7220 = vmatprep.mubr.bf16.mxu1 %v8658_v8  ;;  %7297 = vmatpush3.bf16.msra.mxu1 %v8109_v9  ;;  %348 = vst [vmem:[#allocation2 + $0x89] sm:$0x1] %v330_v1  ;;  %v8739_v9 = vpack.c.bf16 %v380_v36, %v379_v35  ;;  %v331_v41 = vld [vmem:[#allocation2 + $0x9f] sm:$0x1]  ;;  %v332_v42 = vld [vmem:[#allocation2 + $0xb7] sm:$0x1] }
  0x86   : > { %7298 = vmatprep.subr.bf16.mxu1 %v8110_v22  ;;  %349 = vst [vmem:[#allocation2 + $0xa1] sm:$0x1] %v331_v41  ;;  %350 = vst [vmem:[#allocation2 + $0xb9] sm:$0x1] %v332_v42  ;;  %v334_v15 = vld [vmem:[#allocation2 + $0xe7] sm:$0x1] }
  0x87   : > { %7251 = vmatpush3.bf16.msra.mxu0 %v8104_v7  ;;  %v8737_v7 = vpack.c.bf16 %v8640_v2, %v8635_v63  ;;  %v333_v63 = vld [vmem:[#allocation2 + $0xcf] sm:$0x1]  ;;  %v385_v18 = vld [vmem:[#allocation2 + $0x120] sm:$0xff]  ;;  %352 = vst [vmem:[#allocation2 + $0xe9] sm:$0x1] %v334_v15  ;;  %v390_v10 = vld [vmem:[#allocation2 + $0x158] sm:$0xff] }
  0x88   : > { %7252 = vmatprep.subr.bf16.mxu0 %v8105_v12  ;;  %v383_v2 = vld [vmem:[#allocation2 + $0x108] sm:$0xff]  ;;  %351 = vst [vmem:[#allocation2 + $0xd1] sm:$0x1] %v333_v63  ;;  %v335_v25 = vld [vmem:[#allocation2 + $0xff] sm:$0x1]  ;;  %v388_v5 = vld [vmem:[#allocation2 + $0x140] sm:$0xff] }
  0x89   : > { %7299 = vmatpush3.bf16.msra.mxu1 %v8110_v22  ;;  %353 = vst [vmem:[#allocation2 + $0x101] sm:$0x1] %v335_v25  ;;  %v336_v3 = vld [vmem:[#allocation2 + $0x117] sm:$0x1]  ;;  %v387_v13 = vld [vmem:[#allocation2 + $0x138] sm:$0xff]  ;;  %v907_v14 = vld [vmem:[#allocation2 + $0x2] sm:$0xff] }
  0x8a   : > { %7173 = vmatmul.mubr.bf16.gmra.mxu0 %v8681_v20  ;;  %7300 = vmatprep.subr.bf16.mxu1 %v8112_v32  ;;  %354 = vst [vmem:[#allocation2 + $0x119] sm:$0x1] %v336_v3  ;;  %v389_v38 = vld [vmem:[#allocation2 + $0x150] sm:$0xff]  ;;  %v8775_v43 = vpack.c.bf16 %v388_v5, %v387_v13  ;;  %v338_v44 = vld [vmem:[#allocation2 + $0x147] sm:$0x1]  ;;  %v391_v48 = vld [vmem:[#allocation2 + $0x168] sm:$0xff] }
  0x8b   : > { %7176 = vmatprep.mubr.bf16.mxu0 %v8685_v29  ;;  %7253 = vmatpush3.bf16.msra.mxu0 %v8105_v12  ;;  %v384_v12 = vld [vmem:[#allocation2 + $0x110] sm:$0xff]  ;;  %356 = vst [vmem:[#allocation2 + $0x149] sm:$0x1] %v338_v44  ;;  %v339_v24 = vld [vmem:[#allocation2 + $0x15f] sm:$0x1]  ;;  %v249_v55 = vld [vmem:[%s8546_s6 + $0xf0] sm:$0xff] }
  0x8c   : > { %7221 = vmatmul.mubr.bf16.gmra.mxu1 %v8687_v31  ;;  %7254 = vmatprep.subr.bf16.mxu0 %v8108_v30  ;;  %v8756_v22 = vpack.c.bf16 %v384_v12, %v383_v2  ;;  %v392_v16 = vld [vmem:[#allocation2 + $0x170] sm:$0xff]  ;;  %357 = vst [vmem:[#allocation2 + $0x161] sm:$0x1] %v339_v24  ;;  %282 = vst [vmem:[#allocation2 + $0x181] sm:$0xff] %v249_v55  ;;  %v909_v56 = vld [vmem:[#allocation2 + $0x1a] sm:$0xff] }
  0x8d   : > { %7224 = vmatprep.mubr.bf16.mxu1 %v8689_v33  ;;  %7301 = vmatpush3.bf16.msra.mxu1 %v8112_v32  ;;  %v8760_v32 = vpack.c.bf16 %v386_v19, %v385_v18  ;;  %v908_v23 = vld [vmem:[#allocation2 + $0xa] sm:$0xff]  ;;  %v8789_v35 = vpack.c.bf16 %v392_v16, %v391_v48  ;;  %v910_v57 = vld [vmem:[#allocation2 + $0x22] sm:$0xff]  ;;  %v911_v59 = vld [vmem:[#allocation2 + $0x32] sm:$0xff] }
  0x8e   : > { %7302 = vmatprep.subr.bf16.mxu1 %v8113_v46  ;;  %v939_v27 = vpack.c.bf16 %v908_v23, %v907_v14  ;;  %v912_v34 = vld [vmem:[#allocation2 + $0x3a] sm:$0xff]  ;;  %v8796_v26 = vpack.c.bf16 %v910_v57, %v909_v56  ;;  %v913_v1 = vld [vmem:[#allocation2 + $0x4a] sm:$0xff]  ;;  %v915_v41 = vld [vmem:[#allocation2 + $0x62] sm:$0xff] }
  0x8f   : > { %7255 = vmatpush3.bf16.msra.mxu0 %v8108_v30  ;;  %v8758_v30 = vld [vmem:[#allocation7 + $0x178] sm:$0xff]   ;;  %v8118_v0 = vld [vmem:[#allocation7 + $0x130] sm:$0xff]   ;;  %v8119_v42 = vld [vmem:[#allocation7 + $0x128] sm:$0xff]  }
  0x90   : > { %7256 = vmatprep.subr.bf16.mxu0 %v8111_v40  ;;  %v8123_v63 = vld [vmem:[#allocation7 + $0x170] sm:$0xff]   ;;  %v914_v2 = vld [vmem:[#allocation2 + $0x52] sm:$0xff]  ;;  %v8128_v13 = vld [vmem:[#allocation7 + $0x158] sm:$0xff]  }
  0x91   : > { %7303 = vmatpush3.bf16.msra.mxu1 %v8113_v46  ;;  %v8777_v46 = vpack.c.bf16 %v390_v10, %v389_v38  ;;  %v8806_v12 = vpack.c.bf16 %v914_v2, %v913_v1  ;;  %v8125_v15 = vld [vmem:[#allocation7 + $0x168] sm:$0xff]   ;;  %v918_v25 = vld [vmem:[#allocation2 + $0x82] sm:$0xff]  ;;  %v8126_v3 = vld [vmem:[#allocation7 + $0x160] sm:$0xff]  }
  0x92   : > { %7177 = vmatmul.mubr.bf16.gmra.mxu0 %v8715_v45  ;;  %7304 = vmatprep.subr.bf16.mxu1 %v8115_v28  ;;  %v917_v19 = vld [vmem:[#allocation2 + $0x7a] sm:$0xff]  ;;  %v921_v44 = vld [vmem:[#allocation2 + $0xaa] sm:$0xff]  ;;  %v922_v14 = vld [vmem:[#allocation2 + $0xb2] sm:$0xff] }
  0x93   : > { %7180 = vmatprep.mubr.bf16.mxu0 %v8719_v47  ;;  %7257 = vmatpush3.bf16.msra.mxu0 %v8111_v40  ;;  %v337_v40 = vld [vmem:[#allocation2 + $0x12f] sm:$0x1]  ;;  %v305_v60 = vld [vmem:[#allocation2 + $0x182] sm:$0x1]  ;;  %v920_v5 = vld [vmem:[#allocation2 + $0x9a] sm:$0xff]  ;;  %v8814_v10 = vpack.c.bf16 %v918_v25, %v917_v19  ;;  %v8822_v24 = vpack.c.bf16 %v922_v14, %v921_v44 }
  0x94   : > { %7225 = vmatmul.mubr.bf16.gmra.mxu1 %v8721_v49  ;;  %7258 = vmatprep.subr.bf16.mxu0 %v8114_v50  ;;  %355 = vst [vmem:[#allocation2 + $0x131] sm:$0x1] %v337_v40  ;;  %323 = vst [vmem:[#allocation2 + $0x180] sm:$0x1] %v305_v60  ;;  %v8124_v40 = vld [vmem:[#allocation7 + $0x110] sm:$0xff]   ;;  %v924_v16 = vld [vmem:[#allocation2 + $0xca] sm:$0xff] }
  0x95   : > { %7228 = vmatprep.mubr.bf16.mxu1 %v8723_v53  ;;  %7305 = vmatpush3.bf16.msra.mxu1 %v8115_v28  ;;  %v250_v28 = vld [vmem:[%s8546_s6 + $0xf8] sm:$0xff]  ;;  %v8127_v23 = vld [vmem:[#allocation7 + $0x108] sm:$0xff]   ;;  %v8132_v56 = vld [vmem:[#allocation7 + $0x140] sm:$0xff]  }
  0x96   : > { %7306 = vmatprep.subr.bf16.mxu1 %v8116_v62  ;;  %283 = vst [vmem:[#allocation2 + $0x189] sm:$0xff] %v250_v28  ;;  %v8791_v36 = vpack.c.bf16 %v250_v28, %v249_v55  ;;  %v8131_v48 = vld [vmem:[#allocation7 + $0x148] sm:$0xff]   ;;  %v8130_v55 = vld [vmem:[#allocation7 + $0x100] sm:$0xff]   ;;  %v8133_v57 = vld [vmem:[#allocation7 + $0x1b8] sm:$0xff]  }
  0x97   : > { %7259 = vmatpush3.bf16.msra.mxu0 %v8114_v50  ;;  %v340_v50 = vld [vmem:[#allocation2 + $0x177] sm:$0x1]  ;;  %v931_v1 = vld [vmem:[#allocation2 + $0x122] sm:$0xff]  ;;  %v306_v19 = vld [vmem:[#allocation2 + $0x19a] sm:$0x1] }
  0x98   : > { %7340 = vmatprep.subr.bf16.mxu0 %v8728_v58  ;;  %358 = vst [vmem:[#allocation2 + $0x179] sm:$0x1] %v340_v50  ;;  %v927_v28 = vld [vmem:[#allocation2 + $0xf2] sm:$0xff]  ;;  %324 = vst [vmem:[#allocation2 + $0x198] sm:$0x1] %v306_v19  ;;  %v8134_v14 = vld [vmem:[#allocation7 + $0x1b0] sm:$0xff]  }
  0x99   : > { %7307 = vmatpush3.bf16.msra.mxu1 %v8116_v62  ;;  %v8798_v62 = vpack.c.bf16 %v912_v34, %v911_v59  ;;  %v8138_v59 = vld [vmem:[#allocation7 + $0x1f8] sm:$0xff]   ;;  %v935_v2 = vld [vmem:[#allocation2 + $0x152] sm:$0xff] }
  0x9a   : > { %7181 = vmatmul.mubr.bf16.gmra.mxu0 %v8733_v61  ;;  %7388 = vmatprep.subr.bf16.mxu1 %v8758_v30  ;;  %v1517_v25 = vld [vmem:[#allocation2 + $0x19] sm:$0xff]  ;;  %v1522_v44 = vld [vmem:[#allocation2 + $0x51] sm:$0xff] }
  0x9b   : > { %7184 = vmatprep.mubr.bf16.mxu0 %v8737_v7 }
  0x9c   : > { %7229 = vmatmul.mubr.bf16.gmra.mxu1 %v8739_v9 }
  0x9d   : > { %7232 = vmatprep.mubr.bf16.mxu1 %v8742_v11 }
  0xa2   : > { %7185 = vmatmul.mubr.bf16.gmra.mxu0 %v8750_v17 }
  0xa3   : > { %7188 = vmatprep.mubr.bf16.mxu0 %v8754_v21 }
  0xa4   : > { %7233 = vmatmul.mubr.bf16.gmra.mxu1 %v8756_v22 }
  0xa5   : > { %7236 = vmatprep.mubr.bf16.mxu1 %v8760_v32 }
  0xaa   : > { %7189 = vmatmul.mubr.bf16.gmra.mxu0 %v8769_v37 }
  0xab   : > { %7192 = vmatprep.mubr.bf16.mxu0 %v8773_v39 }
  0xac   : > { %7237 = vmatmul.mubr.bf16.gmra.mxu1 %v8775_v43 }
  0xad   : > { %7240 = vmatprep.mubr.bf16.mxu1 %v8777_v46 }
  0xb2   : > { %7193 = vmatmul.mubr.bf16.gmra.mxu0 %v8785_v51 }
  0xb3   : > { %7260 = vmatprep.mubr.bf16.mxu0 %v939_v27  ;;  %v925_v27 = vld [vmem:[#allocation2 + $0xda] sm:$0xff] }
  0xb4   : > { %7241 = vmatmul.mubr.bf16.gmra.mxu1 %v8789_v35 }
  0xb5   : > { %7308 = vmatprep.mubr.bf16.mxu1 %v8627_v52  ;;  %v916_v52 = vld [vmem:[#allocation2 + $0x6a] sm:$0xff] }
  0xb6   : > { %v8808_v18 = vpack.c.bf16 %v916_v52, %v915_v41  ;;  %v932_v41 = vld [vmem:[#allocation2 + $0x12a] sm:$0xff]  ;;  %v934_v52 = vld [vmem:[#allocation2 + $0x142] sm:$0xff] }
  0xba   : > { %7261 = vmatmul.mubr.bf16.vlgmr.msra.gmra.mxu0 %v8796_v26 }
  0xbb   : > { %7341 = vmatpush3.bf16.msra.mxu0 %v8728_v58  ;;  %7264 = vmatprep.mubr.bf16.mxu0 %v8798_v62  ;;  %v8120_v58 = vld [vmem:[#allocation7 + $0x120] sm:$0xff]  }
  0xbc   : > { %7309 = vmatmul.mubr.bf16.vlgmr.msra.gmra.mxu1 %v8629_v54  ;;  %7342 = vmatprep.subr.bf16.mxu0 %v8118_v0  ;;  %v919_v54 = vld [vmem:[#allocation2 + $0x92] sm:$0xff] }
  0xbd   : > { %7312 = vmatprep.mubr.bf16.mxu1 %v8655_v6  ;;  %7389 = vmatpush3.bf16.msra.mxu1 %v8758_v30  ;;  %v8121_v6 = vld [vmem:[#allocation7 + $0x118] sm:$0xff]   ;;  %v8816_v38 = vpack.c.bf16 %v920_v5, %v919_v54 }
  0xbe   : > { %7390 = vmatprep.subr.bf16.mxu1 %v8123_v63  ;;  %v341_v30 = vld [vmem:[#allocation2 + $0x18f] sm:$0x1]  ;;  %v1518_v54 = vld [vmem:[#allocation2 + $0x21] sm:$0xff] }
  0xbf   : > { %7343 = vmatpush3.bf16.msra.mxu0 %v8118_v0  ;;  %359 = vst [vmem:[#allocation2 + $0x191] sm:$0x1] %v341_v30  ;;  %v929_v0 = vld [vmem:[#allocation2 + $0x10a] sm:$0xff]  ;;  %v1549_v30 = vpack.c.bf16 %v1518_v54, %v1517_v25 }
  0xc0   : > { %7344 = vmatprep.subr.bf16.mxu0 %v8119_v42 }
  0xc1   : > { %7391 = vmatpush3.bf16.msra.mxu1 %v8123_v63  ;;  %v933_v63 = vld [vmem:[#allocation2 + $0x13a] sm:$0xff] }
  0xc2   : > { %7265 = vmatmul.mubr.bf16.gmra.mxu0 %v8806_v12  ;;  %7392 = vmatprep.subr.bf16.mxu1 %v8125_v15 }
  0xc3   : > { %7268 = vmatprep.mubr.bf16.mxu0 %v8808_v18  ;;  %7345 = vmatpush3.bf16.msra.mxu0 %v8119_v42  ;;  %v8840_v42 = vpack.c.bf16 %v932_v41, %v931_v1  ;;  %v2137_v41 = vld [vmem:[#allocation2 + $0x98] sm:$0xff] }
  0xc4   : > { %7313 = vmatmul.mubr.bf16.gmra.mxu1 %v8658_v8  ;;  %7346 = vmatprep.subr.bf16.mxu0 %v8120_v58  ;;  %v8129_v8 = vld [vmem:[#allocation7 + $0x150] sm:$0xff]  }
  0xc5   : > { %7316 = vmatprep.mubr.bf16.mxu1 %v8687_v31  ;;  %7393 = vmatpush3.bf16.msra.mxu1 %v8125_v15  ;;  %v923_v31 = vld [vmem:[#allocation2 + $0xc2] sm:$0xff]  ;;  %v936_v15 = vld [vmem:[#allocation2 + $0x15a] sm:$0xff] }
  0xc6   : > { %7394 = vmatprep.subr.bf16.mxu1 %v8126_v3  ;;  %v8824_v50 = vpack.c.bf16 %v924_v16, %v923_v31  ;;  %v8139_v31 = vld [vmem:[#allocation7 + $0x1f0] sm:$0xff]   ;;  %v8135_v16 = vld [vmem:[#allocation7 + $0x1a8] sm:$0xff]  }
  0xc7   : > { %7347 = vmatpush3.bf16.msra.mxu0 %v8120_v58  ;;  %v8846_v58 = vpack.c.bf16 %v934_v52, %v933_v63  ;;  %v2439_v63 = vld [vmem:[#allocation2 + $0x79] sm:$0xff] }
  0xc8   : > { %7348 = vmatprep.subr.bf16.mxu0 %v8121_v6 }
  0xc9   : > { %7395 = vmatpush3.bf16.msra.mxu1 %v8126_v3  ;;  %v938_v3 = vld [vmem:[#allocation2 + $0x172] sm:$0xff] }
  0xca   : > { %7269 = vmatmul.mubr.bf16.gmra.mxu0 %v8814_v10  ;;  %7396 = vmatprep.subr.bf16.mxu1 %v8128_v13 }
  0xcb   : > { %7272 = vmatprep.mubr.bf16.mxu0 %v8816_v38  ;;  %7349 = vmatpush3.bf16.msra.mxu0 %v8121_v6  ;;  %v1243_v6 = vld [vmem:[#allocation2 + $0x188] sm:$0xff] }
  0xcc   : > { %7317 = vmatmul.mubr.bf16.gmra.mxu1 %v8689_v33  ;;  %7350 = vmatprep.subr.bf16.mxu0 %v8124_v40  ;;  %v926_v33 = vld [vmem:[#allocation2 + $0xe2] sm:$0xff] }
  0xcd   : > { %7320 = vmatprep.mubr.bf16.mxu1 %v8721_v49  ;;  %7397 = vmatpush3.bf16.msra.mxu1 %v8128_v13  ;;  %v928_v49 = vld [vmem:[#allocation2 + $0xfa] sm:$0xff]  ;;  %v8830_v34 = vpack.c.bf16 %v926_v33, %v925_v27  ;;  %v1519_v13 = vld [vmem:[#allocation2 + $0x31] sm:$0xff] }
  0xce   : > { %7398 = vmatprep.subr.bf16.mxu1 %v8129_v8  ;;  %v8832_v60 = vpack.c.bf16 %v928_v49, %v927_v28  ;;  %v8145_v27 = vld [vmem:[#allocation7 + $0x1d0] sm:$0xff]   ;;  %v2438_v28 = vld [vmem:[#allocation2 + $0x69] sm:$0xff] }
  0xcf   : > { %7351 = vmatpush3.bf16.msra.mxu0 %v8124_v40  ;;  %v1520_v40 = vld [vmem:[#allocation2 + $0x39] sm:$0xff]  ;;  %v2437_v33 = vld [vmem:[#allocation2 + $0x61] sm:$0xff] }
  0xd0   : > { %7352 = vmatprep.subr.bf16.mxu0 %v8127_v23  ;;  %v8150_v49 = vld [vmem:[#allocation7 + $0x230] sm:$0xff]  }
  0xd1   : > { %7399 = vmatpush3.bf16.msra.mxu1 %v8129_v8  ;;  %v1521_v8 = vld [vmem:[#allocation2 + $0x49] sm:$0xff] }
  0xd2   : > { %7273 = vmatmul.mubr.bf16.gmra.mxu0 %v8822_v24  ;;  %7400 = vmatprep.subr.bf16.mxu1 %v8131_v48 }
  0xd3   : > { %7276 = vmatprep.mubr.bf16.mxu0 %v8824_v50  ;;  %7353 = vmatpush3.bf16.msra.mxu0 %v8127_v23  ;;  %v8141_v23 = vld [vmem:[#allocation7 + $0x1e8] sm:$0xff]  }
  0xd4   : > { %7321 = vmatmul.mubr.bf16.gmra.mxu1 %v8723_v53  ;;  %7354 = vmatprep.subr.bf16.mxu0 %v8130_v55  ;;  %v930_v53 = vld [vmem:[#allocation2 + $0x112] sm:$0xff] }
  0xd5   : > { %7324 = vmatprep.mubr.bf16.mxu1 %v8739_v9  ;;  %7401 = vmatpush3.bf16.msra.mxu1 %v8131_v48  ;;  %v8838_v9 = vpack.c.bf16 %v930_v53, %v929_v0  ;;  %v8142_v48 = vld [vmem:[#allocation7 + $0x1e0] sm:$0xff]  }
  0xd6   : > { %7402 = vmatprep.subr.bf16.mxu1 %v8132_v56  ;;  %v2136_v53 = vld [vmem:[#allocation2 + $0x90] sm:$0xff] }
  0xd7   : > { %7355 = vmatpush3.bf16.msra.mxu0 %v8130_v55  ;;  %v8137_v55 = vld [vmem:[#allocation7 + $0x198] sm:$0xff]   ;;  %v2164_v25 = vpack.c.bf16 %v2137_v41, %v2136_v53  ;;  %v2449_v53 = vld [vmem:[#allocation2 + $0xf1] sm:$0xff]  ;;  %v2450_v41 = vld [vmem:[#allocation2 + $0xf9] sm:$0xff] }
  0xd8   : > { %7436 = vmatprep.subr.bf16.mxu0 %v8133_v57 }
  0xd9   : > { %7403 = vmatpush3.bf16.msra.mxu1 %v8132_v56 }
  0xda   : > { %7277 = vmatmul.mubr.bf16.gmra.mxu0 %v8830_v34  ;;  %7484 = vmatprep.subr.bf16.mxu1 %v8138_v59 }
  0xdb   : > { %7280 = vmatprep.mubr.bf16.mxu0 %v8832_v60 }
  0xdc   : > { %7325 = vmatmul.mubr.bf16.gmra.mxu1 %v8742_v11  ;;  %v8848_v11 = vpack.c.bf16 %v936_v15, %v935_v2  ;;  %v2440_v2 = vld [vmem:[#allocation2 + $0x81] sm:$0xff] }
  0xdd   : > { %7328 = vmatprep.mubr.bf16.mxu1 %v8756_v22  ;;  %v937_v22 = vld [vmem:[#allocation2 + $0x16a] sm:$0xff] }
  0xe2   : > { %7281 = vmatmul.mubr.bf16.gmra.mxu0 %v8838_v9 }
  0xe3   : > { %7284 = vmatprep.mubr.bf16.mxu0 %v8840_v42 }
  0xe4   : > { %7329 = vmatmul.mubr.bf16.gmra.mxu1 %v8760_v32  ;;  %v1242_v32 = vld [vmem:[#allocation2 + $0x180] sm:$0xff] }
  0xe5   : > { %7332 = vmatprep.mubr.bf16.mxu1 %v8775_v43  ;;  %v8854_v43 = vpack.c.bf16 %v938_v3, %v937_v22  ;;  %v8856_v5 = vpack.c.bf16 %v1243_v6, %v1242_v32  ;;  %v2442_v22 = vld [vmem:[#allocation2 + $0x99] sm:$0xff]  ;;  %v2468_v6 = vpack.c.bf16 %v2440_v2, %v2439_v63  ;;  %v8152_v32 = vld [vmem:[#allocation7 + $0x220] sm:$0xff]  }
  0xea   : > { %7285 = vmatmul.mubr.bf16.gmra.mxu0 %v8846_v58 }
  0xeb   : > { %7288 = vmatprep.mubr.bf16.mxu0 %v8848_v11 }
  0xec   : > { %7333 = vmatmul.mubr.bf16.gmra.mxu1 %v8777_v46  ;;  %v8861_v46 = vpack.c.bf16 %v1520_v40, %v1519_v13 }
  0xed   : > { %7336 = vmatprep.mubr.bf16.mxu1 %v8789_v35  ;;  %v8863_v35 = vpack.c.bf16 %v1522_v44, %v1521_v8  ;;  %v2138_v44 = vld [vmem:[#allocation2 + $0xa8] sm:$0xff] }
  0xf2   : > { %7289 = vmatmul.mubr.bf16.gmra.mxu0 %v8854_v43 }
  0xf3   : > { %7356 = vmatprep.mubr.bf16.mxu0 %v1549_v30 }
  0xf4   : > { %7337 = vmatmul.mubr.bf16.gmra.mxu1 %v8856_v5 }
  0xf5   : > { %7404 = vmatprep.mubr.bf16.mxu1 %v8796_v26  ;;  %v8136_v26 = vld [vmem:[#allocation7 + $0x1a0] sm:$0xff]  }
  0xfa   : > { %7357 = vmatmul.mubr.bf16.vlgmr.msra.gmra.mxu0 %v8861_v46 }
  0xfb   : > { %7437 = vmatpush3.bf16.msra.mxu0 %v8133_v57  ;;  %7360 = vmatprep.mubr.bf16.mxu0 %v8863_v35  ;;  %v2467_v57 = vpack.c.bf16 %v2438_v28, %v2437_v33  ;;  %v2144_v28 = vld [vmem:[#allocation2 + $0xf0] sm:$0xff] }
  0xfc   : > { %7405 = vmatmul.mubr.bf16.vlgmr.msra.gmra.mxu1 %v8798_v62  ;;  %7438 = vmatprep.subr.bf16.mxu0 %v8134_v14  ;;  %v8144_v62 = vld [vmem:[#allocation7 + $0x1d8] sm:$0xff]  }
  0xfd   : > { %7408 = vmatprep.mubr.bf16.mxu1 %v8806_v12  ;;  %7485 = vmatpush3.bf16.msra.mxu1 %v8138_v59  ;;  %v8140_v12 = vld [vmem:[#allocation7 + $0x190] sm:$0xff]  }
  0xfe   : > { %7486 = vmatprep.subr.bf16.mxu1 %v8139_v31 }
  0xff   : > { %7439 = vmatpush3.bf16.msra.mxu0 %v8134_v14 }
 0x100   : > { %7440 = vmatprep.subr.bf16.mxu0 %v8135_v16 }
 0x101   : > { %7487 = vmatpush3.bf16.msra.mxu1 %v8139_v31  ;;  %v2140_v31 = vld [vmem:[#allocation2 + $0xc0] sm:$0xff] }
 0x102   : > { %7361 = vmatmul.mubr.bf16.gmra.mxu0 %v8648_v4  ;;  %7488 = vmatprep.subr.bf16.mxu1 %v8141_v23  ;;  %v8143_v4 = vld [vmem:[#allocation7 + $0x188] sm:$0xff]  }
 0x103   : > { %7364 = vmatprep.mubr.bf16.mxu0 %v8681_v20  ;;  %7441 = vmatpush3.bf16.msra.mxu0 %v8135_v16  ;;  %v8147_v20 = vld [vmem:[#allocation7 + $0x1c8] sm:$0xff]   ;;  %v2141_v16 = vld [vmem:[#allocation2 + $0xc8] sm:$0xff] }
 0x104   : > { %7409 = vmatmul.mubr.bf16.gmra.mxu1 %v8808_v18  ;;  %7442 = vmatprep.subr.bf16.mxu0 %v8136_v26  ;;  %v8146_v18 = vld [vmem:[#allocation7 + $0x180] sm:$0xff]  }
 0x105   : > { %7412 = vmatprep.mubr.bf16.mxu1 %v8814_v10  ;;  %7489 = vmatpush3.bf16.msra.mxu1 %v8141_v23  ;;  %v8148_v10 = vld [vmem:[#allocation7 + $0x1c0] sm:$0xff]   ;;  %v8153_v23 = vld [vmem:[#allocation7 + $0x218] sm:$0xff]  }
 0x106   : > { %7490 = vmatprep.subr.bf16.mxu1 %v8142_v48 }
 0x107   : > { %7443 = vmatpush3.bf16.msra.mxu0 %v8136_v26 }
 0x108   : > { %7444 = vmatprep.subr.bf16.mxu0 %v8137_v55 }
 0x109   : > { %7491 = vmatpush3.bf16.msra.mxu1 %v8142_v48  ;;  %v2443_v48 = vld [vmem:[#allocation2 + $0xa9] sm:$0xff] }
 0x10a   : > { %7365 = vmatmul.mubr.bf16.gmra.mxu0 %v8685_v29  ;;  %7492 = vmatprep.subr.bf16.mxu1 %v8144_v62  ;;  %v8149_v29 = vld [vmem:[#allocation7 + $0x238] sm:$0xff]  }
 0x10b   : > { %7368 = vmatprep.mubr.bf16.mxu0 %v8715_v45  ;;  %7445 = vmatpush3.bf16.msra.mxu0 %v8137_v55  ;;  %v342_v45 = vld [vmem:[#allocation2 + $0x1a7] sm:$0x1]  ;;  %v2444_v55 = vld [vmem:[#allocation2 + $0xb1] sm:$0xff] }
 0x10c   : > { %7413 = vmatmul.mubr.bf16.gmra.mxu1 %v8816_v38  ;;  %7446 = vmatprep.subr.bf16.mxu0 %v8140_v12  ;;  %360 = vst [vmem:[#allocation2 + $0x1a9] sm:$0x1] %v342_v45  ;;  %v2130_v38 = vld [vmem:[#allocation2 + $0x48] sm:$0xff] }
 0x10d   : > { %7416 = vmatprep.mubr.bf16.mxu1 %v8822_v24  ;;  %7493 = vmatpush3.bf16.msra.mxu1 %v8144_v62  ;;  %v2131_v24 = vld [vmem:[#allocation2 + $0x50] sm:$0xff] }
 0x10e   : > { %7494 = vmatprep.subr.bf16.mxu1 %v8145_v27 }
 0x10f   : > { %7447 = vmatpush3.bf16.msra.mxu0 %v8140_v12 }
 0x110   : > { %7448 = vmatprep.subr.bf16.mxu0 %v8143_v4 }
 0x111   : > { %7495 = vmatpush3.bf16.msra.mxu1 %v8145_v27 }
 0x112   : > { %7369 = vmatmul.mubr.bf16.gmra.mxu0 %v8719_v47  ;;  %7496 = vmatprep.subr.bf16.mxu1 %v8147_v20  ;;  %v2128_v47 = vld [vmem:[#allocation2 + $0x30] sm:$0xff] }
 0x113   : > { %7372 = vmatprep.mubr.bf16.mxu0 %v8733_v61  ;;  %7449 = vmatpush3.bf16.msra.mxu0 %v8143_v4  ;;  %v2129_v61 = vld [vmem:[#allocation2 + $0x38] sm:$0xff]  ;;  %v2445_v4 = vld [vmem:[#allocation2 + $0xc1] sm:$0xff] }
 0x114   : > { %7417 = vmatmul.mubr.bf16.gmra.mxu1 %v8824_v50  ;;  %7450 = vmatprep.subr.bf16.mxu0 %v8146_v18  ;;  %v2161_v50 = vpack.c.bf16 %v2131_v24, %v2130_v38 }
 0x115   : > { %7420 = vmatprep.mubr.bf16.mxu1 %v8830_v34  ;;  %7497 = vmatpush3.bf16.msra.mxu1 %v8147_v20  ;;  %v2134_v34 = vld [vmem:[#allocation2 + $0x78] sm:$0xff]  ;;  %v2446_v20 = vld [vmem:[#allocation2 + $0xc9] sm:$0xff] }
 0x116   : > { %7498 = vmatprep.subr.bf16.mxu1 %v8148_v10 }
 0x117   : > { %7451 = vmatpush3.bf16.msra.mxu0 %v8146_v18 }
 0x118   : > { %7532 = vmatprep.subr.bf16.mxu0 %v8149_v29 }
 0x119   : > { %7499 = vmatpush3.bf16.msra.mxu1 %v8148_v10  ;;  %v2166_v10 = vpack.c.bf16 %v2141_v16, %v2140_v31 }
 0x11a   : > { %7373 = vmatmul.mubr.bf16.gmra.mxu0 %v8737_v7  ;;  %v1852_v7 = vld [vmem:[#allocation2 + $0x182] sm:$0xff] }
 0x11b   : > { %7376 = vmatprep.mubr.bf16.mxu0 %v8750_v17  ;;  %v1853_v17 = vld [vmem:[#allocation2 + $0x18a] sm:$0xff] }
 0x11c   : > { %7421 = vmatmul.mubr.bf16.gmra.mxu1 %v8832_v60  ;;  %v2135_v60 = vld [vmem:[#allocation2 + $0x80] sm:$0xff] }
 0x11d   : > { %7424 = vmatprep.mubr.bf16.mxu1 %v8838_v9  ;;  %v8151_v9 = vld [vmem:[#allocation7 + $0x228] sm:$0xff]  }
 0x122   : > { %7377 = vmatmul.mubr.bf16.gmra.mxu0 %v8754_v21  ;;  %v2160_v21 = vpack.c.bf16 %v2129_v61, %v2128_v47  ;;  %v2470_v47 = vpack.c.bf16 %v2444_v55, %v2443_v48  ;;  %v8154_v61 = vld [vmem:[#allocation7 + $0x210] sm:$0xff]   ;;  %v2454_v55 = vld [vmem:[#allocation2 + $0x129] sm:$0xff] }
 0x123   : > { %7380 = vmatprep.mubr.bf16.mxu0 %v8769_v37  ;;  %v8893_v37 = vpack.c.bf16 %v1853_v17, %v1852_v7  ;;  %v2471_v17 = vpack.c.bf16 %v2446_v20, %v2445_v4  ;;  %v2453_v48 = vld [vmem:[#allocation2 + $0x121] sm:$0xff] }
 0x124   : > { %7425 = vmatmul.mubr.bf16.gmra.mxu1 %v8840_v42 }
 0x125   : > { %7428 = vmatprep.mubr.bf16.mxu1 %v8846_v58  ;;  %v2163_v58 = vpack.c.bf16 %v2135_v60, %v2134_v34  ;;  %v2448_v34 = vld [vmem:[#allocation2 + $0xe1] sm:$0xff] }
 0x12a   : > { %7381 = vmatmul.mubr.bf16.gmra.mxu0 %v8773_v39  ;;  %v2132_v39 = vld [vmem:[#allocation2 + $0x60] sm:$0xff] }
 0x12b   : > { %7384 = vmatprep.mubr.bf16.mxu0 %v8785_v51  ;;  %v2133_v51 = vld [vmem:[#allocation2 + $0x68] sm:$0xff] }
 0x12c   : > { %7429 = vmatmul.mubr.bf16.gmra.mxu1 %v8848_v11  ;;  %v2162_v56 = vpack.c.bf16 %v2133_v51, %v2132_v39  ;;  %v2441_v11 = vld [vmem:[#allocation2 + $0x91] sm:$0xff]  ;;  %v2143_v51 = vld [vmem:[#allocation2 + $0xe0] sm:$0xff] }
 0x12d   : > { %7432 = vmatprep.mubr.bf16.mxu1 %v8854_v43  ;;  %v2469_v30 = vpack.c.bf16 %v2442_v22, %v2441_v11  ;;  %v2142_v39 = vld [vmem:[#allocation2 + $0xd8] sm:$0xff]  ;;  %v2473_v22 = vpack.c.bf16 %v2450_v41, %v2449_v53 }
 0x132   : > { %7385 = vmatmul.mubr.bf16.gmra.mxu0 %v8791_v36 }
 0x133   : > { %7452 = vmatprep.mubr.bf16.mxu0 %v2160_v21 }
 0x134   : > { %7433 = vmatmul.mubr.bf16.gmra.mxu1 %v8893_v37 }
 0x135   : > { %7500 = vmatprep.mubr.bf16.mxu1 %v8861_v46  ;;  %v2139_v46 = vld [vmem:[#allocation2 + $0xb0] sm:$0xff] }
 0x136   : > { %v2165_v27 = vpack.c.bf16 %v2139_v46, %v2138_v44  ;;  %v2149_v44 = vld [vmem:[#allocation2 + $0x128] sm:$0xff] }
 0x13a   : > { %v7166_v59 = vpop.f32.mrf.mxu0  ;;  %7453 = vmatmul.mubr.bf16.vlgmr.msra.gmra.mxu0 %v2161_v50 }
 0x13b   : > { %7533 = vmatpush3.bf16.msra.mxu0 %v8149_v29  ;;  %7456 = vmatprep.mubr.bf16.mxu0 %v2162_v56  ;;  %v7214_v0 = vpop.f32.mrf.mxu1  ;;  %v2145_v56 = vld [vmem:[#allocation2 + $0xf8] sm:$0xff] }
 0x13c   : > { %v571_v1 = vpop.f32.mrf.mxu0  ;;  %7501 = vmatmul.mubr.bf16.vlgmr.msra.gmra.mxu1 %v8863_v35  ;;  %7534 = vmatprep.subr.bf16.mxu0 %v8150_v49  ;;  %v8899_v42 = vadd.f32 %v7214_v0, %v7166_v59  ;;  %v2447_v59 = vld [vmem:[#allocation2 + $0xd9] sm:$0xff]  ;;  %v2168_v63 = vpack.c.bf16 %v2145_v56, %v2144_v28  ;;  %v2456_v56 = vld [vmem:[#allocation2 + $0x141] sm:$0xff] }
 0x13d   : > { %7504 = vmatprep.mubr.bf16.mxu1 %v2467_v57  ;;  %v780_v52 = vpop.f32.mrf.mxu1  ;;  %v2455_v28 = vld [vmem:[#allocation2 + $0x139] sm:$0xff] }
 0x13e   : > { %v7167_v15 = vpop.f32.mrf.mxu0  ;;  %v8901_v19 = vadd.f32 %v780_v52, %v571_v1  ;;  %v2167_v1 = vpack.c.bf16 %v2143_v51, %v2142_v39  ;;  %v2152_v51 = vld [vmem:[#allocation2 + $0x150] sm:$0xff] }
 0x13f   : > { %7535 = vmatpush3.bf16.msra.mxu0 %v8150_v49  ;;  %v7215_v54 = vpop.f32.mrf.mxu1  ;;  %v8155_v49 = vld [vmem:[#allocation7 + $0x208] sm:$0xff]  }
 0x140   : > { %v574_v3 = vpop.f32.mrf.mxu0  ;;  %7536 = vmatprep.subr.bf16.mxu0 %v8151_v9  ;;  %v8903_v43 = vadd.f32 %v7215_v54, %v7167_v15  ;;  %v2472_v15 = vpack.c.bf16 %v2448_v34, %v2447_v59 }
 0x141   : > { %v783_v13 = vpop.f32.mrf.mxu1 }
 0x142   : > { %v7170_v40 = vpop.f32.mrf.mxu0  ;;  %7457 = vmatmul.mubr.bf16.gmra.mxu0 %v2163_v58  ;;  %v8905_v8 = vadd.f32 %v783_v13, %v574_v3  ;;  %v8156_v58 = vld [vmem:[#allocation7 + $0x200] sm:$0xff]  }
 0x143   : > { %7460 = vmatprep.mubr.bf16.mxu0 %v2164_v25  ;;  %7537 = vmatpush3.bf16.msra.mxu0 %v8151_v9 }
 0x144   : > { %v7218_v35 = vpop.f32.mrf.mxu1  ;;  %v587_v14 = vpop.f32.mrf.mxu0  ;;  %7505 = vmatmul.mubr.bf16.gmra.mxu1 %v2468_v6  ;;  %7538 = vmatprep.subr.bf16.mxu0 %v8152_v32  ;;  %v2146_v6 = vld [vmem:[#allocation2 + $0x108] sm:$0xff] }
 0x145   : > { %v8907_v26 = vadd.f32 %v7218_v35, %v7170_v40  ;;  %7508 = vmatprep.mubr.bf16.mxu1 %v2469_v30  ;;  %v2148_v40 = vld [vmem:[#allocation2 + $0x120] sm:$0xff]  ;;  %v2451_v35 = vld [vmem:[#allocation2 + $0x109] sm:$0xff] }
 0x146   : > { %v796_v62 = vpop.f32.mrf.mxu1  ;;  %v7171_v12 = vpop.f32.mrf.mxu0 }
 0x147   : > { %v8909_v18 = vadd.f32 %v796_v62, %v587_v14  ;;  %7539 = vmatpush3.bf16.msra.mxu0 %v8152_v32  ;;  %v2147_v32 = vld [vmem:[#allocation2 + $0x110] sm:$0xff] }
 0x148   : > { %v7219_v29 = vpop.f32.mrf.mxu1  ;;  %v590_v45 = vpop.f32.mrf.mxu0  ;;  %7540 = vmatprep.subr.bf16.mxu0 %v8153_v23  ;;  %v2452_v14 = vld [vmem:[#allocation2 + $0x111] sm:$0xff] }
 0x149   : > { %v8911_v7 = vadd.f32 %v7219_v29, %v7171_v12  ;;  %v2170_v12 = vpack.c.bf16 %v2149_v44, %v2148_v40  ;;  %v2474_v20 = vpack.c.bf16 %v2452_v14, %v2451_v35  ;;  %v2475_v29 = vpack.c.bf16 %v2454_v55, %v2453_v48  ;;  %v2460_v40 = vld [vmem:[#allocation2 + $0x171] sm:$0xff] }
 0x14a   : > { %v799_v21 = vpop.f32.mrf.mxu1  ;;  %v7174_v38 = vpop.f32.mrf.mxu0  ;;  %7461 = vmatmul.mubr.bf16.gmra.mxu0 %v2165_v27 }
 0x14b   : > { %v8913_v24 = vadd.f32 %v799_v21, %v590_v45  ;;  %7464 = vmatprep.mubr.bf16.mxu0 %v2166_v10  ;;  %7541 = vmatpush3.bf16.msra.mxu0 %v8153_v23  ;;  %v2169_v23 = vpack.c.bf16 %v2147_v32, %v2146_v6  ;;  %v2151_v21 = vld [vmem:[#allocation2 + $0x140] sm:$0xff] }
 0x14c   : > { %v7222_v50 = vpop.f32.mrf.mxu1  ;;  %v603_v33 = vpop.f32.mrf.mxu0  ;;  %7509 = vmatmul.mubr.bf16.gmra.mxu1 %v2470_v47  ;;  %7542 = vmatprep.subr.bf16.mxu0 %v8154_v61 }
 0x14d   : > { %v8915_v57 = vadd.f32 %v7222_v50, %v7174_v38  ;;  %7512 = vmatprep.mubr.bf16.mxu1 %v2471_v17  ;;  %v2150_v17 = vld [vmem:[#allocation2 + $0x138] sm:$0xff] }
 0x14e   : > { %v812_v60 = vpop.f32.mrf.mxu1  ;;  %v7175_v0 = vpop.f32.mrf.mxu0  ;;  %v2153_v50 = vld [vmem:[#allocation2 + $0x158] sm:$0xff]  ;;  %v2171_v34 = vpack.c.bf16 %v2151_v21, %v2150_v17 }
 0x14f   : > { %v8917_v9 = vadd.f32 %v812_v60, %v603_v33  ;;  %7543 = vmatpush3.bf16.msra.mxu0 %v8154_v61  ;;  %v2457_v60 = vld [vmem:[#allocation2 + $0x151] sm:$0xff]  ;;  %v2172_v53 = vpack.c.bf16 %v2153_v50, %v2152_v51  ;;  %v2739_v17 = vld [vmem:[#allocation2 + $0x3a] sm:$0xff] }
 0x150   : > { %v7223_v2 = vpop.f32.mrf.mxu1  ;;  %v606_v52 = vpop.f32.mrf.mxu0  ;;  %7544 = vmatprep.subr.bf16.mxu0 %v8155_v49 }
 0x151   : > { %v8919_v11 = vadd.f32 %v7223_v2, %v7175_v0  ;;  %v2458_v0 = vld [vmem:[#allocation2 + $0x159] sm:$0xff]  ;;  %v2476_v2 = vpack.c.bf16 %v2456_v56, %v2455_v28 }
 0x152   : > { %v815_v25 = vpop.f32.mrf.mxu1  ;;  %v7178_v54 = vpop.f32.mrf.mxu0  ;;  %7465 = vmatmul.mubr.bf16.gmra.mxu0 %v2167_v1 }
 0x153   : > { %v8921_v3 = vadd.f32 %v815_v25, %v606_v52  ;;  %7468 = vmatprep.mubr.bf16.mxu0 %v2168_v63  ;;  %7545 = vmatpush3.bf16.msra.mxu0 %v8155_v49  ;;  %v2154_v25 = vld [vmem:[#allocation2 + $0x168] sm:$0xff] }
 0x154   : > { %v7226_v30 = vpop.f32.mrf.mxu1  ;;  %v619_v13 = vpop.f32.mrf.mxu0  ;;  %7513 = vmatmul.mubr.bf16.gmra.mxu1 %v2472_v15  ;;  %7546 = vmatprep.subr.bf16.mxu0 %v8156_v58  ;;  %v2477_v15 = vpack.c.bf16 %v2458_v0, %v2457_v60 }
 0x155   : > { %v8923_v46 = vadd.f32 %v7226_v30, %v7178_v54  ;;  %7516 = vmatprep.mubr.bf16.mxu1 %v2473_v22  ;;  %v2155_v54 = vld [vmem:[#allocation2 + $0x170] sm:$0xff] }
 0x156   : > { %v828_v31 = vpop.f32.mrf.mxu1  ;;  %v7179_v16 = vpop.f32.mrf.mxu0  ;;  %v2173_v14 = vpack.c.bf16 %v2155_v54, %v2154_v25  ;;  %v2743_v25 = vld [vmem:[#allocation2 + $0x6a] sm:$0xff] }
 0x157   : > { %v8925_v62 = vadd.f32 %v828_v31, %v619_v13  ;;  %7547 = vmatpush3.bf16.msra.mxu0 %v8156_v58  ;;  %v2459_v13 = vld [vmem:[#allocation2 + $0x169] sm:$0xff] }
 0x158   : > { %v7227_v27 = vpop.f32.mrf.mxu1  ;;  %v622_v4 = vpop.f32.mrf.mxu0  ;;  %v2478_v48 = vpack.c.bf16 %v2460_v40, %v2459_v13 }
 0x159   : > { %v8927_v10 = vadd.f32 %v7227_v27, %v7179_v16 }
 0x15a   : > { %v831_v45 = vpop.f32.mrf.mxu1  ;;  %v7182_v47 = vpop.f32.mrf.mxu0  ;;  %7469 = vmatmul.mubr.bf16.gmra.mxu0 %v2169_v23 }
 0x15b   : > { %v8929_v61 = vadd.f32 %v831_v45, %v622_v4  ;;  %7472 = vmatprep.mubr.bf16.mxu0 %v2170_v12  ;;  %v2158_v4 = vld [vmem:[#allocation2 + $0x198] sm:$0xff] }
 0x15c   : > { %v7230_v38 = vpop.f32.mrf.mxu1  ;;  %v635_v39 = vpop.f32.mrf.mxu0  ;;  %7517 = vmatmul.mubr.bf16.gmra.mxu1 %v2474_v20  ;;  %v2159_v20 = vld [vmem:[#allocation2 + $0x1a0] sm:$0xff] }
 0x15d   : > { %v8931_v33 = vadd.f32 %v7230_v38, %v7182_v47  ;;  %7520 = vmatprep.mubr.bf16.mxu1 %v2475_v29  ;;  %v2738_v47 = vld [vmem:[#allocation2 + $0x32] sm:$0xff]  ;;  %v2175_v28 = vpack.c.bf16 %v2159_v20, %v2158_v4  ;;  %v2744_v20 = vld [vmem:[#allocation2 + $0x7a] sm:$0xff] }
 0x15e   : > { %v844_v49 = vpop.f32.mrf.mxu1  ;;  %v7183_v59 = vpop.f32.mrf.mxu0  ;;  %v2463_v38 = vld [vmem:[#allocation2 + $0x199] sm:$0xff] }
 0x15f   : > { %v8933_v1 = vadd.f32 %v844_v49, %v635_v39  ;;  %v2464_v39 = vld [vmem:[#allocation2 + $0x1a1] sm:$0xff]  ;;  %v2770_v49 = vpack.c.bf16 %v2739_v17, %v2738_v47  ;;  %v2746_v17 = vld [vmem:[#allocation2 + $0x92] sm:$0xff] }
 0x160   : > { %v7231_v41 = vpop.f32.mrf.mxu1  ;;  %v8935_v63 = vpop.f32.mrf.mxu0 }
 0x161   : > { %v8937_v52 = vadd.f32 %v7231_v41, %v7183_v59  ;;  %v2741_v41 = vld [vmem:[#allocation2 + $0x52] sm:$0xff] }
 0x162   : > { %v8939_v58 = vpop.f32.mrf.mxu1  ;;  %v7186_v22 = vpop.f32.mrf.mxu0  ;;  %7473 = vmatmul.mubr.bf16.gmra.mxu0 %v2171_v34  ;;  %v2480_v34 = vpack.c.bf16 %v2464_v39, %v2463_v38  ;;  %v2747_v38 = vld [vmem:[#allocation2 + $0x9a] sm:$0xff] }
 0x163   : > { %7476 = vmatprep.mubr.bf16.mxu0 %v2172_v53 }
 0x164   : > { %v7234_v6 = vpop.f32.mrf.mxu1  ;;  %v651_v32 = vpop.f32.mrf.mxu0  ;;  %7521 = vmatmul.mubr.bf16.gmra.mxu1 %v2476_v2 }
 0x165   : > { %v8941_v30 = vadd.f32 %v7234_v6, %v7186_v22  ;;  %7524 = vmatprep.mubr.bf16.mxu1 %v2477_v15  ;;  %v2742_v22 = vld [vmem:[#allocation2 + $0x62] sm:$0xff] }
 0x166   : > { %v860_v44 = vpop.f32.mrf.mxu1  ;;  %v7187_v35 = vpop.f32.mrf.mxu0 }
 0x167   : > { %v8943_v31 = vadd.f32 %v860_v44, %v651_v32  ;;  %v2772_v44 = vpack.c.bf16 %v2743_v25, %v2742_v22  ;;  %v2748_v25 = vld [vmem:[#allocation2 + $0xaa] sm:$0xff] }
 0x168   : > { %v7235_v16 = vpop.f32.mrf.mxu1  ;;  %v8945_v23 = vpop.f32.mrf.mxu0 }
 0x169   : > { %10906 = vst [vmem:[#allocation14_spill] sm:$0xff] %v8945_v23  ;;  %v8947_v55 = vadd.f32 %v7235_v16, %v7187_v35 }
 0x16a   : > { %v8949_v12 = vpop.f32.mrf.mxu1  ;;  %v7190_v27 = vpop.f32.mrf.mxu0  ;;  %7477 = vmatmul.mubr.bf16.gmra.mxu0 %v2173_v14 }
 0x16b   : > { %10907 = vst [vmem:[#allocation15_spill] sm:$0xff] %v8949_v12  ;;  %7480 = vmatprep.mubr.bf16.mxu0 %v8856_v5 }
 0x16c   : > { %v7238_v29 = vpop.f32.mrf.mxu1  ;;  %v667_v45 = vpop.f32.mrf.mxu0  ;;  %7525 = vmatmul.mubr.bf16.gmra.mxu1 %v2478_v48 }
 0x16d   : > { %v8952_v21 = vadd.f32 %v7238_v29, %v7190_v27  ;;  %7528 = vmatprep.mubr.bf16.mxu1 %v8791_v36  ;;  %v2740_v36 = vld [vmem:[#allocation2 + $0x4a] sm:$0xff]  ;;  %v2745_v29 = vld [vmem:[#allocation2 + $0x82] sm:$0xff] }
 0x16e   : > { %v876_v51 = vpop.f32.mrf.mxu1  ;;  %v7191_v50 = vpop.f32.mrf.mxu0  ;;  %v2771_v13 = vpack.c.bf16 %v2741_v41, %v2740_v36 }
 0x16f   : > { %v8955_v56 = vadd.f32 %v876_v51, %v667_v45 }
 0x170   : > { %v7239_v5 = vpop.f32.mrf.mxu1  ;;  %v8957_v59 = vpop.f32.mrf.mxu0 }
 0x171   : > { %10908 = vst [vmem:[#allocation16_spill] sm:$0xff] %v8957_v59  ;;  %v8959_v60 = vadd.f32 %v7239_v5, %v7191_v50 }
 0x172   : > { %v8961_v0 = vpop.f32.mrf.mxu1  ;;  %v7194_v53 = vpop.f32.mrf.mxu0  ;;  %7481 = vmatmul.mubr.bf16.gmra.mxu0 %v2175_v28 }
 0x173   : > { %10909 = vst [vmem:[#allocation17_spill] sm:$0xff] %v8961_v0  ;;  %7548 = vmatprep.mubr.bf16.mxu0 %v2770_v49  ;;  %v2773_v49 = vpack.c.bf16 %v2745_v29, %v2744_v20 }
 0x174   : > { %v7242_v2 = vpop.f32.mrf.mxu1  ;;  %v683_v15 = vpop.f32.mrf.mxu0  ;;  %7529 = vmatmul.mubr.bf16.gmra.mxu1 %v2480_v34 }
 0x175   : > { %v8963_v54 = vadd.f32 %v7242_v2, %v7194_v53  ;;  %v2774_v53 = vpack.c.bf16 %v2747_v38, %v2746_v17 }
 0x176   : > { %v892_v6 = vpop.f32.mrf.mxu1  ;;  %v7195_v32 = vpop.f32.mrf.mxu0 }
 0x177   : > { %v8965_v40 = vadd.f32 %v892_v6, %v683_v15  ;;  %v2749_v6 = vld [vmem:[#allocation2 + $0xb2] sm:$0xff] }
 0x178   : > { %v7243_v35 = vpop.f32.mrf.mxu1  ;;  %v8967_v14 = vpop.f32.mrf.mxu0  ;;  %v2775_v20 = vpack.c.bf16 %v2749_v6, %v2748_v25 }
 0x179   : > { %10910 = vst [vmem:[#allocation18_spill] sm:$0xff] %v8967_v14  ;;  %v8969_v16 = vadd.f32 %v7243_v35, %v7195_v32 }
 0x17a   : > { %v8971_v48 = vpop.f32.mrf.mxu1  ;;  %v7262_v27 = vpop.f32.mrf.mxu0  ;;  %7549 = vmatmul.mubr.bf16.vlgmr.msra.gmra.mxu0 %v2771_v13  ;;  %v2750_v13 = vld [vmem:[#allocation2 + $0xc2] sm:$0xff] }
 0x17b   : > { %10911 = vst [vmem:[#allocation19_spill] sm:$0xff] %v8971_v48  ;;  %v1182_v4 = vadd.f32 %v7262_v27, %v8899_v42  ;;  %7552 = vmatprep.mubr.bf16.mxu0 %v2772_v44  ;;  %v2751_v44 = vld [vmem:[#allocation2 + $0xca] sm:$0xff] }
 0x17c   : > { %v1053_v45 = vpop.f32.mrf.mxu0  ;;  %v7310_v47 = vpop.f32.mrf.mxu1 }
 0x17d   : > { %v1180_v39 = vadd.f32 %v1053_v45, %v8901_v19  ;;  %v8975_v51 = vadd.f32 %v7310_v47, %v1182_v4  ;;  %v2776_v47 = vpack.c.bf16 %v2751_v44, %v2750_v13 }
 0x17e   : > { %v7263_v50 = vpop.f32.mrf.mxu0  ;;  %v1358_v28 = vpop.f32.mrf.mxu1 }
 0x17f   : > { %v1183_v5 = vadd.f32 %v7263_v50, %v8903_v43  ;;  %v8978_v34 = vadd.f32 %v1358_v28, %v1180_v39 }
 0x180   : > { %v1056_v42 = vpop.f32.mrf.mxu0  ;;  %v7311_v36 = vpop.f32.mrf.mxu1 }
 0x181   : > { %v8981_v41 = vadd.f32 %v1056_v42, %v8905_v8  ;;  %v8983_v2 = vadd.f32 %v7311_v36, %v1183_v5  ;;  %v2753_v5 = vld [vmem:[#allocation2 + $0xe2] sm:$0xff]  ;;  %v2754_v42 = vld [vmem:[#allocation2 + $0xf2] sm:$0xff]  ;;  %v2755_v36 = vld [vmem:[#allocation2 + $0xfa] sm:$0xff] }
 0x182   : > { %v7266_v15 = vpop.f32.mrf.mxu0  ;;  %v8985_v22 = vpop.f32.mrf.mxu1  ;;  %7553 = vmatmul.mubr.bf16.gmra.mxu0 %v2773_v49  ;;  %v2752_v49 = vld [vmem:[#allocation2 + $0xda] sm:$0xff]  ;;  %v2778_v13 = vpack.c.bf16 %v2755_v36, %v2754_v42 }
 0x183   : > { %v1186_v19 = vadd.f32 %v7266_v15, %v8907_v26  ;;  %7556 = vmatprep.mubr.bf16.mxu0 %v2774_v53  ;;  %v2777_v6 = vpack.c.bf16 %v2753_v5, %v2752_v49 }
 0x184   : > { %v1069_v43 = vpop.f32.mrf.mxu0  ;;  %v7314_v32 = vpop.f32.mrf.mxu1 }
 0x185   : > { %v1184_v35 = vadd.f32 %v1069_v43, %v8909_v18  ;;  %v8989_v27 = vadd.f32 %v7314_v32, %v1186_v19 }
 0x186   : > { %v7267_v8 = vpop.f32.mrf.mxu0  ;;  %v1374_v4 = vpop.f32.mrf.mxu1 }
 0x187   : > { %v1187_v29 = vadd.f32 %v7267_v8, %v8911_v7  ;;  %v8992_v45 = vadd.f32 %v1374_v4, %v1184_v35 }
 0x188   : > { %v1072_v26 = vpop.f32.mrf.mxu0  ;;  %v7315_v17 = vpop.f32.mrf.mxu1 }
 0x189   : > { %v8995_v38 = vadd.f32 %v1072_v26, %v8913_v24  ;;  %v8997_v39 = vadd.f32 %v7315_v17, %v1187_v29  ;;  %v2756_v29 = vld [vmem:[#allocation2 + $0x10a] sm:$0xff]  ;;  %v2758_v17 = vld [vmem:[#allocation2 + $0x122] sm:$0xff] }
 0x18a   : > { %v7270_v50 = vpop.f32.mrf.mxu0  ;;  %v8999_v28 = vpop.f32.mrf.mxu1  ;;  %7557 = vmatmul.mubr.bf16.gmra.mxu0 %v2775_v20 }
 0x18b   : > { %v1190_v18 = vadd.f32 %v7270_v50, %v8915_v57  ;;  %7560 = vmatprep.mubr.bf16.mxu0 %v2776_v47  ;;  %v2757_v47 = vld [vmem:[#allocation2 + $0x112] sm:$0xff]  ;;  %v2759_v50 = vld [vmem:[#allocation2 + $0x12a] sm:$0xff] }
 0x18c   : > { %v1085_v7 = vpop.f32.mrf.mxu0  ;;  %v7318_v53 = vpop.f32.mrf.mxu1  ;;  %v2780_v36 = vpack.c.bf16 %v2759_v50, %v2758_v17 }
 0x18d   : > { %v1188_v15 = vadd.f32 %v1085_v7, %v8917_v9  ;;  %v9003_v19 = vadd.f32 %v7318_v53, %v1190_v18  ;;  %v2779_v7 = vpack.c.bf16 %v2757_v47, %v2756_v29 }
 0x18e   : > { %v7271_v24 = vpop.f32.mrf.mxu0  ;;  %v1390_v25 = vpop.f32.mrf.mxu1 }
 0x18f   : > { %v1191_v43 = vadd.f32 %v7271_v24, %v8919_v11  ;;  %v9006_v32 = vadd.f32 %v1390_v25, %v1188_v15 }
 0x190   : > { %v1088_v57 = vpop.f32.mrf.mxu0  ;;  %v7319_v44 = vpop.f32.mrf.mxu1 }
 0x191   : > { %v9009_v35 = vadd.f32 %v1088_v57, %v8921_v3  ;;  %v9011_v8 = vadd.f32 %v7319_v44, %v1191_v43  ;;  %v2761_v57 = vld [vmem:[#allocation2 + $0x142] sm:$0xff] }
 0x192   : > { %v7274_v4 = vpop.f32.mrf.mxu0  ;;  %v9013_v20 = vpop.f32.mrf.mxu1  ;;  %7561 = vmatmul.mubr.bf16.gmra.mxu0 %v2777_v6 }
 0x193   : > { %v1194_v9 = vadd.f32 %v7274_v4, %v8923_v46  ;;  %7564 = vmatprep.mubr.bf16.mxu0 %v2778_v13  ;;  %v2760_v13 = vld [vmem:[#allocation2 + $0x13a] sm:$0xff]  ;;  %v2762_v4 = vld [vmem:[#allocation2 + $0x152] sm:$0xff] }
 0x194   : > { %v1101_v11 = vpop.f32.mrf.mxu0  ;;  %v7322_v26 = vpop.f32.mrf.mxu1 }
 0x195   : > { %v1192_v18 = vadd.f32 %v1101_v11, %v8925_v62  ;;  %v9017_v49 = vadd.f32 %v7322_v26, %v1194_v9  ;;  %v2763_v9 = vld [vmem:[#allocation2 + $0x15a] sm:$0xff]  ;;  %v2781_v26 = vpack.c.bf16 %v2761_v57, %v2760_v13 }
 0x196   : > { %v7275_v3 = vpop.f32.mrf.mxu0  ;;  %v1406_v5 = vpop.f32.mrf.mxu1 }
 0x197   : > { %v1195_v53 = vadd.f32 %v7275_v3, %v8927_v10  ;;  %v9020_v42 = vadd.f32 %v1406_v5, %v1192_v18  ;;  %v2782_v18 = vpack.c.bf16 %v2763_v9, %v2762_v4 }
 0x198   : > { %v1104_v46 = vpop.f32.mrf.mxu0  ;;  %v7323_v15 = vpop.f32.mrf.mxu1 }
 0x199   : > { %v9023_v24 = vadd.f32 %v1104_v46, %v8929_v61  ;;  %v9025_v25 = vadd.f32 %v7323_v15, %v1195_v53  ;;  %v2765_v46 = vld [vmem:[#allocation2 + $0x172] sm:$0xff] }
 0x19a   : > { %v7278_v6 = vpop.f32.mrf.mxu0  ;;  %v9027_v43 = vpop.f32.mrf.mxu1  ;;  %7565 = vmatmul.mubr.bf16.gmra.mxu0 %v2779_v7 }
 0x19b   : > { %v1198_v62 = vadd.f32 %v7278_v6, %v8931_v33  ;;  %7568 = vmatprep.mubr.bf16.mxu0 %v2780_v36  ;;  %v2764_v36 = vld [vmem:[#allocation2 + $0x16a] sm:$0xff] }
 0x19c   : > { %v1117_v10 = vpop.f32.mrf.mxu0  ;;  %v7326_v44 = vpop.f32.mrf.mxu1 }
 0x19d   : > { %v1196_v29 = vadd.f32 %v1117_v10, %v8933_v1  ;;  %v9031_v47 = vadd.f32 %v7326_v44, %v1198_v62  ;;  %v2783_v10 = vpack.c.bf16 %v2765_v46, %v2764_v36 }
 0x19e   : > { %v7279_v61 = vpop.f32.mrf.mxu0  ;;  %v1422_v11 = vpop.f32.mrf.mxu1 }
 0x19f   : > { %v1199_v17 = vadd.f32 %v7279_v61, %v8937_v52  ;;  %v9034_v50 = vadd.f32 %v1422_v11, %v1196_v29 }
 0x1a0   : > { %v9036_v33 = vpop.f32.mrf.mxu0  ;;  %v7327_v3 = vpop.f32.mrf.mxu1 }
 0x1a1   : > { %v9038_v5 = vadd.f32 %v7327_v3, %v1199_v17  ;;  %v2769_v17 = vld [vmem:[#allocation2 + $0x1a2] sm:$0xff] }
 0x1a2   : > { %v7282_v7 = vpop.f32.mrf.mxu0  ;;  %v9040_v53 = vpop.f32.mrf.mxu1  ;;  %7569 = vmatmul.mubr.bf16.gmra.mxu0 %v2781_v26  ;;  %v2768_v26 = vld [vmem:[#allocation2 + $0x19a] sm:$0xff] }
 0x1a3   : > { %10912 = vst [vmem:[#allocation20_spill] sm:$0xff] %v9040_v53  ;;  %v1202_v1 = vadd.f32 %v7282_v7, %v8941_v30  ;;  %7572 = vmatprep.mubr.bf16.mxu0 %v2782_v18  ;;  %v2785_v46 = vpack.c.bf16 %v2769_v17, %v2768_v26 }
 0x1a4   : > { %v1133_v15 = vpop.f32.mrf.mxu0  ;;  %v7330_v6 = vpop.f32.mrf.mxu1 }
 0x1a5   : > { %v1200_v52 = vadd.f32 %v1133_v15, %v8943_v31  ;;  %v9044_v62 = vadd.f32 %v7330_v6, %v1202_v1 }
 0x1a6   : > { %v7283_v13 = vpop.f32.mrf.mxu0  ;;  %v1438_v57 = vpop.f32.mrf.mxu1 }
 0x1a7   : > { %v1203_v44 = vadd.f32 %v7283_v13, %v8947_v55  ;;  %v9047_v4 = vadd.f32 %v1438_v57, %v1200_v52 }
 0x1a8   : > { %v9049_v9 = vpop.f32.mrf.mxu0  ;;  %v7331_v29 = vpop.f32.mrf.mxu1 }
 0x1a9   : > { %10913 = vst [vmem:[#allocation21_spill] sm:$0xff] %v9049_v9  ;;  %v9051_v30 = vadd.f32 %v7331_v29, %v1203_v44 }
 0x1aa   : > { %v7286_v61 = vpop.f32.mrf.mxu0  ;;  %v9053_v11 = vpop.f32.mrf.mxu1  ;;  %7573 = vmatmul.mubr.bf16.gmra.mxu0 %v2783_v10 }
 0x1ab   : > { %10914 = vst [vmem:[#allocation22_spill] sm:$0xff] %v9053_v11  ;;  %v1206_v31 = vadd.f32 %v7286_v61, %v8952_v21  ;;  %7576 = vmatprep.mubr.bf16.mxu0 %v8893_v37 }
 0x1ac   : > { %v1149_v18 = vpop.f32.mrf.mxu0  ;;  %v7334_v3 = vpop.f32.mrf.mxu1 }
 0x1ad   : > { %v1204_v55 = vadd.f32 %v1149_v18, %v8955_v56  ;;  %v9058_v7 = vadd.f32 %v7334_v3, %v1206_v31 }
 0x1ae   : > { %v7287_v1 = vpop.f32.mrf.mxu0  ;;  %v1454_v36 = vpop.f32.mrf.mxu1 }
 0x1af   : > { %v1207_v15 = vadd.f32 %v7287_v1, %v8959_v60  ;;  %v9061_v6 = vadd.f32 %v1454_v36, %v1204_v55 }
 0x1b0   : > { %v9063_v52 = vpop.f32.mrf.mxu0  ;;  %v7335_v21 = vpop.f32.mrf.mxu1 }
 0x1b1   : > { %10915 = vst [vmem:[#allocation23_spill] sm:$0xff] %v9063_v52  ;;  %v9065_v13 = vadd.f32 %v7335_v21, %v1207_v15 }
 0x1b2   : > { %v7290_v37 = vpop.f32.mrf.mxu0  ;;  %v9067_v57 = vpop.f32.mrf.mxu1  ;;  %7577 = vmatmul.mubr.bf16.gmra.mxu0 %v2785_v46 }
 0x1b3   : > { %10916 = vst [vmem:[#allocation24_spill] sm:$0xff] %v9067_v57  ;;  %v1210_v56 = vadd.f32 %v7290_v37, %v8963_v54 }
 0x1b4   : > { %v1165_v10 = vpop.f32.mrf.mxu0  ;;  %v7338_v44 = vpop.f32.mrf.mxu1 }
 0x1b5   : > { %v1208_v29 = vadd.f32 %v1165_v10, %v8965_v40  ;;  %v9071_v61 = vadd.f32 %v7338_v44, %v1210_v56 }
 0x1b6   : > { %v7291_v60 = vpop.f32.mrf.mxu0  ;;  %v1470_v31 = vpop.f32.mrf.mxu1 }
 0x1b7   : > { %v1211_v26 = vadd.f32 %v7291_v60, %v8969_v16  ;;  %v9074_v17 = vadd.f32 %v1470_v31, %v1208_v29 }
 0x1b8   : > { %v9076_v18 = vpop.f32.mrf.mxu0  ;;  %v7339_v3 = vpop.f32.mrf.mxu1 }
 0x1b9   : > { %10917 = vst [vmem:[#allocation25_spill] sm:$0xff] %v9076_v18  ;;  %v9078_v55 = vadd.f32 %v7339_v3, %v1211_v26 }
 0x1ba   : > { %v9080_v1 = vpop.f32.mrf.mxu1  ;;  %v7358_v54 = vpop.f32.mrf.mxu0 }
 0x1bb   : > { %10918 = vst [vmem:[#allocation26_spill] sm:$0xff] %v9080_v1  ;;  %v1792_v36 = vadd.f32 %v7358_v54, %v8975_v51 }
 0x1bc   : > { %v1663_v46 = vpop.f32.mrf.mxu0  ;;  %v7406_v40 = vpop.f32.mrf.mxu1 }
 0x1bd   : > { %v1790_v15 = vadd.f32 %v1663_v46, %v8978_v34  ;;  %v9084_v21 = vadd.f32 %v7406_v40, %v1792_v36 }
 0x1be   : > { %v7359_v37 = vpop.f32.mrf.mxu0  ;;  %v1968_v16 = vpop.f32.mrf.mxu1 }
 0x1bf   : > { %v1793_v56 = vadd.f32 %v7359_v37, %v8983_v2  ;;  %v9087_v10 = vadd.f32 %v1968_v16, %v1790_v15 }
 0x1c0   : > { %v9089_v44 = vpop.f32.mrf.mxu0  ;;  %v7407_v29 = vpop.f32.mrf.mxu1 }
 0x1c1   : > { %v9091_v60 = vadd.f32 %v7407_v29, %v1793_v56 }
 0x1c2   : > { %v7362_v31 = vpop.f32.mrf.mxu0  ;;  %v9093_v26 = vpop.f32.mrf.mxu1 }
 0x1c3   : > { %v1796_v51 = vadd.f32 %v7362_v31, %v8989_v27 }
 0x1c4   : > { %v1679_v3 = vpop.f32.mrf.mxu0  ;;  %v7410_v34 = vpop.f32.mrf.mxu1 }
 0x1c5   : > { %v9097_v54 = vadd.f32 %v1679_v3, %v8992_v45  ;;  %v9099_v36 = vadd.f32 %v7410_v34, %v1796_v51 }
 0x1c6   : > { %v7363_v2 = vpop.f32.mrf.mxu0  ;;  %v9101_v46 = vpop.f32.mrf.mxu1 }
 0x1c7   : > { %v1797_v40 = vadd.f32 %v7363_v2, %v8997_v39 }
 0x1c8   : > { %v9104_v15 = vpop.f32.mrf.mxu0  ;;  %v7411_v37 = vpop.f32.mrf.mxu1 }
 0x1c9   : > { %v9106_v16 = vadd.f32 %v7411_v37, %v1797_v40 }
 0x1ca   : > { %v7366_v56 = vpop.f32.mrf.mxu0  ;;  %v9108_v29 = vpop.f32.mrf.mxu1 }
 0x1cb   : > { %v1800_v27 = vadd.f32 %v7366_v56, %v9003_v19 }
 0x1cc   : > { %v1695_v31 = vpop.f32.mrf.mxu0  ;;  %v7414_v45 = vpop.f32.mrf.mxu1 }
 0x1cd   : > { %v9112_v51 = vadd.f32 %v1695_v31, %v9006_v32  ;;  %v9114_v3 = vadd.f32 %v7414_v45, %v1800_v27 }
 0x1ce   : > { %v7367_v34 = vpop.f32.mrf.mxu0  ;;  %v9116_v1 = vpop.f32.mrf.mxu1 }
 0x1cf   : > { %v1801_v39 = vadd.f32 %v7367_v34, %v9011_v8 }
 0x1d0   : > { %v9119_v2 = vpop.f32.mrf.mxu0  ;;  %v7415_v40 = vpop.f32.mrf.mxu1 }
 0x1d1   : > { %v9121_v37 = vadd.f32 %v7415_v40, %v1801_v39 }
 0x1d2   : > { %v7370_v18 = vpop.f32.mrf.mxu0  ;;  %v9123_v48 = vpop.f32.mrf.mxu1 }
 0x1d3   : > { %v1804_v19 = vadd.f32 %v7370_v18, %v9017_v49 }
 0x1d4   : > { %v1711_v56 = vpop.f32.mrf.mxu0  ;;  %v7418_v32 = vpop.f32.mrf.mxu1 }
 0x1d5   : > { %v9127_v27 = vadd.f32 %v1711_v56, %v9020_v42  ;;  %v9129_v31 = vadd.f32 %v7418_v32, %v1804_v19 }
 0x1d6   : > { %v7371_v45 = vpop.f32.mrf.mxu0  ;;  %v9131_v14 = vpop.f32.mrf.mxu1 }
 0x1d7   : > { %v1805_v8 = vadd.f32 %v7371_v45, %v9025_v25 }
 0x1d8   : > { %v9134_v34 = vpop.f32.mrf.mxu0  ;;  %v7419_v39 = vpop.f32.mrf.mxu1 }
 0x1d9   : > { %v9136_v40 = vadd.f32 %v7419_v39, %v1805_v8 }
 0x1da   : > { %v7374_v57 = vpop.f32.mrf.mxu0  ;;  %v9138_v52 = vpop.f32.mrf.mxu1 }
 0x1db   : > { %10919 = vst [vmem:[#allocation27_spill] sm:$0xff] %v9138_v52  ;;  %v1808_v49 = vadd.f32 %v7374_v57, %v9031_v47 }
 0x1dc   : > { %v1727_v18 = vpop.f32.mrf.mxu0  ;;  %v7422_v42 = vpop.f32.mrf.mxu1 }
 0x1dd   : > { %v9142_v19 = vadd.f32 %v1727_v18, %v9034_v50  ;;  %v9144_v56 = vadd.f32 %v7422_v42, %v1808_v49 }
 0x1de   : > { %v7375_v32 = vpop.f32.mrf.mxu0  ;;  %v9146_v0 = vpop.f32.mrf.mxu1 }
 0x1df   : > { %10920 = vst [vmem:[#allocation28_spill] sm:$0xff] %v9142_v19  ;;  %10921 = vst [vmem:[#allocation29_spill] sm:$0xff] %v9146_v0  ;;  %v1809_v25 = vadd.f32 %v7375_v32, %v9038_v5 }
 0x1e0   : > { %v9149_v45 = vpop.f32.mrf.mxu0  ;;  %v7423_v8 = vpop.f32.mrf.mxu1 }
 0x1e1   : > { %10922 = vst [vmem:[#allocation30_spill] sm:$0xff] %v9149_v45  ;;  %v9151_v39 = vadd.f32 %v7423_v8, %v1809_v25 }
 0x1e2   : > { %v7378_v59 = vpop.f32.mrf.mxu0  ;;  %v9153_v11 = vpop.f32.mrf.mxu1 }
 0x1e3   : > { %10923 = vst [vmem:[#allocation31_spill] sm:$0xff] %v9153_v11  ;;  %v1812_v47 = vadd.f32 %v7378_v59, %v9044_v62 }
 0x1e4   : > { %v1743_v57 = vpop.f32.mrf.mxu0  ;;  %v7426_v50 = vpop.f32.mrf.mxu1 }
 0x1e5   : > { %v9157_v49 = vadd.f32 %v1743_v57, %v9047_v4  ;;  %v9159_v18 = vadd.f32 %v7426_v50, %v1812_v47 }
 0x1e6   : > { %v7379_v42 = vpop.f32.mrf.mxu0  ;;  %v9161_v9 = vpop.f32.mrf.mxu1 }
 0x1e7   : > { %10924 = vst [vmem:[#allocation32_spill] sm:$0xff] %v9157_v49  ;;  %10925 = vst [vmem:[#allocation33_spill] sm:$0xff] %v9161_v9  ;;  %v1813_v5 = vadd.f32 %v7379_v42, %v9051_v30 }
 0x1e8   : > { %v9164_v32 = vpop.f32.mrf.mxu0  ;;  %v7427_v25 = vpop.f32.mrf.mxu1 }
 0x1e9   : > { %10926 = vst [vmem:[#allocation34_spill] sm:$0xff] %v9164_v32  ;;  %v9166_v8 = vadd.f32 %v7427_v25, %v1813_v5 }
 0x1ea   : > { %v7382_v11 = vpop.f32.mrf.mxu0  ;;  %v9168_v45 = vpop.f32.mrf.mxu1 }
 0x1eb   : > { %10927 = vst [vmem:[#allocation35_spill] sm:$0xff] %v9168_v45  ;;  %v1816_v59 = vadd.f32 %v7382_v11, %v9058_v7 }
 0x1ec   : > { %v1759_v62 = vpop.f32.mrf.mxu0  ;;  %v7430_v4 = vpop.f32.mrf.mxu1 }
 0x1ed   : > { %v9172_v47 = vadd.f32 %v1759_v62, %v9061_v6  ;;  %v9174_v57 = vadd.f32 %v7430_v4, %v1816_v59 }
 0x1ee   : > { %v7383_v50 = vpop.f32.mrf.mxu0  ;;  %v9176_v9 = vpop.f32.mrf.mxu1 }
 0x1ef   : > { %10928 = vst [vmem:[#allocation36_spill] sm:$0xff] %v9172_v47  ;;  %10929 = vst [vmem:[#allocation37_spill] sm:$0xff] %v9176_v9  ;;  %v1817_v30 = vadd.f32 %v7383_v50, %v9065_v13 }
 0x1f0   : > { %v9179_v42 = vpop.f32.mrf.mxu0  ;;  %v7431_v5 = vpop.f32.mrf.mxu1 }
 0x1f1   : > { %10930 = vst [vmem:[#allocation38_spill] sm:$0xff] %v9179_v42  ;;  %v9181_v25 = vadd.f32 %v7431_v5, %v1817_v30 }
 0x1f2   : > { %v7386_v45 = vpop.f32.mrf.mxu0  ;;  %v9183_v32 = vpop.f32.mrf.mxu1 }
 0x1f3   : > { %10931 = vst [vmem:[#allocation39_spill] sm:$0xff] %v9183_v32  ;;  %v1820_v11 = vadd.f32 %v7386_v45, %v9071_v61 }
 0x1f4   : > { %v1775_v7 = vpop.f32.mrf.mxu0  ;;  %v7434_v6 = vpop.f32.mrf.mxu1 }
 0x1f5   : > { %v9187_v59 = vadd.f32 %v1775_v7, %v9074_v17  ;;  %v9189_v62 = vadd.f32 %v7434_v6, %v1820_v11  ;;  %v8157_v17 = vld [vmem:[#allocation9 + $0x78] sm:$0xff]  }
 0x1f6   : > { %v7387_v4 = vpop.f32.mrf.mxu0  ;;  %v9191_v9 = vpop.f32.mrf.mxu1  ;;  %7580 = vmatprep.subr.bf16.mxu1 %v8157_v17 }
 0x1f7   : > { %10932 = vst [vmem:[#allocation40_spill] sm:$0xff] %v9187_v59  ;;  %10933 = vst [vmem:[#allocation41_spill] sm:$0xff] %v9191_v9  ;;  %v1821_v13 = vadd.f32 %v7387_v4, %v9078_v55  ;;  %7581 = vmatpush3.bf16.msra.mxu1 %v8157_v17 }
 0x1f8   : > { %v9194_v50 = vpop.f32.mrf.mxu0  ;;  %v7435_v30 = vpop.f32.mrf.mxu1 }
 0x1f9   : > { %10934 = vst [vmem:[#allocation42_spill] sm:$0xff] %v9194_v50  ;;  %v9196_v5 = vadd.f32 %v7435_v30, %v1821_v13 }
 0x1fa   : > { %v9198_v32 = vpop.f32.mrf.mxu1  ;;  %v7454_v61 = vpop.f32.mrf.mxu0 }
 0x1fb   : > { %10935 = vst [vmem:[#allocation43_spill] sm:$0xff] %v9198_v32  ;;  %v9201_v45 = vadd.f32 %v7454_v61, %v9084_v21 }
 0x1fc   : > { %v2274_v7 = vpop.f32.mrf.mxu0  ;;  %v9203_v11 = vpop.f32.mrf.mxu1 }
 0x1fd   : > { %v9206_v6 = vadd.f32 %v2274_v7, %v9087_v10 }
 0x1fe   : > { %v7455_v55 = vpop.f32.mrf.mxu0  ;;  %v9208_v4 = vpop.f32.mrf.mxu1 }
 0x1ff   : > { %v9211_v13 = vadd.f32 %v7455_v55, %v9091_v60 }
 0x200   : > { %v9213_v30 = vpop.f32.mrf.mxu0  ;;  %v9215_v32 = vpop.f32.mrf.mxu1 }
 0x202   : > { %v7458_v21 = vpop.f32.mrf.mxu0  ;;  %v9220_v50 = vpop.f32.mrf.mxu1 }
 0x203   : > { %v9218_v61 = vadd.f32 %v7458_v21, %v9099_v36 }
 0x204   : > { %v9222_v10 = vpop.f32.mrf.mxu0  ;;  %v9227_v17 = vpop.f32.mrf.mxu1 }
 0x206   : > { %v7459_v7 = vpop.f32.mrf.mxu0  ;;  %v9234_v42 = vpop.f32.mrf.mxu1 }
 0x207   : > { %v9225_v9 = vadd.f32 %v7459_v7, %v9106_v16 }
 0x208   : > { %v9229_v60 = vpop.f32.mrf.mxu0  ;;  %v9241_v49 = vpop.f32.mrf.mxu1 }
 0x20a   : > { %v7462_v55 = vpop.f32.mrf.mxu0  ;;  %v9248_v19 = vpop.f32.mrf.mxu1 }
 0x20b   : > { %v9232_v59 = vadd.f32 %v7462_v55, %v9114_v3 }
 0x20c   : > { %v9236_v36 = vpop.f32.mrf.mxu0  ;;  %v9255_v23 = vpop.f32.mrf.mxu1 }
 0x20e   : > { %v7463_v21 = vpop.f32.mrf.mxu0 }
 0x20f   : > { %v9239_v47 = vadd.f32 %v7463_v21, %v9121_v37 }
 0x210   : > { %v9243_v16 = vpop.f32.mrf.mxu0 }
 0x211   : > { %10936 = vst [vmem:[#allocation44_spill] sm:$0xff] %v9239_v47  ;;  %v9262_v47 = vpop.f32.mrf.mxu1 }
 0x212   : > { %v7466_v7 = vpop.f32.mrf.mxu0 }
 0x213   : > { %v9246_v0 = vadd.f32 %v7466_v7, %v9129_v31  ;;  %v9269_v52 = vpop.f32.mrf.mxu1 }
 0x214   : > { %v9250_v3 = vpop.f32.mrf.mxu0  ;;  %10943 = vst [vmem:[#allocation51_spill] sm:$0xff] %v9269_v52 }
 0x215   : > { %10937 = vst [vmem:[#allocation45_spill] sm:$0xff] %v9246_v0 }
 0x216   : > { %v7467_v55 = vpop.f32.mrf.mxu0 }
 0x217   : > { %v9253_v12 = vadd.f32 %v7467_v55, %v9136_v40 }
 0x218   : > { %v9257_v37 = vpop.f32.mrf.mxu0 }
 0x219   : > { %10938 = vst [vmem:[#allocation46_spill] sm:$0xff] %v9253_v12  ;;  %10939 = vst [vmem:[#allocation47_spill] sm:$0xff] %v9257_v37  ;;  %v9276_v37 = vpop.f32.mrf.mxu1 }
 0x21a   : > { %v7470_v21 = vpop.f32.mrf.mxu0 }
 0x21b   : > { %v9260_v53 = vadd.f32 %v7470_v21, %v9144_v56  ;;  %v8158_v21 = vld [vmem:[#allocation9 + $0x70] sm:$0xff]  }
 0x21c   : > { %v9264_v31 = vpop.f32.mrf.mxu0  ;;  %7582 = vmatprep.subr.bf16.mxu1 %v8158_v21 }
 0x21d   : > { %10940 = vst [vmem:[#allocation48_spill] sm:$0xff] %v9260_v53  ;;  %10941 = vst [vmem:[#allocation49_spill] sm:$0xff] %v9264_v31  ;;  %7583 = vmatpush3.bf16.msra.mxu1 %v8158_v21 }
 0x21e   : > { %v7471_v7 = vpop.f32.mrf.mxu0 }
 0x21f   : > { %v9267_v0 = vadd.f32 %v7471_v7, %v9151_v39  ;;  %v9283_v39 = vpop.f32.mrf.mxu1 }
 0x220   : > { %v9271_v40 = vpop.f32.mrf.mxu0 }
 0x221   : > { %10942 = vst [vmem:[#allocation50_spill] sm:$0xff] %v9267_v0  ;;  %10944 = vst [vmem:[#allocation52_spill] sm:$0xff] %v9271_v40  ;;  %v8159_v0 = vld [vmem:[#allocation9 + $0x68] sm:$0xff]  }
 0x222   : > { %v7474_v55 = vpop.f32.mrf.mxu0  ;;  %7584 = vmatprep.subr.bf16.mxu1 %v8159_v0 }
 0x223   : > { %v9274_v12 = vadd.f32 %v7474_v55, %v9159_v18  ;;  %7585 = vmatpush3.bf16.msra.mxu1 %v8159_v0  ;;  %v9290_v55 = vpop.f32.mrf.mxu1  ;;  %v1486_v0 = vadd.f32 %v8985_v22, %v8981_v41 }
 0x224   : > { %v9278_v56 = vpop.f32.mrf.mxu0 }
 0x225   : > { %10945 = vst [vmem:[#allocation53_spill] sm:$0xff] %v9274_v12  ;;  %10946 = vst [vmem:[#allocation54_spill] sm:$0xff] %v9278_v56  ;;  %v8160_v56 = vld [vmem:[#allocation9 + $0x60] sm:$0xff]  }
 0x226   : > { %v7475_v53 = vpop.f32.mrf.mxu0  ;;  %7586 = vmatprep.subr.bf16.mxu1 %v8160_v56 }
 0x227   : > { %v9281_v31 = vadd.f32 %v7475_v53, %v9166_v8  ;;  %7587 = vmatpush3.bf16.msra.mxu1 %v8160_v56  ;;  %v9297_v8 = vpop.f32.mrf.mxu1  ;;  %v8162_v56 = vld [vmem:[#allocation9 + $0x50] sm:$0xff]  }
 0x228   : > { %v9285_v7 = vpop.f32.mrf.mxu0 }
 0x229   : > { %10947 = vst [vmem:[#allocation55_spill] sm:$0xff] %v9281_v31  ;;  %10948 = vst [vmem:[#allocation56_spill] sm:$0xff] %v9285_v7  ;;  %v8161_v31 = vld [vmem:[#allocation9 + $0x58] sm:$0xff]  }
 0x22a   : > { %v7478_v40 = vpop.f32.mrf.mxu0  ;;  %v8163_v7 = vld [vmem:[#allocation9 + $0x38] sm:$0xff]   ;;  %7588 = vmatprep.subr.bf16.mxu1 %v8161_v31 }
 0x22b   : > { %v9288_v18 = vadd.f32 %v7478_v40, %v9174_v57  ;;  %7628 = vmatprep.subr.bf16.mxu0 %v8163_v7  ;;  %7589 = vmatpush3.bf16.msra.mxu1 %v8161_v31  ;;  %v8166_v31 = vld [vmem:[#allocation9 + $0x28] sm:$0xff]  }
 0x22c   : > { %v9292_v12 = vpop.f32.mrf.mxu0  ;;  %7629 = vmatpush3.bf16.msra.mxu0 %v8163_v7  ;;  %7590 = vmatprep.subr.bf16.mxu1 %v8162_v56 }
 0x22d   : > { %10949 = vst [vmem:[#allocation57_spill] sm:$0xff] %v9288_v18  ;;  %10950 = vst [vmem:[#allocation58_spill] sm:$0xff] %v9292_v12  ;;  %v1791_v18 = vadd.f32 %v9089_v44, %v1486_v0 }
 0x22e   : > { %v7479_v52 = vpop.f32.mrf.mxu0 }
 0x22f   : > { %v9295_v53 = vadd.f32 %v7479_v52, %v9181_v25  ;;  %v9306_v52 = vpop.f32.mrf.mxu1  ;;  %7591 = vmatpush3.bf16.msra.mxu1 %v8162_v56  ;;  %v2096_v7 = vadd.f32 %v9093_v26, %v1791_v18  ;;  %v8168_v26 = vld [vmem:[#allocation9 + $0x40] sm:$0xff]  }
 0x230   : > { %v9299_v21 = vpop.f32.mrf.mxu0 }
 0x231   : > { %10951 = vst [vmem:[#allocation59_spill] sm:$0xff] %v9295_v53  ;;  %10952 = vst [vmem:[#allocation60_spill] sm:$0xff] %v9299_v21  ;;  %v8164_v53 = vld [vmem:[#allocation9 + $0x30] sm:$0xff]   ;;  %v9314_v41 = vpop.f32.mrf.mxu1  ;;  %v2402_v0 = vadd.f32 %v9213_v30, %v2096_v7  ;;  %v2708_v30 = vadd.f32 %v9203_v11, %v9201_v45  ;;  %v2709_v7 = vadd.f32 %v9215_v32, %v9211_v13 }
 0x232   : > { %v7482_v57 = vpop.f32.mrf.mxu0  ;;  %7630 = vmatprep.subr.bf16.mxu0 %v8164_v53 }
 0x233   : > { %v9304_v40 = vadd.f32 %v7482_v57, %v9189_v62  ;;  %7631 = vmatpush3.bf16.msra.mxu0 %v8164_v53  ;;  %v8165_v62 = vld [vmem:[#allocation9 + $0x48] sm:$0xff]   ;;  %v1490_v57 = vadd.f32 %v8999_v28, %v8995_v38  ;;  %v2706_v38 = vadd.f32 %v9208_v4, %v9206_v6  ;;  %v8170_v4 = vld [vmem:[#allocation9 + $0x10] sm:$0xff]  }
 0x234   : > { %v9308_v25 = vpop.f32.mrf.mxu0  ;;  %7592 = vmatprep.subr.bf16.mxu1 %v8165_v62  ;;  %7632 = vmatprep.subr.bf16.mxu0 %v8166_v31 }
 0x235   : > { %7593 = vmatpush3.bf16.msra.mxu1 %v8165_v62  ;;  %v1795_v53 = vadd.f32 %v9104_v15, %v1490_v57  ;;  %v8169_v15 = vld [vmem:[#allocation9 + $0x18] sm:$0xff]  }
 0x236   : > { %v7483_v21 = vpop.f32.mrf.mxu0  ;;  %7594 = vmatprep.subr.bf16.mxu1 %v8168_v26 }
 0x237   : > { %v9312_v12 = vadd.f32 %v7483_v21, %v9196_v5  ;;  %7633 = vmatpush3.bf16.msra.mxu0 %v8166_v31  ;;  %v2099_v5 = vadd.f32 %v9101_v46, %v9097_v54  ;;  %v9325_v21 = vpop.f32.mrf.mxu1  ;;  %v2707_v54 = vadd.f32 %v9220_v50, %v2402_v0  ;;  %v2100_v62 = vadd.f32 %v9108_v29, %v1795_v53 }
 0x238   : > { %v9316_v22 = vpop.f32.mrf.mxu0 }
 0x239   : > { %10953 = vst [vmem:[#allocation61_spill] sm:$0xff] %v9312_v12  ;;  %v8167_v12 = vld [vmem:[#allocation9 + $0x20] sm:$0xff]   ;;  %v2405_v28 = vadd.f32 %v9222_v10, %v2099_v5  ;;  %7595 = vmatpush3.bf16.msra.mxu1 %v8168_v26  ;;  %v9336_v31 = vpop.f32.mrf.mxu1  ;;  %v9338_v10 = vld [vmem:[#allocation9 + $0xb8] sm:$0xff]   ;;  %v2406_v29 = vadd.f32 %v9229_v60, %v2100_v62  ;;  %v2713_v62 = vadd.f32 %v9241_v49, %v9225_v9 }
 0x23a   : > { %v7550_v44 = vpop.f32.mrf.mxu0  ;;  %7634 = vmatprep.subr.bf16.mxu0 %v8167_v12  ;;  %7676 = vmatprep.subr.bf16.mxu1 %v9338_v10 }
 0x23b   : > { %7635 = vmatpush3.bf16.msra.mxu0 %v8167_v12  ;;  %v9342_v57 = vadd.f32 %v7550_v44, %v2708_v30  ;;  %v1494_v12 = vadd.f32 %v9013_v20, %v9009_v35  ;;  %v2710_v50 = vadd.f32 %v9234_v42, %v2405_v28  ;;  %v2103_v35 = vadd.f32 %v9116_v1, %v9112_v51  ;;  %v9362_v42 = vpop.f32.mrf.mxu1  ;;  %v8171_v44 = vld [vmem:[#allocation9 + $0x8] sm:$0xff]  }
 0x23c   : > { %v2884_v56 = vpop.f32.mrf.mxu0  ;;  %7636 = vmatprep.subr.bf16.mxu0 %v8169_v15  ;;  %v2712_v28 = vadd.f32 %v9227_v17, %v9218_v61 }
 0x23d   : > { %v9333_v46 = vadd.f32 %v2884_v56, %v2706_v38  ;;  %v1799_v20 = vadd.f32 %v9119_v2, %v1494_v12  ;;  %v3147_v53 = vmul.f32 %v9342_v57, %v9342_v57  ;;  %v2409_v1 = vadd.f32 %v9236_v36, %v2103_v35  ;;  %v8173_v36 = vld [vmem:[#allocation9] sm:$0xff]  }
 0x23e   : > { %v7551_v18 = vpop.f32.mrf.mxu0  ;;  %v2711_v2 = vadd.f32 %v9248_v19, %v2406_v29 }
 0x23f   : > { %v3145_v0 = vmul.f32 %v9333_v46, %v9333_v46  ;;  %v9353_v5 = vadd.f32 %v7551_v18, %v2709_v7  ;;  %7637 = vmatpush3.bf16.msra.mxu0 %v8169_v15  ;;  %v2104_v15 = vadd.f32 %v9123_v48, %v1799_v20  ;;  %v1498_v48 = vadd.f32 %v9027_v43, %v9023_v24 }
 0x240   : > { %v2887_v6 = vpop.f32.mrf.mxu0  ;;  %7638 = vmatprep.subr.bf16.mxu0 %v8170_v4  ;;  %v2714_v9 = vadd.f32 %v9262_v47, %v2409_v1  ;;  %v2107_v24 = vadd.f32 %v9131_v14, %v9127_v27 }
 0x241   : > { %v9344_v45 = vadd.f32 %v2887_v6, %v2707_v54  ;;  %v3148_v18 = vmul.f32 %v9353_v5, %v9353_v5  ;;  %v9379_v6 = vpop.f32.mrf.mxu1  ;;  %v2410_v49 = vadd.f32 %v9243_v16, %v2104_v15  ;;  %v1803_v43 = vadd.f32 %v9134_v34, %v1498_v48  ;;  %v10957_v15 = vld [vmem:[#allocation20_spill] sm:$0xff] }
 0x242   : > { %v7554_v11 = vpop.f32.mrf.mxu0 }
 0x243   : > { %v3107_v32 = vadd.f32 %v9344_v45, %v9333_v46  ;;  %v3146_v13 = vmul.f32 %v9344_v45, %v9344_v45  ;;  %7639 = vmatpush3.bf16.msra.mxu0 %v8170_v4  ;;  %v9381_v61 = vadd.f32 %v7554_v11, %v2712_v28  ;;  %v9402_v47 = vpop.f32.mrf.mxu1  ;;  %v2715_v27 = vadd.f32 %v9276_v37, %v2410_v49  ;;  %v10954_v28 = vld [vmem:[#allocation27_spill] sm:$0xff] }
 0x244   : > { %v2900_v60 = vpop.f32.mrf.mxu0  ;;  %7640 = vmatprep.subr.bf16.mxu0 %v8171_v44  ;;  %v2108_v1 = vadd.f32 %v10954_v28, %v1803_v43  ;;  %v10963_v43 = vld [vmem:[#allocation30_spill] sm:$0xff] }
 0x245   : > { %v3108_v56 = vadd.f32 %v3107_v32, %v9342_v57  ;;  %v3177_v26 = vadd.f32 %v3146_v13, %v3145_v0  ;;  %v9367_v38 = vadd.f32 %v2900_v60, %v2710_v50  ;;  %v848_v13 = vadd.f32 %v8939_v58, %v8935_v63 }
 0x246   : > { %v7555_v51 = vpop.f32.mrf.mxu0  ;;  %v3151_v35 = vmul.f32 %v9381_v61, %v9381_v61  ;;  %v2716_v63 = vadd.f32 %v9255_v23, %v9232_v59  ;;  %v2413_v58 = vadd.f32 %v9250_v3, %v2107_v24 }
 0x247   : > { %v3178_v30 = vadd.f32 %v3177_v26, %v3147_v53  ;;  %v3109_v54 = vadd.f32 %v3108_v56, %v9353_v5  ;;  %v3149_v7 = vmul.f32 %v9367_v38, %v9367_v38  ;;  %v9392_v11 = vadd.f32 %v7555_v51, %v2713_v62  ;;  %7641 = vmatpush3.bf16.msra.mxu0 %v8171_v44  ;;  %v10955_v51 = vld [vmem:[#allocation44_spill] sm:$0xff] }
 0x248   : > { %v2903_v17 = vpop.f32.mrf.mxu0  ;;  %7642 = vmatprep.subr.bf16.mxu0 %v8173_v36  ;;  %v1197_v44 = vadd.f32 %v9036_v33, %v848_v13  ;;  %v10962_v13 = vld [vmem:[#allocation29_spill] sm:$0xff] }
 0x249   : > { %v3110_v19 = vadd.f32 %v3109_v54, %v9367_v38  ;;  %v3179_v12 = vadd.f32 %v3178_v30, %v3148_v18  ;;  %v9386_v50 = vadd.f32 %v2903_v17, %v2711_v2  ;;  %v3152_v34 = vmul.f32 %v9392_v11, %v9392_v11  ;;  %v10956_v2 = vld [vmem:[#allocation51_spill] sm:$0xff]  ;;  %v9420_v18 = vpop.f32.mrf.mxu1 }
 0x24a   : > { %v7558_v4 = vpop.f32.mrf.mxu0  ;;  %v2717_v33 = vadd.f32 %v10956_v2, %v10955_v51  ;;  %v1502_v62 = vadd.f32 %v10957_v15, %v1197_v44  ;;  %v2718_v17 = vadd.f32 %v9290_v55, %v2413_v58  ;;  %v10964_v58 = vld [vmem:[#allocation21_spill] sm:$0xff] }
 0x24b   : > { %v3180_v29 = vadd.f32 %v3179_v12, %v3149_v7  ;;  %v3111_v0 = vadd.f32 %v3110_v19, %v9386_v50  ;;  %v3150_v32 = vmul.f32 %v9386_v50, %v9386_v50  ;;  %7643 = vmatpush3.bf16.msra.mxu0 %v8173_v36  ;;  %v9422_v23 = vadd.f32 %v7558_v4, %v2716_v63  ;;  %v10958_v36 = vld [vmem:[#allocation47_spill] sm:$0xff]  ;;  %v10959_v4 = vld [vmem:[#allocation14_spill] sm:$0xff]  ;;  %v9442_v55 = vpop.f32.mrf.mxu1 }
 0x24c   : > { %v2916_v16 = vpop.f32.mrf.mxu0  ;;  %v2414_v19 = vadd.f32 %v10958_v36, %v2108_v1 }
 0x24d   : > { %v3112_v20 = vadd.f32 %v3111_v0, %v9381_v61  ;;  %v3181_v60 = vadd.f32 %v3180_v29, %v3150_v32  ;;  %v9407_v53 = vadd.f32 %v2916_v16, %v2714_v9  ;;  %v10960_v29 = vld [vmem:[#allocation15_spill] sm:$0xff]  ;;  %v10961_v32 = vld [vmem:[#allocation28_spill] sm:$0xff]  ;;  %v1807_v16 = vadd.f32 %v10963_v43, %v1502_v62  ;;  %v9460_v15 = vpop.f32.mrf.mxu1  ;;  %v10972_v43 = vld [vmem:[#allocation17_spill] sm:$0xff] }
 0x24e   : > { %v7559_v14 = vpop.f32.mrf.mxu0  ;;  %v864_v0 = vadd.f32 %v10960_v29, %v10959_v4  ;;  %v2111_v24 = vadd.f32 %v10962_v13, %v10961_v32  ;;  %v2719_v1 = vadd.f32 %v9306_v52, %v2414_v19  ;;  %v10970_v4 = vld [vmem:[#allocation52_spill] sm:$0xff] }
 0x24f   : > { %v3182_v56 = vadd.f32 %v3181_v60, %v3151_v35  ;;  %v3113_v26 = vadd.f32 %v3112_v20, %v9392_v11  ;;  %v3153_v37 = vmul.f32 %v9407_v53, %v9407_v53  ;;  %v9432_v48 = vadd.f32 %v7559_v14, %v2717_v33 }
 0x250   : > { %v2919_v59 = vpop.f32.mrf.mxu0  ;;  %v3155_v20 = vmul.f32 %v9422_v23, %v9422_v23  ;;  %v1201_v14 = vadd.f32 %v10964_v58, %v864_v0 }
 0x251   : > { %v3114_v3 = vadd.f32 %v3113_v26, %v9407_v53  ;;  %v3183_v30 = vadd.f32 %v3182_v56, %v3152_v34  ;;  %v9427_v54 = vadd.f32 %v2919_v59, %v2715_v27  ;;  %v10965_v27 = vld [vmem:[#allocation45_spill] sm:$0xff]  ;;  %v3156_v51 = vmul.f32 %v9432_v48, %v9432_v48  ;;  %v10967_v59 = vld [vmem:[#allocation31_spill] sm:$0xff] }
 0x252   : > { %v7562_v7 = vpop.f32.mrf.mxu0  ;;  %v2720_v34 = vadd.f32 %v9283_v39, %v10965_v27  ;;  %v10966_v56 = vld [vmem:[#allocation49_spill] sm:$0xff] }
 0x253   : > { %v3184_v12 = vadd.f32 %v3183_v30, %v3153_v37  ;;  %v3115_v9 = vadd.f32 %v3114_v3, %v9427_v54  ;;  %v3154_v49 = vmul.f32 %v9427_v54, %v9427_v54  ;;  %v2417_v26 = vadd.f32 %v10966_v56, %v2111_v24  ;;  %v10968_v37 = vld [vmem:[#allocation46_spill] sm:$0xff]  ;;  %v10971_v24 = vld [vmem:[#allocation16_spill] sm:$0xff] }
 0x254   : > { %v2932_v35 = vpop.f32.mrf.mxu0  ;;  %v2112_v3 = vadd.f32 %v10967_v59, %v1807_v16  ;;  %v2721_v30 = vadd.f32 %v9297_v8, %v10968_v37  ;;  %v9462_v62 = vadd.f32 %v7562_v7, %v2720_v34  ;;  %v880_v16 = vadd.f32 %v10972_v43, %v10971_v24 }
 0x255   : > { %v3116_v60 = vadd.f32 %v3115_v9, %v9422_v23  ;;  %v3185_v44 = vadd.f32 %v3184_v12, %v3154_v49  ;;  %v9447_v63 = vadd.f32 %v2932_v35, %v2718_v17  ;;  %v10969_v12 = vld [vmem:[#allocation22_spill] sm:$0xff]  ;;  %v2722_v49 = vadd.f32 %v9325_v21, %v2417_v26  ;;  %v10973_v35 = vld [vmem:[#allocation32_spill] sm:$0xff]  ;;  %v2675_v21 = vpop.f32.mrf.mxu1 }
 0x256   : > { %v7563_v28 = vpop.f32.mrf.mxu0  ;;  %v1506_v9 = vadd.f32 %v10969_v12, %v1201_v14  ;;  %v2418_v29 = vadd.f32 %v10970_v4, %v2112_v3  ;;  %v3159_v27 = vmul.f32 %v9462_v62, %v9462_v62  ;;  %v10980_v12 = vld [vmem:[#allocation50_spill] sm:$0xff] }
 0x257   : > { %v3186_v2 = vadd.f32 %v3185_v44, %v3155_v20  ;;  %v3117_v33 = vadd.f32 %v3116_v60, %v9432_v48  ;;  %v3157_v52 = vmul.f32 %v9447_v63, %v9447_v63  ;;  %v9472_v32 = vadd.f32 %v7563_v28, %v2721_v30  ;;  %v10974_v20 = vld [vmem:[#allocation33_spill] sm:$0xff]  ;;  %v10975_v44 = vld [vmem:[#allocation34_spill] sm:$0xff]  ;;  %v10976_v28 = vld [vmem:[#allocation23_spill] sm:$0xff] }
 0x258   : > { %v2935_v39 = vpop.f32.mrf.mxu0  ;;  %v2115_v60 = vadd.f32 %v10974_v20, %v10973_v35  ;;  %v1811_v58 = vadd.f32 %v10975_v44, %v1506_v9  ;;  %v2723_v37 = vadd.f32 %v9362_v42, %v2418_v29  ;;  %v2725_v9 = vadd.f32 %v9336_v31, %v10980_v12 }
 0x259   : > { %v3118_v17 = vadd.f32 %v3117_v33, %v9447_v63  ;;  %v3187_v36 = vadd.f32 %v3186_v2, %v3156_v51  ;;  %v9467_v19 = vadd.f32 %v2935_v39, %v2719_v1  ;;  %v1205_v1 = vadd.f32 %v10976_v28, %v880_v16  ;;  %v10977_v51 = vld [vmem:[#allocation48_spill] sm:$0xff]  ;;  %v10978_v33 = vld [vmem:[#allocation54_spill] sm:$0xff] }
 0x25a   : > { %v7566_v8 = vpop.f32.mrf.mxu0  ;;  %v2724_v2 = vadd.f32 %v9314_v41, %v10977_v51  ;;  %v2421_v59 = vadd.f32 %v10978_v33, %v2115_v60  ;;  %v3160_v30 = vmul.f32 %v9472_v32, %v9472_v32  ;;  %v10982_v16 = vld [vmem:[#allocation56_spill] sm:$0xff] }
 0x25b   : > { %v3188_v0 = vadd.f32 %v3187_v36, %v3157_v52  ;;  %v3119_v7 = vadd.f32 %v3118_v17, %v9467_v19  ;;  %v3158_v13 = vmul.f32 %v9467_v19, %v9467_v19  ;;  %v10979_v52 = vld [vmem:[#allocation35_spill] sm:$0xff] }
 0x25c   : > { %v2948_v14 = vpop.f32.mrf.mxu0  ;;  %v2116_v36 = vadd.f32 %v10979_v52, %v1811_v58  ;;  %v9500_v4 = vadd.f32 %v7566_v8, %v2724_v2  ;;  %v2726_v43 = vadd.f32 %v9402_v47, %v2421_v59  ;;  %v10983_v58 = vld [vmem:[#allocation18_spill] sm:$0xff] }
 0x25d   : > { %v3120_v34 = vadd.f32 %v3119_v7, %v9462_v62  ;;  %v3189_v56 = vadd.f32 %v3188_v0, %v3158_v13  ;;  %v9485_v26 = vadd.f32 %v2948_v14, %v2722_v49  ;;  %v9498_v49 = vpop.f32.mrf.mxu1  ;;  %v10981_v13 = vld [vmem:[#allocation24_spill] sm:$0xff]  ;;  %v10984_v14 = vld [vmem:[#allocation19_spill] sm:$0xff] }
 0x25e   : > { %v7567_v3 = vpop.f32.mrf.mxu0  ;;  %v1510_v24 = vadd.f32 %v10981_v13, %v1205_v1  ;;  %v2422_v35 = vadd.f32 %v10982_v16, %v2116_v36  ;;  %v10987_v1 = vld [vmem:[#allocation38_spill] sm:$0xff]  ;;  %v3163_v33 = vmul.f32 %v9500_v4, %v9500_v4  ;;  %v10991_v13 = vld [vmem:[#allocation39_spill] sm:$0xff] }
 0x25f   : > { %v3190_v39 = vadd.f32 %v3189_v56, %v3159_v27  ;;  %v3121_v17 = vadd.f32 %v3120_v34, %v9472_v32  ;;  %v3161_v42 = vmul.f32 %v9485_v26, %v9485_v26  ;;  %v9510_v60 = vadd.f32 %v7567_v3, %v2725_v9  ;;  %v10985_v34 = vld [vmem:[#allocation36_spill] sm:$0xff]  ;;  %v10986_v56 = vld [vmem:[#allocation37_spill] sm:$0xff]  ;;  %v2678_v47 = vpop.f32.mrf.mxu1  ;;  %v10990_v36 = vld [vmem:[#allocation58_spill] sm:$0xff] }
 0x260   : > { %v2951_v41 = vpop.f32.mrf.mxu0  ;;  %v896_v27 = vadd.f32 %v10984_v14, %v10983_v58  ;;  %v2119_v28 = vadd.f32 %v10986_v56, %v10985_v34  ;;  %v1815_v51 = vadd.f32 %v10987_v1, %v1510_v24  ;;  %v10993_v14 = vld [vmem:[#allocation26_spill] sm:$0xff]  ;;  %v10994_v56 = vld [vmem:[#allocation60_spill] sm:$0xff] }
 0x261   : > { %v3122_v0 = vadd.f32 %v3121_v17, %v9485_v26  ;;  %v3191_v29 = vadd.f32 %v3190_v39, %v3160_v30  ;;  %v9505_v7 = vadd.f32 %v2951_v41, %v2723_v37  ;;  %v10988_v30 = vld [vmem:[#allocation25_spill] sm:$0xff]  ;;  %v2727_v41 = vadd.f32 %v9442_v55, %v2422_v35 }
 0x262   : > { %v7570_v31 = vpop.f32.mrf.mxu0  ;;  %v1209_v39 = vadd.f32 %v10988_v30, %v896_v27  ;;  %v10989_v17 = vld [vmem:[#allocation53_spill] sm:$0xff]  ;;  %v2425_v12 = vadd.f32 %v10990_v36, %v2119_v28  ;;  %v2120_v24 = vadd.f32 %v10991_v13, %v1815_v51 }
 0x263   : > { %v3192_v20 = vadd.f32 %v3191_v29, %v3161_v42  ;;  %v3123_v8 = vadd.f32 %v3122_v0, %v9505_v7  ;;  %v3162_v44 = vmul.f32 %v9505_v7, %v9505_v7  ;;  %v2728_v52 = vadd.f32 %v9379_v6, %v10989_v17  ;;  %v10997_v17 = vld [vmem:[#allocation42_spill] sm:$0xff] }
 0x264   : > { %v2964_v2 = vpop.f32.mrf.mxu0  ;;  %v3164_v0 = vmul.f32 %v9510_v60, %v9510_v60  ;;  %v1514_v27 = vadd.f32 %v10993_v14, %v1209_v39  ;;  %v2730_v34 = vadd.f32 %v2675_v21, %v2425_v12  ;;  %v2426_v28 = vadd.f32 %v10994_v56, %v2120_v24 }
 0x265   : > { %v3124_v59 = vadd.f32 %v3123_v8, %v9500_v4  ;;  %v3193_v3 = vadd.f32 %v3192_v20, %v3162_v44  ;;  %v9523_v37 = vadd.f32 %v2964_v2, %v2726_v43  ;;  %v10992_v43 = vld [vmem:[#allocation55_spill] sm:$0xff]  ;;  %v7530_v20 = vpop.f32.mrf.mxu1  ;;  %v9536_v8 = vadd.f32 %v7570_v31, %v2728_v52 }
 0x266   : > { %v7571_v9 = vpop.f32.mrf.mxu0  ;;  %v2729_v16 = vadd.f32 %v9420_v18, %v10992_v43  ;;  %v1819_v52 = vadd.f32 %v10997_v17, %v1514_v27  ;;  %v2731_v24 = vadd.f32 %v2678_v47, %v2426_v28 }
 0x267   : > { %v3194_v42 = vadd.f32 %v3193_v3, %v3163_v33  ;;  %v3125_v29 = vadd.f32 %v3124_v59, %v9510_v60  ;;  %v3165_v55 = vmul.f32 %v9523_v37, %v9523_v37  ;;  %v9550_v33 = vld [vmem:[#allocation9 + $0xf8] sm:$0xff]   ;;  %v10995_v59 = vld [vmem:[#allocation40_spill] sm:$0xff]  ;;  %v2691_v39 = vpop.f32.mrf.mxu1  ;;  %v3167_v36 = vmul.f32 %v9536_v8, %v9536_v8 }
 0x268   : > { %v2967_v6 = vpop.f32.mrf.mxu0  ;;  %v9545_v18 = vadd.f32 %v7571_v9, %v2729_v16  ;;  %v10996_v3 = vld [vmem:[#allocation41_spill] sm:$0xff]  ;;  %7724 = vmatprep.subr.bf16.mxu0 %v9550_v33 }
 0x269   : > { %v3126_v44 = vadd.f32 %v3125_v29, %v9523_v37  ;;  %v3195_v35 = vadd.f32 %v3194_v42, %v3164_v0  ;;  %v9541_v58 = vadd.f32 %v2967_v6, %v2727_v41  ;;  %v2123_v30 = vadd.f32 %v10996_v3, %v10995_v59  ;;  %v10998_v0 = vld [vmem:[#allocation57_spill] sm:$0xff]  ;;  %v7531_v27 = vpop.f32.mrf.mxu1 }
 0x26a   : > { %v7574_v1 = vpop.f32.mrf.mxu0  ;;  %v2732_v42 = vadd.f32 %v9460_v15, %v10998_v0  ;;  %v3168_v43 = vmul.f32 %v9545_v18, %v9545_v18 }
 0x26b   : > { %v3196_v51 = vadd.f32 %v3195_v35, %v3165_v55  ;;  %v3127_v31 = vadd.f32 %v3126_v44, %v9541_v58  ;;  %v3166_v2 = vmul.f32 %v9541_v58, %v9541_v58  ;;  %v2429_v29 = vadd.f32 %v9308_v25, %v2123_v30  ;;  %v10999_v44 = vld [vmem:[#allocation43_spill] sm:$0xff]  ;;  %v2694_v30 = vpop.f32.mrf.mxu1 }
 0x26c   : > { %v2980_v21 = vpop.f32.mrf.mxu0  ;;  %v2124_v55 = vadd.f32 %v10999_v44, %v1819_v52  ;;  %v11000_v35 = vld [vmem:[#allocation59_spill] sm:$0xff] }
 0x26d   : > { %v3128_v12 = vadd.f32 %v3127_v31, %v9536_v8  ;;  %v3197_v9 = vadd.f32 %v3196_v51, %v3166_v2  ;;  %v9558_v41 = vadd.f32 %v2980_v21, %v2730_v34  ;;  %v2733_v14 = vadd.f32 %v9498_v49, %v11000_v35 }
 0x26e   : > { %v7575_v13 = vpop.f32.mrf.mxu0  ;;  %v9570_v34 = vadd.f32 %v7574_v1, %v2732_v42  ;;  %v2734_v51 = vadd.f32 %v2691_v39, %v2429_v29  ;;  %v2430_v31 = vadd.f32 %v9316_v22, %v2124_v55  ;;  %v2736_v22 = vadd.f32 %v7530_v20, %v9304_v40 }
 0x26f   : > { %v3198_v16 = vadd.f32 %v3197_v9, %v3167_v36  ;;  %v3129_v6 = vadd.f32 %v3128_v12, %v9545_v18  ;;  %v3169_v25 = vmul.f32 %v9558_v41, %v9558_v41  ;;  %v9578_v3 = vadd.f32 %v7575_v13, %v2733_v14  ;;  %v11001_v13 = vld [vmem:[#allocation61_spill] sm:$0xff] }
 0x270   : > { %v2983_v56 = vpop.f32.mrf.mxu0  ;;  %v3171_v52 = vmul.f32 %v9570_v34, %v9570_v34  ;;  %v2735_v9 = vadd.f32 %v2694_v30, %v2430_v31 }
 0x271   : > { %v3130_v15 = vadd.f32 %v3129_v6, %v9558_v41  ;;  %v3199_v47 = vadd.f32 %v3198_v16, %v3168_v43  ;;  %v9575_v28 = vadd.f32 %v2983_v56, %v2731_v24  ;;  %v3172_v0 = vmul.f32 %v9578_v3, %v9578_v3 }
 0x272   : > { %v7578_v2 = vpop.f32.mrf.mxu0  ;;  %v2737_v24 = vadd.f32 %v7531_v27, %v11001_v13 }
 0x273   : > { %v3200_v59 = vadd.f32 %v3199_v47, %v3169_v25  ;;  %v3131_v49 = vadd.f32 %v3130_v15, %v9575_v28  ;;  %v3170_v1 = vmul.f32 %v9575_v28, %v9575_v28  ;;  %v9593_v43 = vadd.f32 %v7578_v2, %v2736_v22 }
 0x274   : > { %v2996_v17 = vpop.f32.mrf.mxu0 }
 0x275   : > { %v3132_v21 = vadd.f32 %v3131_v49, %v9570_v34  ;;  %v3201_v36 = vadd.f32 %v3200_v59, %v3170_v1  ;;  %v9586_v39 = vadd.f32 %v2996_v17, %v2734_v51  ;;  %v3175_v15 = vmul.f32 %v9593_v43, %v9593_v43 }
 0x276   : > { %v7579_v12 = vpop.f32.mrf.mxu0 }
 0x277   : > { %v3202_v42 = vadd.f32 %v3201_v36, %v3171_v52  ;;  %v3133_v29 = vadd.f32 %v3132_v21, %v9578_v3  ;;  %v3173_v44 = vmul.f32 %v9586_v39, %v9586_v39  ;;  %v9598_v35 = vadd.f32 %v7579_v12, %v2737_v24 }
 0x278   : > { %v2999_v16 = vpop.f32.mrf.mxu0 }
 0x279   : > { %v3134_v6 = vadd.f32 %v3133_v29, %v9586_v39  ;;  %v3203_v55 = vadd.f32 %v3202_v42, %v3172_v0  ;;  %v3040_v40 = vadd.f32 %v2999_v16, %v2735_v9  ;;  %v3176_v47 = vmul.f32 %v9598_v35, %v9598_v35 }
 0x27b   : > { %v3204_v20 = vadd.f32 %v3203_v55, %v3173_v44  ;;  %v3135_v14 = vadd.f32 %v3134_v6, %v3040_v40  ;;  %v3174_v56 = vmul.f32 %v3040_v40, %v3040_v40 }
 0x27d   : > { %v3136_v27 = vadd.f32 %v3135_v14, %v9593_v43  ;;  %v3205_v25 = vadd.f32 %v3204_v20, %v3174_v56 }
 0x27f   : > { %v3137_v51 = vadd.f32 %v3136_v27, %v9598_v35  ;;  %v3206_v31 = vadd.f32 %v3205_v25, %v3175_v15 }
 0x281   : > { %v3138_v2 = vrot.slane %v3137_v51, 4  ;;  %v3207_v59 = vadd.f32 %v3206_v31, %v3176_v47 }
 0x283   : > { %v3139_v49 = vadd.f32 %v3138_v2, %v3137_v51  ;;  %v3208_v1 = vrot.slane %v3207_v59, 4 }
 0x285   : > { %v3140_v30 = vrot.slane %v3139_v49, 2  ;;  %v3209_v17 = vadd.f32 %v3208_v1, %v3207_v59 }
 0x287   : > { %v3141_v52 = vadd.f32 %v3140_v30, %v3139_v49  ;;  %v3210_v21 = vrot.slane %v3209_v17, 2 }
 0x289   : > { %v3142_v36 = vrot.slane %v3141_v52, 1  ;;  %v3211_v22 = vadd.f32 %v3210_v21, %v3209_v17 }
 0x28b   : > { %v3143_v12 = vadd.f32 %v3142_v36, %v3141_v52  ;;  %v3212_v9 = vrot.slane %v3211_v22, 1 }
 0x28d   : > { %v3144_v0 = vmul.f32 0.00390625, %v3143_v12  ;;  %v3213_v42 = vadd.f32 %v3212_v9, %v3211_v22 }
 0x28f   : > { %v3214_v29 = vmul.f32 0.00390625, %v3213_v42  ;;  %v3215_v13 = vmul.f32 %v3144_v0, %v3144_v0  ;;  %v3220_v44 = vsub.f32 0.0, %v3144_v0 }
 0x291   : > { %v3216_v24 = vsub.f32 %v3214_v29, %v3215_v13 }
 0x293   : > { %v3217_v16 = vmax.f32 %v3216_v24, 0.0 }
 0x295   : > { %v3218_v6 = vadd.f32 1e-05, %v3217_v16 }
 0x297   : > { %8229 = vrsqrt.f32 %v3218_v6 }
 0x2a4   : > { %v8230_v55 = vpop.eup %8229 }
 0x2a5   : > { %v9606_v20 = vmul.f32 %v8230_v55, %v3220_v44  ;;  %v3251_v14 = vmul.f32 %v8230_v55, %v3040_v40  ;;  %v3222_v56 = vmul.f32 %v8230_v55, %v9333_v46  ;;  %v3223_v15 = vmul.f32 %v8230_v55, %v9344_v45 }
 0x2a6   : > { %v3224_v27 = vmul.f32 %v8230_v55, %v9342_v57  ;;  %v3225_v25 = vmul.f32 %v8230_v55, %v9353_v5  ;;  %v3226_v47 = vmul.f32 %v8230_v55, %v9367_v38  ;;  %v3227_v51 = vmul.f32 %v8230_v55, %v9386_v50 }
 0x2a7   : > { %v3283_v31 = vadd.f32 %v3251_v14, %v9606_v20  ;;  %v3228_v2 = vmul.f32 %v8230_v55, %v9381_v61  ;;  %v3229_v59 = vmul.f32 %v8230_v55, %v9392_v11  ;;  %v3230_v40 = vmul.f32 %v8230_v55, %v9407_v53 }
 0x2a8   : > { %v3231_v46 = vmul.f32 %v8230_v55, %v9427_v54  ;;  %v3232_v45 = vmul.f32 %v8230_v55, %v9422_v23  ;;  %v3233_v57 = vmul.f32 %v8230_v55, %v9432_v48  ;;  %v3234_v5 = vmul.f32 %v8230_v55, %v9447_v63 }
 0x2a9   : > { %v9622_v49 = vmax.f32 %v3283_v31, 0.0  ;;  %v3235_v38 = vmul.f32 %v8230_v55, %v9467_v19  ;;  %v3236_v50 = vmul.f32 %v8230_v55, %v9462_v62  ;;  %v3237_v61 = vmul.f32 %v8230_v55, %v9472_v32 }
 0x2aa   : > { %v3238_v11 = vmul.f32 %v8230_v55, %v9485_v26  ;;  %v3239_v53 = vmul.f32 %v8230_v55, %v9505_v7  ;;  %v3240_v54 = vmul.f32 %v8230_v55, %v9500_v4  ;;  %v3241_v23 = vmul.f32 %v8230_v55, %v9510_v60 }
 0x2ab   : > { %v3242_v48 = vmul.f32 %v8230_v55, %v9523_v37  ;;  %v3243_v63 = vmul.f32 %v8230_v55, %v9541_v58  ;;  %v3244_v1 = vmul.f32 %v8230_v55, %v9536_v8  ;;  %v3245_v19 = vmul.f32 %v8230_v55, %v9545_v18  ;;  %3347 = vst [vmem:[#allocation2 + $0x171] sm:$0xff] %v9622_v49 }
 0x2ac   : > { %3353 = vst [vmem:[#allocation2 + $0x1a1] sm:$0xff] %v9622_v49  ;;  %v3246_v62 = vmul.f32 %v8230_v55, %v9558_v41  ;;  %v3247_v32 = vmul.f32 %v8230_v55, %v9575_v28  ;;  %v3248_v26 = vmul.f32 %v8230_v55, %v9570_v34  ;;  %v3249_v4 = vmul.f32 %v8230_v55, %v9578_v3 }
 0x2ad   : > { %v3250_v7 = vmul.f32 %v8230_v55, %v9586_v39  ;;  %v3252_v60 = vmul.f32 %v8230_v55, %v9593_v43  ;;  %v3253_v37 = vmul.f32 %v8230_v55, %v9598_v35  ;;  %v9645_v8 = vadd.f32 %v3222_v56, %v9606_v20 }
 0x2ae   : > { %v9648_v58 = vadd.f32 %v3223_v15, %v9606_v20  ;;  %v3256_v18 = vadd.f32 %v3224_v27, %v9606_v20  ;;  %v3257_v41 = vadd.f32 %v3225_v25, %v9606_v20  ;;  %v9653_v34 = vadd.f32 %v3226_v47, %v9606_v20 }
 0x2af   : > { %v9656_v28 = vadd.f32 %v3227_v51, %v9606_v20  ;;  %v9659_v3 = vadd.f32 %v3228_v2, %v9606_v20  ;;  %v9662_v39 = vadd.f32 %v3229_v59, %v9606_v20  ;;  %v9665_v43 = vadd.f32 %v3230_v40, %v9606_v20 }
 0x2b0   : > { %v9668_v35 = vadd.f32 %v3231_v46, %v9606_v20  ;;  %v9671_v30 = vadd.f32 %v3232_v45, %v9606_v20  ;;  %v9674_v17 = vadd.f32 %v3233_v57, %v9606_v20  ;;  %v9677_v52 = vadd.f32 %v3234_v5, %v9606_v20 }
 0x2b1   : > { %v9680_v21 = vadd.f32 %v3235_v38, %v9606_v20  ;;  %v9683_v36 = vadd.f32 %v3236_v50, %v9606_v20  ;;  %v9686_v22 = vadd.f32 %v3237_v61, %v9606_v20  ;;  %v9689_v12 = vadd.f32 %v3238_v11, %v9606_v20 }
 0x2b2   : > { %v9692_v9 = vadd.f32 %v3239_v53, %v9606_v20  ;;  %v9695_v0 = vadd.f32 %v3240_v54, %v9606_v20  ;;  %v9698_v42 = vadd.f32 %v3241_v23, %v9606_v20  ;;  %v9701_v29 = vadd.f32 %v3242_v48, %v9606_v20  ;;  %v3405_v13 = vld [vmem:[#allocation2 + $0x177] sm:$0x1] }
 0x2b3   : > { %v9704_v24 = vadd.f32 %v3243_v63, %v9606_v20  ;;  %v9707_v16 = vadd.f32 %v3244_v1, %v9606_v20  ;;  %v9710_v6 = vadd.f32 %v3245_v19, %v9606_v20  ;;  %v9713_v44 = vadd.f32 %v3246_v62, %v9606_v20  ;;  %3423 = vst [vmem:[#allocation2 + $0x179] sm:$0x1] %v3405_v13  ;;  %v3407_v55 = vld [vmem:[#allocation2 + $0x1a7] sm:$0x1] }
 0x2b4   : > { %v9716_v14 = vadd.f32 %v3247_v32, %v9606_v20  ;;  %v9719_v56 = vadd.f32 %v3248_v26, %v9606_v20  ;;  %v9722_v15 = vadd.f32 %v3249_v4, %v9606_v20  ;;  %v3282_v27 = vadd.f32 %v3250_v7, %v9606_v20  ;;  %3425 = vst [vmem:[#allocation2 + $0x1a9] sm:$0x1] %v3407_v55  ;;  %v8175_v55 = vld [vmem:[#allocation9 + $0xa8] sm:$0xff]  }
 0x2b5   : > { %v9726_v25 = vadd.f32 %v3252_v60, %v9606_v20  ;;  %v9729_v47 = vadd.f32 %v3253_v37, %v9606_v20  ;;  %v3286_v51 = vmax.f32 %v9645_v8, 0.0  ;;  %v3287_v31 = vmax.f32 %v9648_v58, 0.0 }
 0x2b6   : > { %v3288_v2 = vmax.f32 %v3256_v18, 0.0  ;;  %v3289_v59 = vmax.f32 %v3257_v41, 0.0  ;;  %v3290_v40 = vmax.f32 %v9653_v34, 0.0  ;;  %v3291_v46 = vmax.f32 %v9656_v28, 0.0 }
 0x2b7   : > { %v3292_v45 = vmax.f32 %v9659_v3, 0.0  ;;  %v3293_v57 = vmax.f32 %v9662_v39, 0.0  ;;  %v3294_v5 = vmax.f32 %v9665_v43, 0.0  ;;  %v3295_v38 = vmax.f32 %v9668_v35, 0.0  ;;  %3318 = vst [vmem:[#allocation2 + $0x19] sm:$0xff] %v3286_v51  ;;  %3319 = vst [vmem:[#allocation2 + $0x21] sm:$0xff] %v3287_v31 }
 0x2b8   : > { %v3296_v20 = vmax.f32 %v9671_v30, 0.0  ;;  %v3297_v50 = vmax.f32 %v9674_v17, 0.0  ;;  %v3298_v61 = vmax.f32 %v9677_v52, 0.0  ;;  %v3299_v11 = vmax.f32 %v9680_v21, 0.0  ;;  %3320 = vst [vmem:[#allocation2 + $0x31] sm:$0xff] %v3288_v2  ;;  %3321 = vst [vmem:[#allocation2 + $0x39] sm:$0xff] %v3289_v59 }
 0x2b9   : > { %3322 = vst [vmem:[#allocation2 + $0x49] sm:$0xff] %v3290_v40  ;;  %3323 = vst [vmem:[#allocation2 + $0x51] sm:$0xff] %v3291_v46  ;;  %v3300_v53 = vmax.f32 %v9683_v36, 0.0  ;;  %v3301_v54 = vmax.f32 %v9686_v22, 0.0  ;;  %v3302_v23 = vmax.f32 %v9689_v12, 0.0  ;;  %v3303_v48 = vmax.f32 %v9692_v9, 0.0 }
 0x2ba   : > { %3350 = vst [vmem:[#allocation2 + $0x1] sm:$0xff] %v3288_v2  ;;  %3351 = vst [vmem:[#allocation2 + $0x9] sm:$0xff] %v3289_v59  ;;  %v3304_v63 = vmax.f32 %v9695_v0, 0.0  ;;  %v3305_v1 = vmax.f32 %v9698_v42, 0.0  ;;  %v3306_v19 = vmax.f32 %v9701_v29, 0.0  ;;  %v3307_v62 = vmax.f32 %v9704_v24, 0.0 }
 0x2bb   : > { %3324 = vst [vmem:[#allocation2 + $0x61] sm:$0xff] %v3292_v45  ;;  %3325 = vst [vmem:[#allocation2 + $0x69] sm:$0xff] %v3293_v57  ;;  %v3308_v32 = vmax.f32 %v9707_v16, 0.0  ;;  %v3309_v26 = vmax.f32 %v9710_v6, 0.0  ;;  %v3310_v4 = vmax.f32 %v9713_v44, 0.0  ;;  %v3311_v7 = vmax.f32 %v9716_v14, 0.0 }
 0x2bc   : > { %3326 = vst [vmem:[#allocation2 + $0x79] sm:$0xff] %v3294_v5  ;;  %3327 = vst [vmem:[#allocation2 + $0x81] sm:$0xff] %v3295_v38  ;;  %v3312_v60 = vmax.f32 %v9719_v56, 0.0  ;;  %v3313_v37 = vmax.f32 %v9722_v15, 0.0  ;;  %v9759_v8 = vmax.f32 %v3282_v27, 0.0  ;;  %v3316_v58 = vmax.f32 %v9726_v25, 0.0 }
 0x2bd   : > { %3328 = vst [vmem:[#allocation2 + $0x91] sm:$0xff] %v3296_v20  ;;  %3329 = vst [vmem:[#allocation2 + $0x99] sm:$0xff] %v3297_v50  ;;  %v3317_v18 = vmax.f32 %v9729_v47, 0.0  ;;  %v3522_v41 = vpack.c.bf16 %v3289_v59, %v3288_v2  ;;  %v3523_v34 = vpack.c.bf16 %v3287_v31, %v3286_v51  ;;  %v9763_v28 = vpack.c.bf16 %v3291_v46, %v3290_v40  ;;  %v8174_v43 = vld [vmem:[#allocation9 + $0xb0] sm:$0xff]   ;;  %v8176_v25 = vld [vmem:[#allocation9 + $0xa0] sm:$0xff]  }
 0x2be   : > { %3330 = vst [vmem:[#allocation2 + $0xa9] sm:$0xff] %v3298_v61  ;;  %3331 = vst [vmem:[#allocation2 + $0xb1] sm:$0xff] %v3299_v11  ;;  %v3355_v39 = vld [vmem:[#allocation2 + $0x1a] sm:$0x1]  ;;  %v3526_v35 = vpack.c.bf16 %v3293_v57, %v3292_v45  ;;  %v9769_v30 = vpack.c.bf16 %v3295_v38, %v3294_v5  ;;  %v9771_v17 = vpack.c.bf16 %v3297_v50, %v3296_v20  ;;  %v3391_v21 = vld [vmem:[#allocation2 + $0x27] sm:$0x1] }
 0x2bf   : > { %3332 = vst [vmem:[#allocation2 + $0xc1] sm:$0xff] %v3300_v53  ;;  %3333 = vst [vmem:[#allocation2 + $0xc9] sm:$0xff] %v3301_v54  ;;  %v9773_v52 = vpack.c.bf16 %v3299_v11, %v3298_v61  ;;  %7596 = vmatprep.mubr.bf16.mxu1 %v3522_v41  ;;  %v3356_v22 = vld [vmem:[#allocation2 + $0x32] sm:$0x1]  ;;  %v9775_v12 = vpack.c.bf16 %v3301_v54, %v3300_v53  ;;  %v9777_v9 = vpack.c.bf16 %v3303_v48, %v3302_v23  ;;  %v3429_v31 = vld [vmem:[#allocation2 + $0x20] sm:$0xff] }
 0x2c0   : > { %3334 = vst [vmem:[#allocation2 + $0xd9] sm:$0xff] %v3302_v23  ;;  %3335 = vst [vmem:[#allocation2 + $0xe1] sm:$0xff] %v3303_v48  ;;  %v9779_v0 = vpack.c.bf16 %v3305_v1, %v3304_v63  ;;  %v9781_v3 = vpack.c.bf16 %v3307_v62, %v3306_v19  ;;  %7597 = vmatmul.mubr.bf16.vlgmr.msra.gmra.mxu1 %v3523_v34  ;;  %v3357_v42 = vld [vmem:[#allocation2 + $0x4a] sm:$0x1]  ;;  %v9783_v29 = vpack.c.bf16 %v3309_v26, %v3308_v32  ;;  %v3431_v38 = vld [vmem:[#allocation2 + $0x38] sm:$0xff] }
 0x2c1   : > { %3336 = vst [vmem:[#allocation2 + $0xf1] sm:$0xff] %v3304_v63  ;;  %3337 = vst [vmem:[#allocation2 + $0xf9] sm:$0xff] %v3305_v1  ;;  %v3354_v36 = vld [vmem:[#allocation2 + $0x2] sm:$0x1]  ;;  %v9785_v13 = vpack.c.bf16 %v3311_v7, %v3310_v4  ;;  %v9787_v24 = vpack.c.bf16 %v3313_v37, %v3312_v60  ;;  %v3537_v16 = vpack.c.bf16 %v9622_v49, %v9759_v8  ;;  %7600 = vmatprep.mubr.bf16.mxu1 %v3522_v41  ;;  %v3427_v40 = vld [vmem:[#allocation2 + $0x8] sm:$0xff] }
 0x2c2   : > { %3338 = vst [vmem:[#allocation2 + $0x109] sm:$0xff] %v3306_v19  ;;  %3339 = vst [vmem:[#allocation2 + $0x111] sm:$0xff] %v3307_v62  ;;  %7677 = vmatpush3.bf16.msra.mxu1 %v9338_v10  ;;  %v3358_v6 = vld [vmem:[#allocation2 + $0x62] sm:$0x1]  ;;  %v8177_v11 = vld [vmem:[#allocation9 + $0x98] sm:$0xff]  }
 0x2c3   : > { %3340 = vst [vmem:[#allocation2 + $0x121] sm:$0xff] %v3308_v32  ;;  %3341 = vst [vmem:[#allocation2 + $0x129] sm:$0xff] %v3309_v26  ;;  %v3359_v44 = vld [vmem:[#allocation2 + $0x7a] sm:$0x1]  ;;  %7678 = vmatprep.subr.bf16.mxu1 %v8174_v43  ;;  %v8180_v20 = vld [vmem:[#allocation9 + $0xf0] sm:$0xff]  }
 0x2c4   : > { %3342 = vst [vmem:[#allocation2 + $0x139] sm:$0xff] %v3310_v4  ;;  %3343 = vst [vmem:[#allocation2 + $0x141] sm:$0xff] %v3311_v7  ;;  %v3360_v14 = vld [vmem:[#allocation2 + $0x92] sm:$0x1]  ;;  %v3390_v53 = vld [vmem:[#allocation2 + $0xf] sm:$0x1] }
 0x2c5   : > { %3352 = vst [vmem:[#allocation2 + $0x199] sm:$0xff] %v9759_v8  ;;  %3344 = vst [vmem:[#allocation2 + $0x151] sm:$0xff] %v3312_v60  ;;  %v3361_v56 = vld [vmem:[#allocation2 + $0xaa] sm:$0x1]  ;;  %v8178_v23 = vld [vmem:[#allocation9 + $0x90] sm:$0xff]  }
 0x2c6   : > { %3345 = vst [vmem:[#allocation2 + $0x159] sm:$0xff] %v3313_v37  ;;  %3346 = vst [vmem:[#allocation2 + $0x169] sm:$0xff] %v9759_v8  ;;  %v3362_v15 = vld [vmem:[#allocation2 + $0xc2] sm:$0x1]  ;;  %7679 = vmatpush3.bf16.msra.mxu1 %v8174_v43  ;;  %v8182_v63 = vld [vmem:[#allocation9 + $0xe8] sm:$0xff]  }
 0x2c7   : > { %3348 = vst [vmem:[#allocation2 + $0x181] sm:$0xff] %v3316_v58  ;;  %3349 = vst [vmem:[#allocation2 + $0x189] sm:$0xff] %v3317_v18  ;;  %v3363_v27 = vld [vmem:[#allocation2 + $0xda] sm:$0x1]  ;;  %7680 = vmatprep.subr.bf16.mxu1 %v8175_v55  ;;  %v3392_v1 = vld [vmem:[#allocation2 + $0x3f] sm:$0x1] }
 0x2c8   : > { %3373 = vst [vmem:[#allocation2 + $0x18] sm:$0x1] %v3355_v39  ;;  %3409 = vst [vmem:[#allocation2 + $0x29] sm:$0x1] %v3391_v21  ;;  %v3364_v47 = vld [vmem:[#allocation2 + $0xf2] sm:$0x1]  ;;  %7601 = vmatmul.mubr.bf16.gmra.mxu1 %v9763_v28 }
 0x2c9   : > { %3372 = vst [vmem:[#allocation2] sm:$0x1] %v3354_v36  ;;  %3374 = vst [vmem:[#allocation2 + $0x30] sm:$0x1] %v3356_v22  ;;  %v3365_v51 = vld [vmem:[#allocation2 + $0x10a] sm:$0x1]  ;;  %7604 = vmatprep.mubr.bf16.mxu1 %v3526_v35 }
 0x2ca   : > { %3375 = vst [vmem:[#allocation2 + $0x48] sm:$0x1] %v3357_v42  ;;  %3376 = vst [vmem:[#allocation2 + $0x60] sm:$0x1] %v3358_v6  ;;  %v3366_v2 = vld [vmem:[#allocation2 + $0x122] sm:$0x1]  ;;  %7681 = vmatpush3.bf16.msra.mxu1 %v8175_v55 }
 0x2cb   : > { %3377 = vst [vmem:[#allocation2 + $0x78] sm:$0x1] %v3359_v44  ;;  %3378 = vst [vmem:[#allocation2 + $0x90] sm:$0x1] %v3360_v14  ;;  %v3367_v5 = vld [vmem:[#allocation2 + $0x13a] sm:$0x1]  ;;  %7682 = vmatprep.subr.bf16.mxu1 %v8176_v25 }
 0x2cc   : > { %3379 = vst [vmem:[#allocation2 + $0xa8] sm:$0x1] %v3361_v56  ;;  %3380 = vst [vmem:[#allocation2 + $0xc0] sm:$0x1] %v3362_v15  ;;  %v3368_v50 = vld [vmem:[#allocation2 + $0x152] sm:$0x1] }
 0x2cd   : > { %3381 = vst [vmem:[#allocation2 + $0xd8] sm:$0x1] %v3363_v27  ;;  %3382 = vst [vmem:[#allocation2 + $0xf0] sm:$0x1] %v3364_v47  ;;  %v3369_v54 = vld [vmem:[#allocation2 + $0x16a] sm:$0x1] }
 0x2ce   : > { %3383 = vst [vmem:[#allocation2 + $0x108] sm:$0x1] %v3365_v51  ;;  %3384 = vst [vmem:[#allocation2 + $0x120] sm:$0x1] %v3366_v2  ;;  %7683 = vmatpush3.bf16.msra.mxu1 %v8176_v25  ;;  %v3393_v62 = vld [vmem:[#allocation2 + $0x57] sm:$0x1] }
 0x2cf   : > { %v3428_v10 = vld [vmem:[#allocation2 + $0x18] sm:$0xff]  ;;  %3385 = vst [vmem:[#allocation2 + $0x138] sm:$0x1] %v3367_v5  ;;  %3386 = vst [vmem:[#allocation2 + $0x150] sm:$0x1] %v3368_v50  ;;  %7684 = vmatprep.subr.bf16.mxu1 %v8177_v11  ;;  %v3433_v32 = vld [vmem:[#allocation2 + $0x50] sm:$0xff] }
 0x2d0   : > { %v3426_v59 = vld [vmem:[#allocation2] sm:$0xff]  ;;  %v9792_v46 = vpack.c.bf16 %v3429_v31, %v3428_v10  ;;  %v3430_v45 = vld [vmem:[#allocation2 + $0x30] sm:$0xff]  ;;  %3408 = vst [vmem:[#allocation2 + $0x11] sm:$0x1] %v3390_v53  ;;  %3387 = vst [vmem:[#allocation2 + $0x168] sm:$0x1] %v3369_v54  ;;  %7605 = vmatmul.mubr.bf16.gmra.mxu1 %v9769_v30 }
 0x2d1   : > { %v3458_v57 = vpack.c.bf16 %v3427_v40, %v3426_v59  ;;  %v9795_v61 = vpack.c.bf16 %v3431_v38, %v3430_v45  ;;  %v3432_v48 = vld [vmem:[#allocation2 + $0x48] sm:$0xff]  ;;  %v3434_v19 = vld [vmem:[#allocation2 + $0x60] sm:$0xff]  ;;  %3410 = vst [vmem:[#allocation2 + $0x41] sm:$0x1] %v3392_v1  ;;  %3411 = vst [vmem:[#allocation2 + $0x59] sm:$0x1] %v3393_v62  ;;  %7608 = vmatprep.mubr.bf16.mxu1 %v9771_v17 }
 0x2d2   : > { %v3394_v26 = vld [vmem:[#allocation2 + $0x6f] sm:$0x1]  ;;  %v9801_v4 = vpack.c.bf16 %v3433_v32, %v3432_v48  ;;  %7685 = vmatpush3.bf16.msra.mxu1 %v8177_v11  ;;  %v8183_v7 = vld [vmem:[#allocation9 + $0xe0] sm:$0xff]   ;;  %v3395_v60 = vld [vmem:[#allocation2 + $0x87] sm:$0x1] }
 0x2d3   : > { %7644 = vmatprep.mubr.bf16.mxu0 %v3458_v57  ;;  %3412 = vst [vmem:[#allocation2 + $0x71] sm:$0x1] %v3394_v26  ;;  %7686 = vmatprep.subr.bf16.mxu1 %v8178_v23  ;;  %v8181_v58 = vld [vmem:[#allocation9 + $0x88] sm:$0xff]   ;;  %3413 = vst [vmem:[#allocation2 + $0x89] sm:$0x1] %v3395_v60  ;;  %v8184_v39 = vld [vmem:[#allocation9 + $0x80] sm:$0xff]  }
 0x2d4   : > { %7645 = vmatmul.mubr.bf16.vlgmr.msra.gmra.mxu0 %v9792_v46  ;;  %v3396_v18 = vld [vmem:[#allocation2 + $0x9f] sm:$0x1]  ;;  %v3397_v41 = vld [vmem:[#allocation2 + $0xb7] sm:$0x1]  ;;  %v3398_v34 = vld [vmem:[#allocation2 + $0xcf] sm:$0x1] }
 0x2d5   : > { %7648 = vmatprep.mubr.bf16.mxu0 %v9795_v61  ;;  %7725 = vmatpush3.bf16.msra.mxu0 %v9550_v33  ;;  %v3435_v33 = vld [vmem:[#allocation2 + $0x68] sm:$0xff]  ;;  %3414 = vst [vmem:[#allocation2 + $0xa1] sm:$0x1] %v3396_v18  ;;  %3415 = vst [vmem:[#allocation2 + $0xb9] sm:$0x1] %v3397_v41  ;;  %v3436_v35 = vld [vmem:[#allocation2 + $0x78] sm:$0xff] }
 0x2d6   : > { %7726 = vmatprep.subr.bf16.mxu0 %v8180_v20  ;;  %v9804_v37 = vpack.c.bf16 %v3435_v33, %v3434_v19  ;;  %3416 = vst [vmem:[#allocation2 + $0xd1] sm:$0x1] %v3398_v34  ;;  %v3399_v28 = vld [vmem:[#allocation2 + $0xe7] sm:$0x1]  ;;  %7687 = vmatpush3.bf16.msra.mxu1 %v8178_v23  ;;  %v3400_v43 = vld [vmem:[#allocation2 + $0xff] sm:$0x1] }
 0x2d7   : > { %3417 = vst [vmem:[#allocation2 + $0xe9] sm:$0x1] %v3399_v28  ;;  %7688 = vmatprep.subr.bf16.mxu1 %v8181_v58  ;;  %v8185_v30 = vld [vmem:[#allocation9 + $0xd8] sm:$0xff]   ;;  %3418 = vst [vmem:[#allocation2 + $0x101] sm:$0x1] %v3400_v43  ;;  %v3438_v21 = vld [vmem:[#allocation2 + $0x90] sm:$0xff] }
 0x2d8   : > { %v3401_v17 = vld [vmem:[#allocation2 + $0x117] sm:$0x1]  ;;  %v3402_v36 = vld [vmem:[#allocation2 + $0x12f] sm:$0x1]  ;;  %7609 = vmatmul.mubr.bf16.gmra.mxu1 %v9773_v52  ;;  %v3437_v22 = vld [vmem:[#allocation2 + $0x80] sm:$0xff] }
 0x2d9   : > { %7727 = vmatpush3.bf16.msra.mxu0 %v8180_v20  ;;  %3419 = vst [vmem:[#allocation2 + $0x119] sm:$0x1] %v3401_v17  ;;  %3420 = vst [vmem:[#allocation2 + $0x131] sm:$0x1] %v3402_v36  ;;  %v3403_v42 = vld [vmem:[#allocation2 + $0x147] sm:$0x1]  ;;  %v9809_v6 = vpack.c.bf16 %v3437_v22, %v3436_v35  ;;  %7612 = vmatprep.mubr.bf16.mxu1 %v9775_v12 }
 0x2da   : > { %7728 = vmatprep.subr.bf16.mxu0 %v8182_v63  ;;  %v3439_v44 = vld [vmem:[#allocation2 + $0x98] sm:$0xff]  ;;  %7689 = vmatpush3.bf16.msra.mxu1 %v8181_v58  ;;  %v8186_v55 = vld [vmem:[#allocation9 + $0xd0] sm:$0xff]   ;;  %3421 = vst [vmem:[#allocation2 + $0x149] sm:$0x1] %v3403_v42  ;;  %v9814_v15 = vld [vmem:[#allocation9 + $0x138] sm:$0xff]  }
 0x2db   : > { %v3404_v14 = vld [vmem:[#allocation2 + $0x15f] sm:$0x1]  ;;  %v9812_v56 = vpack.c.bf16 %v3439_v44, %v3438_v21  ;;  %7690 = vmatprep.subr.bf16.mxu1 %v8184_v39  ;;  %v3370_v52 = vld [vmem:[#allocation2 + $0x182] sm:$0x1]  ;;  %v3440_v27 = vld [vmem:[#allocation2 + $0xa8] sm:$0xff] }
 0x2dc   : > { %7649 = vmatmul.mubr.bf16.gmra.mxu0 %v9801_v4  ;;  %3422 = vst [vmem:[#allocation2 + $0x161] sm:$0x1] %v3404_v14  ;;  %v8187_v12 = vld [vmem:[#allocation9 + $0xc8] sm:$0xff]   ;;  %3388 = vst [vmem:[#allocation2 + $0x180] sm:$0x1] %v3370_v52  ;;  %v3442_v25 = vld [vmem:[#allocation2 + $0xc0] sm:$0xff] }
 0x2dd   : > { %7652 = vmatprep.mubr.bf16.mxu0 %v9804_v37  ;;  %7729 = vmatpush3.bf16.msra.mxu0 %v8182_v63  ;;  %v3441_v47 = vld [vmem:[#allocation2 + $0xb0] sm:$0xff]  ;;  %v3443_v10 = vld [vmem:[#allocation2 + $0xc8] sm:$0xff]  ;;  %v3445_v45 = vld [vmem:[#allocation2 + $0xe0] sm:$0xff] }
 0x2de   : > { %7730 = vmatprep.subr.bf16.mxu0 %v8183_v7  ;;  %7691 = vmatpush3.bf16.msra.mxu1 %v8184_v39  ;;  %v9820_v51 = vpack.c.bf16 %v3441_v47, %v3440_v27  ;;  %v8189_v31 = vld [vmem:[#allocation9 + $0xc0] sm:$0xff]   ;;  %v9823_v2 = vpack.c.bf16 %v3443_v10, %v3442_v25  ;;  %v9827_v59 = vld [vmem:[#allocation9 + $0x178] sm:$0xff]   ;;  %v3447_v57 = vld [vmem:[#allocation2 + $0xf8] sm:$0xff] }
 0x2df   : > { %7772 = vmatprep.subr.bf16.mxu1 %v9814_v15  ;;  %v3446_v40 = vld [vmem:[#allocation2 + $0xf0] sm:$0xff]  ;;  %v3406_v38 = vld [vmem:[#allocation2 + $0x18f] sm:$0x1]  ;;  %v3450_v50 = vld [vmem:[#allocation2 + $0x120] sm:$0xff] }
 0x2e0   : > { %7613 = vmatmul.mubr.bf16.gmra.mxu1 %v9777_v9  ;;  %v3444_v9 = vld [vmem:[#allocation2 + $0xd8] sm:$0xff]  ;;  %v9834_v5 = vpack.c.bf16 %v3447_v57, %v3446_v40  ;;  %3424 = vst [vmem:[#allocation2 + $0x191] sm:$0x1] %v3406_v38  ;;  %v3448_v20 = vld [vmem:[#allocation2 + $0x108] sm:$0xff]  ;;  %v3454_v63 = vld [vmem:[#allocation2 + $0x150] sm:$0xff] }
 0x2e1   : > { %7731 = vmatpush3.bf16.msra.mxu0 %v8183_v7  ;;  %7616 = vmatprep.mubr.bf16.mxu1 %v9779_v0  ;;  %v9830_v0 = vpack.c.bf16 %v3445_v45, %v3444_v9  ;;  %v3973_v54 = vld [vmem:[#allocation2 + $0xa] sm:$0xff]  ;;  %v3452_v23 = vld [vmem:[#allocation2 + $0x138] sm:$0xff]  ;;  %v3972_v48 = vld [vmem:[#allocation2 + $0x2] sm:$0xff] }
 0x2e2   : > { %7732 = vmatprep.subr.bf16.mxu0 %v8185_v30  ;;  %v4004_v1 = vpack.c.bf16 %v3973_v54, %v3972_v48  ;;  %v3371_v19 = vld [vmem:[#allocation2 + $0x19a] sm:$0x1]  ;;  %v3975_v26 = vld [vmem:[#allocation2 + $0x22] sm:$0xff]  ;;  %v3976_v49 = vld [vmem:[#allocation2 + $0x32] sm:$0xff] }
 0x2e3   : > { %3389 = vst [vmem:[#allocation2 + $0x198] sm:$0x1] %v3371_v19  ;;  %v3455_v62 = vld [vmem:[#allocation2 + $0x158] sm:$0xff]  ;;  %v3456_v60 = vld [vmem:[#allocation2 + $0x168] sm:$0xff]  ;;  %v8190_v8 = vld [vmem:[#allocation9 + $0x130] sm:$0xff]  }
 0x2e4   : > { %7653 = vmatmul.mubr.bf16.gmra.mxu0 %v9809_v6  ;;  %v9851_v32 = vpack.c.bf16 %v3455_v62, %v3454_v63  ;;  %v3977_v33 = vld [vmem:[#allocation2 + $0x3a] sm:$0xff]  ;;  %v3457_v18 = vld [vmem:[#allocation2 + $0x170] sm:$0xff]  ;;  %v8193_v22 = vld [vmem:[#allocation9 + $0x118] sm:$0xff]  }
 0x2e5   : > { %7656 = vmatprep.mubr.bf16.mxu0 %v9812_v56  ;;  %7733 = vmatpush3.bf16.msra.mxu0 %v8185_v30  ;;  %v3974_v7 = vld [vmem:[#allocation2 + $0x1a] sm:$0xff]  ;;  %v9860_v41 = vpack.c.bf16 %v3457_v18, %v3456_v60  ;;  %v3979_v28 = vld [vmem:[#allocation2 + $0x52] sm:$0xff]  ;;  %v3981_v39 = vld [vmem:[#allocation2 + $0x6a] sm:$0xff] }
 0x2e6   : > { %7734 = vmatprep.subr.bf16.mxu0 %v8186_v55  ;;  %v9855_v58 = vpack.c.bf16 %v3975_v26, %v3974_v7  ;;  %v8191_v34 = vld [vmem:[#allocation9 + $0x128] sm:$0xff]   ;;  %v3978_v43 = vld [vmem:[#allocation2 + $0x4a] sm:$0xff]  ;;  %v3980_v30 = vld [vmem:[#allocation2 + $0x62] sm:$0xff] }
 0x2e7   : > { %v9866_v35 = vpack.c.bf16 %v3979_v28, %v3978_v43  ;;  %v8192_v17 = vld [vmem:[#allocation9 + $0x120] sm:$0xff]   ;;  %v9868_v21 = vpack.c.bf16 %v3981_v39, %v3980_v30  ;;  %v8196_v36 = vld [vmem:[#allocation9 + $0x170] sm:$0xff]   ;;  %v8198_v52 = vld [vmem:[#allocation9 + $0x168] sm:$0xff]  }
 0x2e8   : > { %7617 = vmatmul.mubr.bf16.gmra.mxu1 %v9781_v3  ;;  %v3449_v3 = vld [vmem:[#allocation2 + $0x110] sm:$0xff]  ;;  %v3985_v42 = vld [vmem:[#allocation2 + $0x9a] sm:$0xff]  ;;  %v8201_v9 = vld [vmem:[#allocation9 + $0x158] sm:$0xff]  }
 0x2e9   : > { %7735 = vmatpush3.bf16.msra.mxu0 %v8186_v55  ;;  %7620 = vmatprep.mubr.bf16.mxu1 %v9783_v29  ;;  %v9839_v11 = vpack.c.bf16 %v3449_v3, %v3448_v20  ;;  %v3451_v29 = vld [vmem:[#allocation2 + $0x128] sm:$0xff]  ;;  %v3982_v44 = vld [vmem:[#allocation2 + $0x7a] sm:$0xff]  ;;  %v3984_v14 = vld [vmem:[#allocation2 + $0x92] sm:$0xff] }
 0x2ea   : > { %7736 = vmatprep.subr.bf16.mxu0 %v8187_v12  ;;  %v9842_v53 = vpack.c.bf16 %v3451_v29, %v3450_v50  ;;  %v3987_v27 = vld [vmem:[#allocation2 + $0xb2] sm:$0xff]  ;;  %v3989_v25 = vld [vmem:[#allocation2 + $0xca] sm:$0xff]  ;;  %v3991_v45 = vld [vmem:[#allocation2 + $0xe2] sm:$0xff] }
 0x2eb   : > { %v3986_v47 = vld [vmem:[#allocation2 + $0xaa] sm:$0xff]  ;;  %v3993_v57 = vld [vmem:[#allocation2 + $0xfa] sm:$0xff]  ;;  %v3992_v3 = vld [vmem:[#allocation2 + $0xf2] sm:$0xff] }
 0x2ec   : > { %7657 = vmatmul.mubr.bf16.gmra.mxu0 %v9820_v51  ;;  %v9883_v10 = vpack.c.bf16 %v3987_v27, %v3986_v47  ;;  %v3990_v38 = vld [vmem:[#allocation2 + $0xda] sm:$0xff]  ;;  %v9896_v29 = vpack.c.bf16 %v3993_v57, %v3992_v3  ;;  %v3997_v54 = vld [vmem:[#allocation2 + $0x12a] sm:$0xff]  ;;  %v4000_v26 = vld [vmem:[#allocation2 + $0x152] sm:$0xff] }
 0x2ed   : > { %7660 = vmatprep.mubr.bf16.mxu0 %v9823_v2  ;;  %7737 = vmatpush3.bf16.msra.mxu0 %v8187_v12  ;;  %v9877_v12 = vpack.c.bf16 %v3985_v42, %v3984_v14  ;;  %v8203_v20 = vld [vmem:[#allocation9 + $0x148] sm:$0xff]   ;;  %v9893_v50 = vpack.c.bf16 %v3991_v45, %v3990_v38  ;;  %v9902_v48 = vld [vmem:[#allocation9 + $0x1f8] sm:$0xff]   ;;  %v4307_v39 = vld [vmem:[#allocation2 + $0x180] sm:$0xff] }
 0x2ee   : > { %7738 = vmatprep.subr.bf16.mxu0 %v8189_v31  ;;  %v4003_v7 = vld [vmem:[#allocation2 + $0x172] sm:$0xff]  ;;  %v4583_v60 = vld [vmem:[#allocation2 + $0x21] sm:$0xff]  ;;  %v4586_v28 = vld [vmem:[#allocation2 + $0x49] sm:$0xff] }
 0x2ef   : > { %v4584_v18 = vld [vmem:[#allocation2 + $0x31] sm:$0xff]  ;;  %v4591_v42 = vld [vmem:[#allocation2 + $0x81] sm:$0xff]  ;;  %v4594_v27 = vld [vmem:[#allocation2 + $0xa9] sm:$0xff] }
 0x2f0   : > { %7621 = vmatmul.mubr.bf16.gmra.mxu1 %v9785_v13  ;;  %v3453_v13 = vld [vmem:[#allocation2 + $0x140] sm:$0xff]  ;;  %v8208_v14 = vld [vmem:[#allocation9 + $0x1a0] sm:$0xff]   ;;  %v8217_v3 = vld [vmem:[#allocation9 + $0x1d8] sm:$0xff]  }
 0x2f1   : > { %7739 = vmatpush3.bf16.msra.mxu0 %v8189_v31  ;;  %7624 = vmatprep.mubr.bf16.mxu1 %v9787_v24  ;;  %v9849_v24 = vpack.c.bf16 %v3453_v13, %v3452_v23  ;;  %v3988_v31 = vld [vmem:[#allocation2 + $0xc2] sm:$0xff]  ;;  %v3994_v23 = vld [vmem:[#allocation2 + $0x10a] sm:$0xff]  ;;  %v3998_v13 = vld [vmem:[#allocation2 + $0x13a] sm:$0xff] }
 0x2f2   : > { %7820 = vmatprep.subr.bf16.mxu0 %v9827_v59  ;;  %v9885_v40 = vpack.c.bf16 %v3989_v25, %v3988_v31  ;;  %v4595_v25 = vld [vmem:[#allocation2 + $0xb1] sm:$0xff]  ;;  %v8210_v31 = vld [vmem:[#allocation9 + $0x190] sm:$0xff]  }
 0x2f3   : > { %v4598_v45 = vld [vmem:[#allocation2 + $0xd9] sm:$0xff]  ;;  %v4599_v57 = vld [vmem:[#allocation2 + $0xe1] sm:$0xff] }
 0x2f4   : > { %7661 = vmatmul.mubr.bf16.gmra.mxu0 %v9830_v0 }
 0x2f5   : > { %7664 = vmatprep.mubr.bf16.mxu0 %v9834_v5 }
 0x2f8   : > { %7625 = vmatmul.mubr.bf16.gmra.mxu1 %v3537_v16  ;;  %v9857_v16 = vpack.c.bf16 %v3977_v33, %v3976_v49  ;;  %v4002_v49 = vld [vmem:[#allocation2 + $0x16a] sm:$0xff] }
 0x2f9   : > { %7692 = vmatprep.mubr.bf16.mxu1 %v4004_v1  ;;  %v3996_v1 = vld [vmem:[#allocation2 + $0x122] sm:$0xff] }
 0x2fa   : > { %v9906_v19 = vpack.c.bf16 %v3997_v54, %v3996_v1  ;;  %v4601_v54 = vld [vmem:[#allocation2 + $0xf9] sm:$0xff] }
 0x2fb   : > { %v8219_v1 = vld [vmem:[#allocation9 + $0x1c8] sm:$0xff]  }
 0x2fc   : > { %7665 = vmatmul.mubr.bf16.gmra.mxu0 %v9839_v11 }
 0x2fd   : > { %7668 = vmatprep.mubr.bf16.mxu0 %v9842_v53 }
 0x300   : > { %7693 = vmatmul.mubr.bf16.vlgmr.msra.gmra.mxu1 %v9855_v58 }
 0x301   : > { %7696 = vmatprep.mubr.bf16.mxu1 %v9857_v16  ;;  %7773 = vmatpush3.bf16.msra.mxu1 %v9814_v15  ;;  %v8194_v15 = vld [vmem:[#allocation9 + $0x110] sm:$0xff]  }
 0x302   : > { %7774 = vmatprep.subr.bf16.mxu1 %v8190_v8 }
 0x304   : > { %7669 = vmatmul.mubr.bf16.gmra.mxu0 %v9849_v24 }
 0x305   : > { %7672 = vmatprep.mubr.bf16.mxu0 %v9851_v32  ;;  %7775 = vmatpush3.bf16.msra.mxu1 %v8190_v8 }
 0x306   : > { %7776 = vmatprep.subr.bf16.mxu1 %v8191_v34 }
 0x308   : > { %7697 = vmatmul.mubr.bf16.gmra.mxu1 %v9866_v35 }
 0x309   : > { %7700 = vmatprep.mubr.bf16.mxu1 %v9868_v21  ;;  %7777 = vmatpush3.bf16.msra.mxu1 %v8191_v34  ;;  %v4585_v34 = vld [vmem:[#allocation2 + $0x39] sm:$0xff] }
 0x30a   : > { %7778 = vmatprep.subr.bf16.mxu1 %v8192_v17  ;;  %v9926_v43 = vpack.c.bf16 %v4585_v34, %v4584_v18 }
 0x30c   : > { %7673 = vmatmul.mubr.bf16.gmra.mxu0 %v9860_v41 }
 0x30d   : > { %7740 = vmatprep.mubr.bf16.mxu0 %v9792_v46  ;;  %v3983_v46 = vld [vmem:[#allocation2 + $0x82] sm:$0xff]  ;;  %7779 = vmatpush3.bf16.msra.mxu1 %v8192_v17 }
 0x30e   : > { %v9875_v55 = vpack.c.bf16 %v3983_v46, %v3982_v44  ;;  %7780 = vmatprep.subr.bf16.mxu1 %v8193_v22  ;;  %v4308_v17 = vld [vmem:[#allocation2 + $0x188] sm:$0xff]  ;;  %v4590_v46 = vld [vmem:[#allocation2 + $0x79] sm:$0xff] }
 0x310   : > { %7701 = vmatmul.mubr.bf16.gmra.mxu1 %v9875_v55 }
 0x311   : > { %7704 = vmatprep.mubr.bf16.mxu1 %v9877_v12  ;;  %7781 = vmatpush3.bf16.msra.mxu1 %v8193_v22  ;;  %v4589_v22 = vld [vmem:[#allocation2 + $0x69] sm:$0xff] }
 0x312   : > { %7782 = vmatprep.subr.bf16.mxu1 %v8194_v15 }
 0x314   : > { %7741 = vmatmul.mubr.bf16.vlgmr.msra.gmra.mxu0 %v9795_v61  ;;  %v8199_v61 = vld [vmem:[#allocation9 + $0x160] sm:$0xff]  }
 0x315   : > { %7744 = vmatprep.mubr.bf16.mxu0 %v9801_v4  ;;  %7821 = vmatpush3.bf16.msra.mxu0 %v9827_v59  ;;  %v8197_v4 = vld [vmem:[#allocation9 + $0x108] sm:$0xff]   ;;  %v8200_v59 = vld [vmem:[#allocation9 + $0x100] sm:$0xff]  }
 0x316   : > { %7822 = vmatprep.subr.bf16.mxu0 %v8196_v36  ;;  %7783 = vmatpush3.bf16.msra.mxu1 %v8194_v15  ;;  %v9939_v15 = vpack.c.bf16 %v4591_v42, %v4590_v46  ;;  %v5197_v46 = vld [vmem:[#allocation2 + $0x68] sm:$0xff]  ;;  %v8222_v42 = vld [vmem:[#allocation9 + $0x230] sm:$0xff]  }
 0x317   : > { %7784 = vmatprep.subr.bf16.mxu1 %v8197_v4 }
 0x318   : > { %7705 = vmatmul.mubr.bf16.gmra.mxu1 %v9883_v10 }
 0x319   : > { %7823 = vmatpush3.bf16.msra.mxu0 %v8196_v36  ;;  %7708 = vmatprep.mubr.bf16.mxu1 %v9885_v40  ;;  %v9931_v36 = vpack.c.bf16 %v4308_v17, %v4307_v39  ;;  %v5194_v17 = vld [vmem:[#allocation2 + $0x48] sm:$0xff] }
 0x31a   : > { %7824 = vmatprep.subr.bf16.mxu0 %v8198_v52  ;;  %7785 = vmatpush3.bf16.msra.mxu1 %v8197_v4  ;;  %v4593_v4 = vld [vmem:[#allocation2 + $0x99] sm:$0xff] }
 0x31b   : > { %7786 = vmatprep.subr.bf16.mxu1 %v8200_v59 }
 0x31c   : > { %7745 = vmatmul.mubr.bf16.gmra.mxu0 %v9804_v37  ;;  %v8202_v37 = vld [vmem:[#allocation9 + $0x150] sm:$0xff]  }
 0x31d   : > { %7748 = vmatprep.mubr.bf16.mxu0 %v9809_v6  ;;  %7825 = vmatpush3.bf16.msra.mxu0 %v8198_v52  ;;  %v9889_v6 = vld [vmem:[#allocation9 + $0x1b8] sm:$0xff]   ;;  %v8212_v52 = vld [vmem:[#allocation9 + $0x1f0] sm:$0xff]  }
 0x31e   : > { %7826 = vmatprep.subr.bf16.mxu0 %v8199_v61  ;;  %7787 = vmatpush3.bf16.msra.mxu1 %v8200_v59  ;;  %v8214_v59 = vld [vmem:[#allocation9 + $0x1e8] sm:$0xff]  }
 0x31f   : > { %7868 = vmatprep.subr.bf16.mxu1 %v9889_v6 }
 0x320   : > { %7709 = vmatmul.mubr.bf16.gmra.mxu1 %v9893_v50 }
 0x321   : > { %7827 = vmatpush3.bf16.msra.mxu0 %v8199_v61  ;;  %7712 = vmatprep.mubr.bf16.mxu1 %v9896_v29  ;;  %v8209_v61 = vld [vmem:[#allocation9 + $0x198] sm:$0xff]  }
 0x322   : > { %7828 = vmatprep.subr.bf16.mxu0 %v8201_v9 }
 0x324   : > { %7749 = vmatmul.mubr.bf16.gmra.mxu0 %v9812_v56  ;;  %v8205_v56 = vld [vmem:[#allocation9 + $0x140] sm:$0xff]  }
 0x325   : > { %7752 = vmatprep.mubr.bf16.mxu0 %v9820_v51  ;;  %7829 = vmatpush3.bf16.msra.mxu0 %v8201_v9  ;;  %v3995_v51 = vld [vmem:[#allocation2 + $0x112] sm:$0xff]  ;;  %v9948_v9 = vpack.c.bf16 %v4595_v25, %v4594_v27  ;;  %v5199_v25 = vld [vmem:[#allocation2 + $0x80] sm:$0xff] }
 0x326   : > { %7830 = vmatprep.subr.bf16.mxu0 %v8202_v37  ;;  %v9904_v63 = vpack.c.bf16 %v3995_v51, %v3994_v23  ;;  %v4600_v51 = vld [vmem:[#allocation2 + $0xf1] sm:$0xff]  ;;  %v4602_v23 = vld [vmem:[#allocation2 + $0x109] sm:$0xff] }
 0x327   : > { %v5200_v27 = vld [vmem:[#allocation2 + $0x90] sm:$0xff] }
 0x328   : > { %7713 = vmatmul.mubr.bf16.gmra.mxu1 %v9904_v63 }
 0x329   : > { %7831 = vmatpush3.bf16.msra.mxu0 %v8202_v37  ;;  %7716 = vmatprep.mubr.bf16.mxu1 %v9906_v19  ;;  %v4596_v37 = vld [vmem:[#allocation2 + $0xc1] sm:$0xff] }
 0x32a   : > { %7832 = vmatprep.subr.bf16.mxu0 %v8203_v20 }
 0x32c   : > { %7753 = vmatmul.mubr.bf16.gmra.mxu0 %v9823_v2  ;;  %v3999_v2 = vld [vmem:[#allocation2 + $0x142] sm:$0xff] }
 0x32d   : > { %7756 = vmatprep.mubr.bf16.mxu0 %v9830_v0  ;;  %7833 = vmatpush3.bf16.msra.mxu0 %v8203_v20  ;;  %v4001_v0 = vld [vmem:[#allocation2 + $0x15a] sm:$0xff]  ;;  %v9913_v62 = vpack.c.bf16 %v3999_v2, %v3998_v13  ;;  %v8216_v20 = vld [vmem:[#allocation9 + $0x180] sm:$0xff]   ;;  %v9964_v2 = vpack.c.bf16 %v4601_v54, %v4600_v51 }
 0x32e   : > { %7834 = vmatprep.subr.bf16.mxu0 %v8205_v56  ;;  %v9915_v33 = vpack.c.bf16 %v4001_v0, %v4000_v26  ;;  %v4605_v13 = vld [vmem:[#allocation2 + $0x129] sm:$0xff]  ;;  %v4606_v26 = vld [vmem:[#allocation2 + $0x139] sm:$0xff] }
 0x32f   : > { %v5203_v54 = vld [vmem:[#allocation2 + $0xb0] sm:$0xff] }
 0x330   : > { %7717 = vmatmul.mubr.bf16.gmra.mxu1 %v9913_v62 }
 0x331   : > { %7835 = vmatpush3.bf16.msra.mxu0 %v8205_v56  ;;  %7720 = vmatprep.mubr.bf16.mxu1 %v9915_v33  ;;  %v9956_v56 = vpack.c.bf16 %v4599_v57, %v4598_v45  ;;  %v8225_v57 = vld [vmem:[#allocation9 + $0x218] sm:$0xff]  }
 0x332   : > { %7916 = vmatprep.subr.bf16.mxu0 %v9902_v48 }
 0x334   : > { %7757 = vmatmul.mubr.bf16.gmra.mxu0 %v9834_v5  ;;  %v4582_v5 = vld [vmem:[#allocation2 + $0x19] sm:$0xff] }
 0x335   : > { %7760 = vmatprep.mubr.bf16.mxu0 %v9839_v11  ;;  %v9921_v11 = vpack.c.bf16 %v4003_v7, %v4002_v49  ;;  %v4614_v8 = vpack.c.bf16 %v4583_v60, %v4582_v5  ;;  %v4607_v7 = vld [vmem:[#allocation2 + $0x141] sm:$0xff]  ;;  %v4609_v49 = vld [vmem:[#allocation2 + $0x159] sm:$0xff] }
 0x336   : > { %v9975_v60 = vpack.c.bf16 %v4607_v7, %v4606_v26 }
 0x338   : > { %7721 = vmatmul.mubr.bf16.gmra.mxu1 %v9921_v11 }
 0x339   : > { %7788 = vmatprep.mubr.bf16.mxu1 %v4614_v8  ;;  %v4611_v8 = vld [vmem:[#allocation2 + $0x171] sm:$0xff] }
 0x33c   : > { %7761 = vmatmul.mubr.bf16.gmra.mxu0 %v9842_v53  ;;  %v4587_v53 = vld [vmem:[#allocation2 + $0x51] sm:$0xff] }
 0x33d   : > { %7764 = vmatprep.mubr.bf16.mxu0 %v9849_v24  ;;  %v8206_v24 = vld [vmem:[#allocation9 + $0x1b0] sm:$0xff]   ;;  %v9928_v30 = vpack.c.bf16 %v4587_v53, %v4586_v28  ;;  %v4613_v53 = vld [vmem:[#allocation2 + $0x189] sm:$0xff] }
 0x33e   : > { %v4612_v28 = vld [vmem:[#allocation2 + $0x181] sm:$0xff] }
 0x33f   : > { %v9989_v39 = vpack.c.bf16 %v4613_v53, %v4612_v28  ;;  %v5206_v28 = vld [vmem:[#allocation2 + $0xd8] sm:$0xff] }
 0x340   : > { %7789 = vmatmul.mubr.bf16.vlgmr.msra.gmra.mxu1 %v9926_v43 }
 0x341   : > { %7792 = vmatprep.mubr.bf16.mxu1 %v9928_v30  ;;  %7869 = vmatpush3.bf16.msra.mxu1 %v9889_v6  ;;  %v4597_v6 = vld [vmem:[#allocation2 + $0xc9] sm:$0xff] }
 0x342   : > { %7870 = vmatprep.subr.bf16.mxu1 %v8206_v24  ;;  %v9954_v38 = vpack.c.bf16 %v4597_v6, %v4596_v37 }
 0x344   : > { %7765 = vmatmul.mubr.bf16.gmra.mxu0 %v9851_v32  ;;  %v8207_v32 = vld [vmem:[#allocation9 + $0x1a8] sm:$0xff]  }
 0x345   : > { %7768 = vmatprep.mubr.bf16.mxu0 %v9860_v41  ;;  %v4588_v41 = vld [vmem:[#allocation2 + $0x61] sm:$0xff]  ;;  %7871 = vmatpush3.bf16.msra.mxu1 %v8206_v24 }
 0x346   : > { %v9937_v44 = vpack.c.bf16 %v4589_v22, %v4588_v41  ;;  %7872 = vmatprep.subr.bf16.mxu1 %v8207_v32  ;;  %v5195_v41 = vld [vmem:[#allocation2 + $0x50] sm:$0xff] }
 0x347   : > { %v5225_v22 = vpack.c.bf16 %v5195_v41, %v5194_v17  ;;  %v5207_v17 = vld [vmem:[#allocation2 + $0xe0] sm:$0xff] }
 0x348   : > { %7793 = vmatmul.mubr.bf16.gmra.mxu1 %v9937_v44 }
 0x349   : > { %7796 = vmatprep.mubr.bf16.mxu1 %v9939_v15  ;;  %7873 = vmatpush3.bf16.msra.mxu1 %v8207_v32  ;;  %v5196_v32 = vld [vmem:[#allocation2 + $0x60] sm:$0xff] }
 0x34a   : > { %7874 = vmatprep.subr.bf16.mxu1 %v8208_v14 }
 0x34c   : > { %7769 = vmatmul.mubr.bf16.gmra.mxu0 %v9931_v36 }
 0x34d   : > { %7836 = vmatprep.mubr.bf16.mxu0 %v9855_v58  ;;  %v4592_v58 = vld [vmem:[#allocation2 + $0x91] sm:$0xff]  ;;  %7875 = vmatpush3.bf16.msra.mxu1 %v8208_v14 }
 0x34e   : > { %v9946_v47 = vpack.c.bf16 %v4593_v4, %v4592_v58  ;;  %7876 = vmatprep.subr.bf16.mxu1 %v8209_v61 }
 0x350   : > { %7797 = vmatmul.mubr.bf16.gmra.mxu1 %v9946_v47 }
 0x351   : > { %7800 = vmatprep.mubr.bf16.mxu1 %v9948_v9  ;;  %7877 = vmatpush3.bf16.msra.mxu1 %v8209_v61 }
 0x352   : > { %7878 = vmatprep.subr.bf16.mxu1 %v8210_v31 }
 0x354   : > { %7837 = vmatmul.mubr.bf16.vlgmr.msra.gmra.mxu0 %v9857_v16  ;;  %v8215_v16 = vld [vmem:[#allocation9 + $0x1e0] sm:$0xff]  }
 0x355   : > { %7840 = vmatprep.mubr.bf16.mxu0 %v9866_v35  ;;  %7917 = vmatpush3.bf16.msra.mxu0 %v9902_v48  ;;  %v8213_v35 = vld [vmem:[#allocation9 + $0x188] sm:$0xff]  }
 0x356   : > { %7918 = vmatprep.subr.bf16.mxu0 %v8212_v52  ;;  %7879 = vmatpush3.bf16.msra.mxu1 %v8210_v31  ;;  %v4603_v48 = vld [vmem:[#allocation2 + $0x111] sm:$0xff] }
 0x357   : > { %7880 = vmatprep.subr.bf16.mxu1 %v8213_v35  ;;  %v9967_v0 = vpack.c.bf16 %v4603_v48, %v4602_v23 }
 0x358   : > { %7801 = vmatmul.mubr.bf16.gmra.mxu1 %v9954_v38 }
 0x359   : > { %7919 = vmatpush3.bf16.msra.mxu0 %v8212_v52  ;;  %7804 = vmatprep.mubr.bf16.mxu1 %v9956_v56  ;;  %v4917_v52 = vld [vmem:[#allocation2 + $0x182] sm:$0xff] }
 0x35a   : > { %7920 = vmatprep.subr.bf16.mxu0 %v8214_v59  ;;  %7881 = vmatpush3.bf16.msra.mxu1 %v8213_v35  ;;  %v8224_v35 = vld [vmem:[#allocation9 + $0x220] sm:$0xff]  }
 0x35b   : > { %7882 = vmatprep.subr.bf16.mxu1 %v8216_v20 }
 0x35c   : > { %7841 = vmatmul.mubr.bf16.gmra.mxu0 %v9868_v21  ;;  %v8218_v21 = vld [vmem:[#allocation9 + $0x1d0] sm:$0xff]  }
 0x35d   : > { %7844 = vmatprep.mubr.bf16.mxu0 %v9875_v55  ;;  %7921 = vmatpush3.bf16.msra.mxu0 %v8214_v59  ;;  %v9960_v55 = vld [vmem:[#allocation9 + $0x238] sm:$0xff]  }
 0x35e   : > { %7922 = vmatprep.subr.bf16.mxu0 %v8215_v16  ;;  %7883 = vmatpush3.bf16.msra.mxu1 %v8216_v20 }
 0x35f   : > { %7964 = vmatprep.subr.bf16.mxu1 %v9960_v55 }
 0x360   : > { %7805 = vmatmul.mubr.bf16.gmra.mxu1 %v9964_v2 }
 0x361   : > { %7923 = vmatpush3.bf16.msra.mxu0 %v8215_v16  ;;  %7808 = vmatprep.mubr.bf16.mxu1 %v9967_v0  ;;  %v5201_v16 = vld [vmem:[#allocation2 + $0x98] sm:$0xff] }
 0x362   : > { %7924 = vmatprep.subr.bf16.mxu0 %v8217_v3  ;;  %v5228_v37 = vpack.c.bf16 %v5201_v16, %v5200_v27 }
 0x364   : > { %7845 = vmatmul.mubr.bf16.gmra.mxu0 %v9877_v12  ;;  %v8221_v12 = vld [vmem:[#allocation9 + $0x1c0] sm:$0xff]  }
 0x365   : > { %7848 = vmatprep.mubr.bf16.mxu0 %v9883_v10  ;;  %7925 = vmatpush3.bf16.msra.mxu0 %v8217_v3  ;;  %v4604_v10 = vld [vmem:[#allocation2 + $0x121] sm:$0xff] }
 0x366   : > { %7926 = vmatprep.subr.bf16.mxu0 %v8218_v21  ;;  %v9973_v5 = vpack.c.bf16 %v4605_v13, %v4604_v10  ;;  %v8226_v10 = vld [vmem:[#allocation9 + $0x210] sm:$0xff]  }
 0x368   : > { %7809 = vmatmul.mubr.bf16.gmra.mxu1 %v9973_v5 }
 0x369   : > { %7927 = vmatpush3.bf16.msra.mxu0 %v8218_v21  ;;  %7812 = vmatprep.mubr.bf16.mxu1 %v9975_v60 }
 0x36a   : > { %7928 = vmatprep.subr.bf16.mxu0 %v8219_v1 }
 0x36c   : > { %7849 = vmatmul.mubr.bf16.gmra.mxu0 %v9885_v40  ;;  %v4608_v40 = vld [vmem:[#allocation2 + $0x151] sm:$0xff] }
 0x36d   : > { %7852 = vmatprep.mubr.bf16.mxu0 %v9893_v50  ;;  %7929 = vmatpush3.bf16.msra.mxu0 %v8219_v1  ;;  %v4610_v50 = vld [vmem:[#allocation2 + $0x169] sm:$0xff]  ;;  %v9981_v18 = vpack.c.bf16 %v4609_v49, %v4608_v40 }
 0x36e   : > { %7930 = vmatprep.subr.bf16.mxu0 %v8221_v12  ;;  %v9983_v34 = vpack.c.bf16 %v4611_v8, %v4610_v50  ;;  %v8227_v50 = vld [vmem:[#allocation9 + $0x208] sm:$0xff]  }
 0x370   : > { %7813 = vmatmul.mubr.bf16.gmra.mxu1 %v9981_v18 }
 0x371   : > { %7931 = vmatpush3.bf16.msra.mxu0 %v8221_v12  ;;  %7816 = vmatprep.mubr.bf16.mxu1 %v9983_v34  ;;  %v5205_v12 = vld [vmem:[#allocation2 + $0xc8] sm:$0xff] }
 0x374   : > { %7853 = vmatmul.mubr.bf16.gmra.mxu0 %v9896_v29  ;;  %v5192_v29 = vld [vmem:[#allocation2 + $0x30] sm:$0xff] }
 0x375   : > { %7856 = vmatprep.mubr.bf16.mxu0 %v9904_v63  ;;  %v5193_v63 = vld [vmem:[#allocation2 + $0x38] sm:$0xff] }
 0x376   : > { %v5224_v24 = vpack.c.bf16 %v5193_v63, %v5192_v29  ;;  %v5208_v63 = vld [vmem:[#allocation2 + $0xf0] sm:$0xff] }
 0x378   : > { %7817 = vmatmul.mubr.bf16.gmra.mxu1 %v9989_v39 }
 0x379   : > { %7884 = vmatprep.mubr.bf16.mxu1 %v5224_v24 }
 0x37c   : > { %7857 = vmatmul.mubr.bf16.gmra.mxu0 %v9906_v19  ;;  %v4918_v19 = vld [vmem:[#allocation2 + $0x18a] sm:$0xff] }
 0x37d   : > { %7860 = vmatprep.mubr.bf16.mxu0 %v9913_v62  ;;  %v5226_v62 = vpack.c.bf16 %v5197_v46, %v5196_v32  ;;  %v9994_v61 = vpack.c.bf16 %v4918_v19, %v4917_v52  ;;  %v5231_v19 = vpack.c.bf16 %v5207_v17, %v5206_v28  ;;  %v8228_v46 = vld [vmem:[#allocation9 + $0x200] sm:$0xff]  }
 0x380   : > { %v7598_v14 = vpop.f32.mrf.mxu1  ;;  %7885 = vmatmul.mubr.bf16.vlgmr.msra.gmra.mxu1 %v5225_v22  ;;  %v5209_v22 = vld [vmem:[#allocation2 + $0xf8] sm:$0xff] }
 0x381   : > { %7888 = vmatprep.mubr.bf16.mxu1 %v5226_v62  ;;  %7965 = vmatpush3.bf16.msra.mxu1 %v9960_v55  ;;  %v5204_v55 = vld [vmem:[#allocation2 + $0xc0] sm:$0xff]  ;;  %v5232_v62 = vpack.c.bf16 %v5209_v22, %v5208_v63  ;;  %v5219_v22 = vld [vmem:[#allocation2 + $0x170] sm:$0xff] }
 0x382   : > { %v3636_v58 = vpop.f32.mrf.mxu1  ;;  %7966 = vmatprep.subr.bf16.mxu1 %v8222_v42  ;;  %v5230_v26 = vpack.c.bf16 %v5205_v12, %v5204_v55 }
 0x384   : > { %7861 = vmatmul.mubr.bf16.gmra.mxu0 %v9915_v33  ;;  %v8223_v33 = vld [vmem:[#allocation9 + $0x228] sm:$0xff]   ;;  %v7599_v4 = vpop.f32.mrf.mxu1 }
 0x385   : > { %7864 = vmatprep.mubr.bf16.mxu0 %v9921_v11  ;;  %v5198_v11 = vld [vmem:[#allocation2 + $0x78] sm:$0xff]  ;;  %7967 = vmatpush3.bf16.msra.mxu1 %v8222_v42 }
 0x386   : > { %v3639_v31 = vpop.f32.mrf.mxu1  ;;  %v5227_v59 = vpack.c.bf16 %v5199_v25, %v5198_v11  ;;  %7968 = vmatprep.subr.bf16.mxu1 %v8223_v33  ;;  %v5210_v11 = vld [vmem:[#allocation2 + $0x108] sm:$0xff]  ;;  %v5212_v25 = vld [vmem:[#allocation2 + $0x120] sm:$0xff] }
 0x388   : > { %v7602_v6 = vpop.f32.mrf.mxu1  ;;  %7889 = vmatmul.mubr.bf16.gmra.mxu1 %v5227_v59  ;;  %v5211_v59 = vld [vmem:[#allocation2 + $0x110] sm:$0xff] }
 0x389   : > { %7892 = vmatprep.mubr.bf16.mxu1 %v5228_v37  ;;  %7969 = vmatpush3.bf16.msra.mxu1 %v8223_v33  ;;  %v5233_v37 = vpack.c.bf16 %v5211_v59, %v5210_v11  ;;  %v5803_v59 = vld [vmem:[#allocation2 + $0x3a] sm:$0xff] }
 0x38a   : > { %v3652_v45 = vpop.f32.mrf.mxu1  ;;  %7970 = vmatprep.subr.bf16.mxu1 %v8224_v35 }
 0x38c   : > { %7865 = vmatmul.mubr.bf16.gmra.mxu0 %v9994_v61  ;;  %v7603_v21 = vpop.f32.mrf.mxu1 }
 0x38d   : > { %7932 = vmatprep.mubr.bf16.mxu0 %v9926_v43  ;;  %v5202_v43 = vld [vmem:[#allocation2 + $0xa8] sm:$0xff]  ;;  %7971 = vmatpush3.bf16.msra.mxu1 %v8224_v35 }
 0x38e   : > { %v3655_v48 = vpop.f32.mrf.mxu1  ;;  %v5229_v1 = vpack.c.bf16 %v5203_v54, %v5202_v43  ;;  %7972 = vmatprep.subr.bf16.mxu1 %v8225_v57 }
 0x390   : > { %v7606_v7 = vpop.f32.mrf.mxu1  ;;  %7893 = vmatmul.mubr.bf16.gmra.mxu1 %v5229_v1  ;;  %v5216_v1 = vld [vmem:[#allocation2 + $0x150] sm:$0xff] }
 0x391   : > { %7896 = vmatprep.mubr.bf16.mxu1 %v5230_v26  ;;  %7973 = vmatpush3.bf16.msra.mxu1 %v8225_v57 }
 0x392   : > { %v3668_v49 = vpop.f32.mrf.mxu1  ;;  %7974 = vmatprep.subr.bf16.mxu1 %v8226_v10 }
 0x394   : > { %v7646_v20 = vpop.f32.mrf.mxu0  ;;  %7933 = vmatmul.mubr.bf16.vlgmr.msra.gmra.mxu0 %v9928_v30  ;;  %v7607_v29 = vpop.f32.mrf.mxu1 }
 0x395   : > { %v10000_v3 = vadd.f32 %v7646_v20, %v7598_v14  ;;  %7936 = vmatprep.mubr.bf16.mxu0 %v9937_v44  ;;  %7975 = vmatpush3.bf16.msra.mxu1 %v8226_v10  ;;  %v5215_v10 = vld [vmem:[#allocation2 + $0x140] sm:$0xff] }
 0x396   : > { %v3845_v51 = vpop.f32.mrf.mxu0  ;;  %v3671_v41 = vpop.f32.mrf.mxu1  ;;  %7976 = vmatprep.subr.bf16.mxu1 %v8227_v50 }
 0x397   : > { %v10003_v23 = vadd.f32 %v3845_v51, %v3636_v58  ;;  %v5214_v51 = vld [vmem:[#allocation2 + $0x138] sm:$0xff] }
 0x398   : > { %v7647_v13 = vpop.f32.mrf.mxu0  ;;  %v7610_v14 = vpop.f32.mrf.mxu1  ;;  %7897 = vmatmul.mubr.bf16.gmra.mxu1 %v5231_v19 }
 0x399   : > { %v10005_v30 = vadd.f32 %v7647_v13, %v7599_v4  ;;  %7900 = vmatprep.mubr.bf16.mxu1 %v5232_v62  ;;  %7977 = vmatpush3.bf16.msra.mxu1 %v8227_v50 }
 0x39a   : > { %v3848_v40 = vpop.f32.mrf.mxu0  ;;  %v3684_v58 = vpop.f32.mrf.mxu1  ;;  %7978 = vmatprep.subr.bf16.mxu1 %v8228_v46 }
 0x39b   : > { %v10007_v44 = vadd.f32 %v3848_v40, %v3639_v31  ;;  %v5217_v40 = vld [vmem:[#allocation2 + $0x158] sm:$0xff] }
 0x39c   : > { %v7650_v8 = vpop.f32.mrf.mxu0  ;;  %7937 = vmatmul.mubr.bf16.gmra.mxu0 %v9939_v15  ;;  %v7611_v27 = vpop.f32.mrf.mxu1  ;;  %v5236_v50 = vpack.c.bf16 %v5217_v40, %v5216_v1  ;;  %v5805_v1 = vld [vmem:[#allocation2 + $0x52] sm:$0xff]  ;;  %v5804_v40 = vld [vmem:[#allocation2 + $0x4a] sm:$0xff] }
 0x39d   : > { %v10010_v53 = vadd.f32 %v7650_v8, %v7602_v6  ;;  %7940 = vmatprep.mubr.bf16.mxu0 %v9946_v47  ;;  %7979 = vmatpush3.bf16.msra.mxu1 %v8228_v46  ;;  %v5213_v6 = vld [vmem:[#allocation2 + $0x128] sm:$0xff] }
 0x39e   : > { %v3861_v24 = vpop.f32.mrf.mxu0  ;;  %v3687_v35 = vpop.f32.mrf.mxu1  ;;  %v5234_v57 = vpack.c.bf16 %v5213_v6, %v5212_v25 }
 0x39f   : > { %v10013_v32 = vadd.f32 %v3861_v24, %v3652_v45  ;;  %v5218_v24 = vld [vmem:[#allocation2 + $0x168] sm:$0xff] }
 0x3a0   : > { %v7651_v42 = vpop.f32.mrf.mxu0  ;;  %7901 = vmatmul.mubr.bf16.gmra.mxu1 %v5233_v37  ;;  %v5237_v62 = vpack.c.bf16 %v5219_v22, %v5218_v24  ;;  %v5223_v37 = vld [vmem:[#allocation2 + $0x1a0] sm:$0xff] }
 0x3a1   : > { %v10015_v15 = vadd.f32 %v7651_v42, %v7603_v21  ;;  %7904 = vmatprep.mubr.bf16.mxu1 %v5234_v57 }
 0x3a2   : > { %v3864_v52 = vpop.f32.mrf.mxu0 }
 0x3a3   : > { %v10017_v47 = vadd.f32 %v3864_v52, %v3655_v48 }
 0x3a4   : > { %v7654_v33 = vpop.f32.mrf.mxu0  ;;  %7941 = vmatmul.mubr.bf16.gmra.mxu0 %v9948_v9  ;;  %v7614_v9 = vpop.f32.mrf.mxu1 }
 0x3a5   : > { %v10020_v4 = vadd.f32 %v7654_v33, %v7606_v7  ;;  %7944 = vmatprep.mubr.bf16.mxu0 %v9954_v38  ;;  %v5235_v7 = vpack.c.bf16 %v5215_v10, %v5214_v51 }
 0x3a6   : > { %v3877_v31 = vpop.f32.mrf.mxu0  ;;  %v3700_v38 = vpop.f32.mrf.mxu1 }
 0x3a7   : > { %v10023_v16 = vadd.f32 %v3877_v31, %v3668_v49 }
 0x3a8   : > { %v7655_v45 = vpop.f32.mrf.mxu0  ;;  %v7615_v48 = vpop.f32.mrf.mxu1  ;;  %7905 = vmatmul.mubr.bf16.gmra.mxu1 %v5235_v7 }
 0x3a9   : > { %v10025_v20 = vadd.f32 %v7655_v45, %v7607_v29  ;;  %7908 = vmatprep.mubr.bf16.mxu1 %v5236_v50 }
 0x3aa   : > { %v3880_v43 = vpop.f32.mrf.mxu0  ;;  %v3703_v26 = vpop.f32.mrf.mxu1 }
 0x3ab   : > { %v10027_v21 = vadd.f32 %v3880_v43, %v3671_v41 }
 0x3ac   : > { %v7658_v55 = vpop.f32.mrf.mxu0  ;;  %7945 = vmatmul.mubr.bf16.gmra.mxu0 %v9956_v56  ;;  %v7618_v28 = vpop.f32.mrf.mxu1 }
 0x3ad   : > { %v10030_v54 = vadd.f32 %v7658_v55, %v7610_v14  ;;  %7948 = vmatprep.mubr.bf16.mxu0 %v9964_v2 }
 0x3ae   : > { %v3893_v12 = vpop.f32.mrf.mxu0  ;;  %v3716_v2 = vpop.f32.mrf.mxu1 }
 0x3af   : > { %v10033_v13 = vadd.f32 %v3893_v12, %v3684_v58 }
 0x3b0   : > { %v7659_v49 = vpop.f32.mrf.mxu0  ;;  %v7619_v41 = vpop.f32.mrf.mxu1  ;;  %7909 = vmatmul.mubr.bf16.gmra.mxu1 %v5237_v62 }
 0x3b1   : > { %v10035_v8 = vadd.f32 %v7659_v49, %v7611_v27  ;;  %7912 = vmatprep.mubr.bf16.mxu1 %v9931_v36  ;;  %v5802_v36 = vld [vmem:[#allocation2 + $0x32] sm:$0xff] }
 0x3b2   : > { %v3896_v56 = vpop.f32.mrf.mxu0  ;;  %v3719_v42 = vpop.f32.mrf.mxu1  ;;  %v5834_v43 = vpack.c.bf16 %v5803_v59, %v5802_v36 }
 0x3b3   : > { %v10037_v29 = vadd.f32 %v3896_v56, %v3687_v35  ;;  %v5528_v56 = vld [vmem:[#allocation2 + $0x1a1] sm:$0xff] }
 0x3b4   : > { %v7662_v63 = vpop.f32.mrf.mxu0  ;;  %7949 = vmatmul.mubr.bf16.gmra.mxu0 %v9967_v0  ;;  %v7622_v58 = vpop.f32.mrf.mxu1 }
 0x3b5   : > { %v10040_v17 = vadd.f32 %v7662_v63, %v7614_v9  ;;  %7952 = vmatprep.mubr.bf16.mxu0 %v9973_v5  ;;  %v5222_v5 = vld [vmem:[#allocation2 + $0x198] sm:$0xff]  ;;  %v5806_v63 = vld [vmem:[#allocation2 + $0x62] sm:$0xff] }
 0x3b6   : > { %v3909_v19 = vpop.f32.mrf.mxu0  ;;  %v3732_v11 = vpop.f32.mrf.mxu1  ;;  %v5239_v57 = vpack.c.bf16 %v5223_v37, %v5222_v5  ;;  %v5808_v37 = vld [vmem:[#allocation2 + $0x7a] sm:$0xff] }
 0x3b7   : > { %v10043_v46 = vadd.f32 %v3909_v19, %v3700_v38 }
 0x3b8   : > { %v7663_v14 = vpop.f32.mrf.mxu0  ;;  %v7623_v31 = vpop.f32.mrf.mxu1  ;;  %7913 = vmatmul.mubr.bf16.gmra.mxu1 %v5239_v57 }
 0x3b9   : > { %v10045_v52 = vadd.f32 %v7663_v14, %v7615_v48  ;;  %7980 = vmatprep.mubr.bf16.mxu1 %v5834_v43 }
 0x3ba   : > { %v3912_v33 = vpop.f32.mrf.mxu0  ;;  %v3735_v45 = vpop.f32.mrf.mxu1 }
 0x3bb   : > { %v10048_v0 = vadd.f32 %v3912_v33, %v3703_v26  ;;  %v5807_v26 = vld [vmem:[#allocation2 + $0x6a] sm:$0xff] }
 0x3bc   : > { %v7666_v27 = vpop.f32.mrf.mxu0  ;;  %7953 = vmatmul.mubr.bf16.gmra.mxu0 %v9975_v60  ;;  %v7626_v55 = vpop.f32.mrf.mxu1 }
 0x3bd   : > { %v10051_v25 = vadd.f32 %v7666_v27, %v7618_v28  ;;  %7956 = vmatprep.mubr.bf16.mxu0 %v9981_v18  ;;  %v5527_v28 = vld [vmem:[#allocation2 + $0x199] sm:$0xff] }
 0x3be   : > { %v3925_v35 = vpop.f32.mrf.mxu0  ;;  %v3748_v18 = vpop.f32.mrf.mxu1 }
 0x3bf   : > { %v10054_v6 = vadd.f32 %v3925_v35, %v3716_v2  ;;  %v5835_v2 = vpack.c.bf16 %v5805_v1, %v5804_v40  ;;  %v5813_v40 = vld [vmem:[#allocation2 + $0xb2] sm:$0xff] }
 0x3c0   : > { %v7667_v9 = vpop.f32.mrf.mxu0  ;;  %v7627_v10 = vpop.f32.mrf.mxu1 }
 0x3c1   : > { %v10056_v38 = vadd.f32 %v7667_v9, %v7619_v41  ;;  %v5836_v41 = vpack.c.bf16 %v5807_v26, %v5806_v63  ;;  %7981 = vmatmul.mubr.bf16.vlgmr.msra.gmra.mxu1 %v5835_v2  ;;  %v5812_v63 = vld [vmem:[#allocation2 + $0xaa] sm:$0xff] }
 0x3c2   : > { %v3928_v60 = vpop.f32.mrf.mxu0  ;;  %v3751_v50 = vpop.f32.mrf.mxu1 }
 0x3c3   : > { %v10058_v51 = vadd.f32 %v3928_v60, %v3719_v42  ;;  %v5544_v42 = vpack.c.bf16 %v5528_v56, %v5527_v28  ;;  %7984 = vmatprep.mubr.bf16.mxu1 %v5836_v41 }
 0x3c4   : > { %v7670_v48 = vpop.f32.mrf.mxu0  ;;  %7957 = vmatmul.mubr.bf16.gmra.mxu0 %v9983_v34  ;;  %v7694_v34 = vpop.f32.mrf.mxu1 }
 0x3c5   : > { %v10061_v12 = vadd.f32 %v7670_v48, %v7622_v58  ;;  %7960 = vmatprep.mubr.bf16.mxu0 %v9989_v39  ;;  %v4247_v39 = vadd.f32 %v7694_v34, %v10000_v3  ;;  %v5814_v34 = vld [vmem:[#allocation2 + $0xc2] sm:$0xff] }
 0x3c6   : > { %v3941_v7 = vpop.f32.mrf.mxu0  ;;  %v4118_v14 = vpop.f32.mrf.mxu1 }
 0x3c7   : > { %v10064_v49 = vadd.f32 %v3941_v7, %v3732_v11  ;;  %v4245_v33 = vadd.f32 %v4118_v14, %v10003_v23  ;;  %v5809_v11 = vld [vmem:[#allocation2 + $0x82] sm:$0xff] }
 0x3c8   : > { %v7671_v24 = vpop.f32.mrf.mxu0  ;;  %v7695_v5 = vpop.f32.mrf.mxu1  ;;  %v5837_v36 = vpack.c.bf16 %v5809_v11, %v5808_v37 }
 0x3c9   : > { %v10066_v19 = vadd.f32 %v7671_v24, %v7623_v31  ;;  %v5811_v31 = vld [vmem:[#allocation2 + $0x9a] sm:$0xff]  ;;  %v4248_v35 = vadd.f32 %v7695_v5, %v10005_v30 }
 0x3ca   : > { %v3944_v22 = vpop.f32.mrf.mxu0  ;;  %v4121_v3 = vpop.f32.mrf.mxu1  ;;  %7985 = vmatmul.mubr.bf16.gmra.mxu1 %v5837_v36  ;;  %v5816_v36 = vld [vmem:[#allocation2 + $0xda] sm:$0xff] }
 0x3cb   : > { %v10069_v62 = vadd.f32 %v3944_v22, %v3735_v45  ;;  %v5810_v45 = vld [vmem:[#allocation2 + $0x92] sm:$0xff]  ;;  %v4246_v43 = vadd.f32 %v4121_v3, %v10007_v44  ;;  %v5815_v44 = vld [vmem:[#allocation2 + $0xca] sm:$0xff] }
 0x3cc   : > { %v7674_v58 = vpop.f32.mrf.mxu0  ;;  %7961 = vmatmul.mubr.bf16.gmra.mxu0 %v5544_v42  ;;  %v5838_v60 = vpack.c.bf16 %v5811_v31, %v5810_v45  ;;  %v7698_v23 = vpop.f32.mrf.mxu1  ;;  %v5840_v42 = vpack.c.bf16 %v5815_v44, %v5814_v34  ;;  %v5817_v31 = vld [vmem:[#allocation2 + $0xe2] sm:$0xff]  ;;  %v5821_v44 = vld [vmem:[#allocation2 + $0x112] sm:$0xff] }
 0x3cd   : > { %v10072_v27 = vadd.f32 %v7674_v58, %v7626_v55  ;;  %v4251_v1 = vadd.f32 %v7698_v23, %v10010_v53  ;;  %v5839_v53 = vpack.c.bf16 %v5813_v40, %v5812_v63 }
 0x3ce   : > { %v3957_v59 = vpop.f32.mrf.mxu0  ;;  %7988 = vmatprep.mubr.bf16.mxu1 %v5838_v60  ;;  %v4134_v30 = vpop.f32.mrf.mxu1  ;;  %v5818_v60 = vld [vmem:[#allocation2 + $0xf2] sm:$0xff] }
 0x3cf   : > { %v10075_v57 = vadd.f32 %v3957_v59, %v3748_v18  ;;  %v4249_v7 = vadd.f32 %v4134_v30, %v10013_v32 }
 0x3d0   : > { %v7675_v9 = vpop.f32.mrf.mxu0  ;;  %v7699_v56 = vpop.f32.mrf.mxu1 }
 0x3d1   : > { %v10078_v48 = vadd.f32 %v7675_v9, %v7627_v10  ;;  %v4252_v10 = vadd.f32 %v7699_v56, %v10015_v15 }
 0x3d2   : > { %v3960_v55 = vpop.f32.mrf.mxu0  ;;  %v4137_v41 = vpop.f32.mrf.mxu1  ;;  %7989 = vmatmul.mubr.bf16.gmra.mxu1 %v5839_v53  ;;  %v5820_v53 = vld [vmem:[#allocation2 + $0x10a] sm:$0xff] }
 0x3d3   : > { %v10081_v26 = vadd.f32 %v3960_v55, %v3751_v50  ;;  %v4250_v22 = vadd.f32 %v4137_v41, %v10017_v47  ;;  %7992 = vmatprep.mubr.bf16.mxu1 %v5840_v42  ;;  %v5819_v47 = vld [vmem:[#allocation2 + $0xfa] sm:$0xff]  ;;  %v5822_v42 = vld [vmem:[#allocation2 + $0x122] sm:$0xff] }
 0x3d4   : > { %v7742_v18 = vpop.f32.mrf.mxu0  ;;  %v7702_v32 = vpop.f32.mrf.mxu1  ;;  %v5842_v55 = vpack.c.bf16 %v5819_v47, %v5818_v60  ;;  %v5825_v47 = vld [vmem:[#allocation2 + $0x142] sm:$0xff] }
 0x3d5   : > { %v10084_v28 = vadd.f32 %v7742_v18, %v4247_v39  ;;  %v4255_v58 = vadd.f32 %v7702_v32, %v10020_v4  ;;  %v5841_v4 = vpack.c.bf16 %v5817_v31, %v5816_v36 }
 0x3d6   : > { %v4423_v2 = vpop.f32.mrf.mxu0  ;;  %v4150_v15 = vpop.f32.mrf.mxu1 }
 0x3d7   : > { %v10087_v24 = vadd.f32 %v4423_v2, %v4245_v33  ;;  %v4253_v5 = vadd.f32 %v4150_v15, %v10023_v16 }
 0x3d8   : > { %v7743_v50 = vpop.f32.mrf.mxu0  ;;  %v7703_v37 = vpop.f32.mrf.mxu1 }
 0x3d9   : > { %v10090_v14 = vadd.f32 %v7743_v50, %v4248_v35  ;;  %v4256_v35 = vadd.f32 %v7703_v37, %v10025_v20 }
 0x3da   : > { %v4426_v39 = vpop.f32.mrf.mxu0  ;;  %v4153_v9 = vpop.f32.mrf.mxu1  ;;  %7993 = vmatmul.mubr.bf16.gmra.mxu1 %v5841_v4  ;;  %v5824_v4 = vld [vmem:[#allocation2 + $0x13a] sm:$0xff] }
 0x3db   : > { %v10093_v11 = vadd.f32 %v4426_v39, %v4246_v43  ;;  %v4254_v23 = vadd.f32 %v4153_v9, %v10027_v21  ;;  %7996 = vmatprep.mubr.bf16.mxu1 %v5842_v55  ;;  %v5823_v21 = vld [vmem:[#allocation2 + $0x12a] sm:$0xff]  ;;  %v5826_v55 = vld [vmem:[#allocation2 + $0x152] sm:$0xff] }
 0x3dc   : > { %v7746_v33 = vpop.f32.mrf.mxu0  ;;  %v7706_v16 = vpop.f32.mrf.mxu1  ;;  %v5844_v39 = vpack.c.bf16 %v5823_v21, %v5822_v42  ;;  %v5829_v21 = vld [vmem:[#allocation2 + $0x172] sm:$0xff] }
 0x3dd   : > { %v10096_v59 = vadd.f32 %v7746_v33, %v4251_v1  ;;  %v4259_v18 = vadd.f32 %v7706_v16, %v10030_v54  ;;  %v5843_v54 = vpack.c.bf16 %v5821_v44, %v5820_v53 }
 0x3de   : > { %v4439_v3 = vpop.f32.mrf.mxu0  ;;  %v4166_v20 = vpop.f32.mrf.mxu1 }
 0x3df   : > { %v10099_v45 = vadd.f32 %v4439_v3, %v4249_v7  ;;  %v4257_v56 = vadd.f32 %v4166_v20, %v10033_v13 }
 0x3e0   : > { %v7747_v43 = vpop.f32.mrf.mxu0  ;;  %v7707_v63 = vpop.f32.mrf.mxu1 }
 0x3e1   : > { %v10102_v30 = vadd.f32 %v7747_v43, %v4252_v10  ;;  %v4260_v10 = vadd.f32 %v7707_v63, %v10035_v8 }
 0x3e2   : > { %v4442_v1 = vpop.f32.mrf.mxu0  ;;  %v4169_v50 = vpop.f32.mrf.mxu1  ;;  %7997 = vmatmul.mubr.bf16.gmra.mxu1 %v5843_v54 }
 0x3e3   : > { %v10105_v40 = vadd.f32 %v4442_v1, %v4250_v22  ;;  %v4258_v32 = vadd.f32 %v4169_v50, %v10037_v29  ;;  %8000 = vmatprep.mubr.bf16.mxu1 %v5844_v39  ;;  %v5827_v29 = vld [vmem:[#allocation2 + $0x15a] sm:$0xff]  ;;  %v5828_v50 = vld [vmem:[#allocation2 + $0x16a] sm:$0xff] }
 0x3e4   : > { %v7750_v7 = vpop.f32.mrf.mxu0  ;;  %v7710_v13 = vpop.f32.mrf.mxu1  ;;  %v5846_v1 = vpack.c.bf16 %v5827_v29, %v5826_v55 }
 0x3e5   : > { %v10108_v2 = vadd.f32 %v7750_v7, %v4255_v58  ;;  %v4263_v33 = vadd.f32 %v7710_v13, %v10040_v17  ;;  %v5845_v17 = vpack.c.bf16 %v5825_v47, %v5824_v4 }
 0x3e6   : > { %v4455_v41 = vpop.f32.mrf.mxu0  ;;  %v4182_v8 = vpop.f32.mrf.mxu1 }
 0x3e7   : > { %v10111_v34 = vadd.f32 %v4455_v41, %v4253_v5  ;;  %v4261_v37 = vadd.f32 %v4182_v8, %v10043_v46 }
 0x3e8   : > { %v7751_v22 = vpop.f32.mrf.mxu0  ;;  %v7711_v36 = vpop.f32.mrf.mxu1 }
 0x3e9   : > { %v10114_v15 = vadd.f32 %v7751_v22, %v4256_v35  ;;  %v4264_v35 = vadd.f32 %v7711_v36, %v10045_v52  ;;  %v5847_v22 = vpack.c.bf16 %v5829_v21, %v5828_v50 }
 0x3ea   : > { %v4458_v58 = vpop.f32.mrf.mxu0  ;;  %v4185_v43 = vpop.f32.mrf.mxu1  ;;  %8001 = vmatmul.mubr.bf16.gmra.mxu1 %v5845_v17 }
 0x3eb   : > { %v10117_v31 = vadd.f32 %v4458_v58, %v4254_v23  ;;  %v4262_v16 = vadd.f32 %v4185_v43, %v10048_v0  ;;  %8004 = vmatprep.mubr.bf16.mxu1 %v5846_v1 }
 0x3ec   : > { %v7754_v5 = vpop.f32.mrf.mxu0  ;;  %v7714_v46 = vpop.f32.mrf.mxu1 }
 0x3ed   : > { %v10120_v3 = vadd.f32 %v7754_v5, %v4259_v18  ;;  %v4267_v7 = vadd.f32 %v7714_v46, %v10051_v25 }
 0x3ee   : > { %v4471_v9 = vpop.f32.mrf.mxu0  ;;  %v4198_v52 = vpop.f32.mrf.mxu1 }
 0x3ef   : > { %v10123_v60 = vadd.f32 %v4471_v9, %v4257_v56  ;;  %v4265_v63 = vadd.f32 %v4198_v52, %v10054_v6  ;;  %v5832_v9 = vld [vmem:[#allocation2 + $0x19a] sm:$0xff] }
 0x3f0   : > { %v7755_v23 = vpop.f32.mrf.mxu0  ;;  %v7715_v53 = vpop.f32.mrf.mxu1 }
 0x3f1   : > { %v10126_v20 = vadd.f32 %v7755_v23, %v4260_v10  ;;  %v4268_v10 = vadd.f32 %v7715_v53, %v10056_v38 }
 0x3f2   : > { %v4474_v18 = vpop.f32.mrf.mxu0  ;;  %v4201_v42 = vpop.f32.mrf.mxu1  ;;  %8005 = vmatmul.mubr.bf16.gmra.mxu1 %v5847_v22 }
 0x3f3   : > { %v10129_v44 = vadd.f32 %v4474_v18, %v4258_v32  ;;  %v4266_v32 = vadd.f32 %v4201_v42, %v10058_v51  ;;  %8008 = vmatprep.mubr.bf16.mxu1 %v9994_v61 }
 0x3f4   : > { %v7758_v56 = vpop.f32.mrf.mxu0  ;;  %v7718_v13 = vpop.f32.mrf.mxu1 }
 0x3f5   : > { %v10132_v41 = vadd.f32 %v7758_v56, %v4263_v33  ;;  %v4271_v58 = vadd.f32 %v7718_v13, %v10061_v12 }
 0x3f6   : > { %v4487_v0 = vpop.f32.mrf.mxu0  ;;  %v4214_v38 = vpop.f32.mrf.mxu1 }
 0x3f7   : > { %v10135_v54 = vadd.f32 %v4487_v0, %v4261_v37  ;;  %v4269_v5 = vadd.f32 %v4214_v38, %v10064_v49  ;;  %v5833_v37 = vld [vmem:[#allocation2 + $0x1a2] sm:$0xff] }
 0x3f8   : > { %v7759_v25 = vpop.f32.mrf.mxu0  ;;  %v7719_v36 = vpop.f32.mrf.mxu1  ;;  %v5849_v12 = vpack.c.bf16 %v5833_v37, %v5832_v9 }
 0x3f9   : > { %v10138_v39 = vadd.f32 %v7759_v25, %v4264_v35  ;;  %v4272_v29 = vadd.f32 %v7719_v36, %v10066_v19 }
 0x3fa   : > { %v4490_v6 = vpop.f32.mrf.mxu0  ;;  %v4217_v4 = vpop.f32.mrf.mxu1  ;;  %8009 = vmatmul.mubr.bf16.gmra.mxu1 %v5849_v12 }
 0x3fb   : > { %v10142_v33 = vadd.f32 %v4490_v6, %v4262_v16  ;;  %v4270_v61 = vadd.f32 %v4217_v4, %v10069_v62 }
 0x3fc   : > { %v7762_v8 = vpop.f32.mrf.mxu0  ;;  %v7722_v55 = vpop.f32.mrf.mxu1 }
 0x3fd   : > { %v10145_v47 = vadd.f32 %v7762_v8, %v4267_v7  ;;  %v4275_v23 = vadd.f32 %v7722_v55, %v10072_v27 }
 0x3fe   : > { %v4503_v51 = vpop.f32.mrf.mxu0  ;;  %v4230_v1 = vpop.f32.mrf.mxu1 }
 0x3ff   : > { %v10148_v35 = vadd.f32 %v4503_v51, %v4265_v63  ;;  %v4273_v19 = vadd.f32 %v4230_v1, %v10075_v57 }
 0x400   : > { %v7763_v43 = vpop.f32.mrf.mxu0  ;;  %v7723_v7 = vpop.f32.mrf.mxu1 }
 0x401   : > { %v10151_v17 = vadd.f32 %v7763_v43, %v4268_v10  ;;  %v4276_v56 = vadd.f32 %v7723_v7, %v10078_v48 }
 0x402   : > { %v4506_v49 = vpop.f32.mrf.mxu0  ;;  %v4233_v63 = vpop.f32.mrf.mxu1 }
 0x403   : > { %v10154_v16 = vadd.f32 %v4506_v49, %v4266_v32  ;;  %v4274_v53 = vadd.f32 %v4233_v63, %v10081_v26 }
 0x404   : > { %v7766_v46 = vpop.f32.mrf.mxu0  ;;  %v7790_v27 = vpop.f32.mrf.mxu1 }
 0x405   : > { %v10157_v18 = vadd.f32 %v7766_v46, %v4271_v58  ;;  %v4857_v50 = vadd.f32 %v7790_v27, %v10084_v28 }
 0x406   : > { %v4519_v52 = vpop.f32.mrf.mxu0  ;;  %v4728_v57 = vpop.f32.mrf.mxu1 }
 0x407   : > { %v10160_v62 = vadd.f32 %v4519_v52, %v4269_v5  ;;  %v4855_v25 = vadd.f32 %v4728_v57, %v10087_v24 }
 0x408   : > { %v7767_v21 = vpop.f32.mrf.mxu0  ;;  %v7791_v48 = vpop.f32.mrf.mxu1 }
 0x409   : > { %v10163_v0 = vadd.f32 %v7767_v21, %v4272_v29  ;;  %v4858_v6 = vadd.f32 %v7791_v48, %v10090_v14 }
 0x40a   : > { %v4522_v10 = vpop.f32.mrf.mxu0  ;;  %v4731_v26 = vpop.f32.mrf.mxu1 }
 0x40b   : > { %v10166_v42 = vadd.f32 %v4522_v10, %v4270_v61  ;;  %v10175_v8 = vadd.f32 %v4731_v26, %v10093_v11 }
 0x40c   : > { %v7770_v22 = vpop.f32.mrf.mxu0  ;;  %v7794_v5 = vpop.f32.mrf.mxu1 }
 0x40d   : > { %v10169_v32 = vadd.f32 %v7770_v22, %v4275_v23  ;;  %v4861_v36 = vadd.f32 %v7794_v5, %v10096_v59 }
 0x40e   : > { %v4535_v13 = vpop.f32.mrf.mxu0  ;;  %v4744_v51 = vpop.f32.mrf.mxu1 }
 0x40f   : > { %v10172_v58 = vadd.f32 %v4535_v13, %v4273_v19  ;;  %v10183_v9 = vadd.f32 %v4744_v51, %v10099_v45 }
 0x410   : > { %v7771_v38 = vpop.f32.mrf.mxu0  ;;  %v7795_v4 = vpop.f32.mrf.mxu1 }
 0x411   : > { %v10177_v28 = vadd.f32 %v7771_v38, %v4276_v56  ;;  %v4862_v11 = vadd.f32 %v7795_v4, %v10102_v30 }
 0x412   : > { %v4538_v37 = vpop.f32.mrf.mxu0  ;;  %v4747_v61 = vpop.f32.mrf.mxu1 }
 0x413   : > { %v10180_v24 = vadd.f32 %v4538_v37, %v4274_v53  ;;  %v10191_v49 = vadd.f32 %v4747_v61, %v10105_v40 }
 0x414   : > { %v7838_v29 = vpop.f32.mrf.mxu0  ;;  %v7798_v23 = vpop.f32.mrf.mxu1 }
 0x415   : > { %v10185_v14 = vadd.f32 %v7838_v29, %v4857_v50  ;;  %v4865_v45 = vadd.f32 %v7798_v23, %v10108_v2 }
 0x416   : > { %v5033_v12 = vpop.f32.mrf.mxu0  ;;  %v4760_v46 = vpop.f32.mrf.mxu1 }
 0x417   : > { %v10188_v43 = vadd.f32 %v5033_v12, %v4855_v25  ;;  %v10199_v7 = vadd.f32 %v4760_v46, %v10111_v34 }
 0x418   : > { %v7839_v55 = vpop.f32.mrf.mxu0  ;;  %v7799_v52 = vpop.f32.mrf.mxu1 }
 0x419   : > { %v10193_v59 = vadd.f32 %v7839_v55, %v4858_v6  ;;  %v4866_v40 = vadd.f32 %v7799_v52, %v10114_v15 }
 0x41a   : > { %v10195_v1 = vpop.f32.mrf.mxu0  ;;  %v4763_v63 = vpop.f32.mrf.mxu1 }
 0x41b   : > { %v10207_v53 = vadd.f32 %v4763_v63, %v10117_v31 }
 0x41c   : > { %v7842_v19 = vpop.f32.mrf.mxu0  ;;  %v7802_v2 = vpop.f32.mrf.mxu1 }
 0x41d   : > { %v10201_v30 = vadd.f32 %v7842_v19, %v4861_v36  ;;  %v4869_v34 = vadd.f32 %v7802_v2, %v10120_v3 }
 0x41e   : > { %v10203_v56 = vpop.f32.mrf.mxu0  ;;  %v4776_v50 = vpop.f32.mrf.mxu1 }
 0x41f   : > { %v10215_v22 = vadd.f32 %v4776_v50, %v10123_v60 }
 0x420   : > { %v7843_v21 = vpop.f32.mrf.mxu0  ;;  %v7803_v15 = vpop.f32.mrf.mxu1 }
 0x421   : > { %v10209_v27 = vadd.f32 %v7843_v21, %v4862_v11  ;;  %v4870_v31 = vadd.f32 %v7803_v15, %v10126_v20 }
 0x422   : > { %v10211_v10 = vpop.f32.mrf.mxu0  ;;  %v4779_v13 = vpop.f32.mrf.mxu1 }
 0x423   : > { %v10223_v26 = vadd.f32 %v4779_v13, %v10129_v44 }
 0x424   : > { %v7846_v57 = vpop.f32.mrf.mxu0  ;;  %v7806_v3 = vpop.f32.mrf.mxu1 }
 0x425   : > { %v10217_v25 = vadd.f32 %v7846_v57, %v4865_v45  ;;  %v4873_v60 = vadd.f32 %v7806_v3, %v10132_v41 }
 0x426   : > { %v10219_v48 = vpop.f32.mrf.mxu0  ;;  %v4792_v37 = vpop.f32.mrf.mxu1 }
 0x427   : > { %v10231_v51 = vadd.f32 %v4792_v37, %v10135_v54 }
 0x428   : > { %v7847_v6 = vpop.f32.mrf.mxu0  ;;  %v7807_v20 = vpop.f32.mrf.mxu1 }
 0x429   : > { %v10225_v38 = vadd.f32 %v7847_v6, %v4866_v40  ;;  %v4874_v44 = vadd.f32 %v7807_v20, %v10138_v39 }
 0x42a   : > { %v10227_v5 = vpop.f32.mrf.mxu0  ;;  %v4795_v12 = vpop.f32.mrf.mxu1 }
 0x42b   : > { %v10239_v61 = vadd.f32 %v4795_v12, %v10142_v33 }
 0x42c   : > { %v7850_v36 = vpop.f32.mrf.mxu0  ;;  %v7810_v41 = vpop.f32.mrf.mxu1 }
 0x42d   : > { %v10233_v29 = vadd.f32 %v7850_v36, %v4869_v34  ;;  %v4877_v54 = vadd.f32 %v7810_v41, %v10145_v47 }
 0x42e   : > { %v10235_v4 = vpop.f32.mrf.mxu0  ;;  %v4808_v45 = vpop.f32.mrf.mxu1 }
 0x42f   : > { %v10247_v19 = vadd.f32 %v4808_v45, %v10148_v35 }
 0x430   : > { %v7851_v11 = vpop.f32.mrf.mxu0  ;;  %v7811_v39 = vpop.f32.mrf.mxu1 }
 0x431   : > { %v10241_v55 = vadd.f32 %v7851_v11, %v4870_v31  ;;  %11002 = vst [vmem:[#allocation27_spill] sm:$0xff] %v10247_v19  ;;  %v4878_v33 = vadd.f32 %v7811_v39, %v10151_v17 }
 0x432   : > { %v10243_v23 = vpop.f32.mrf.mxu0  ;;  %v4811_v63 = vpop.f32.mrf.mxu1 }
 0x433   : > { %v10255_v2 = vadd.f32 %v4811_v63, %v10154_v16 }
 0x434   : > { %v7854_v46 = vpop.f32.mrf.mxu0  ;;  %v7814_v47 = vpop.f32.mrf.mxu1 }
 0x435   : > { %v10249_v52 = vadd.f32 %v7854_v46, %v4873_v60  ;;  %11003 = vst [vmem:[#allocation44_spill] sm:$0xff] %v10255_v2  ;;  %v4881_v35 = vadd.f32 %v7814_v47, %v10157_v18 }
 0x436   : > { %v10251_v40 = vpop.f32.mrf.mxu0  ;;  %v4824_v57 = vpop.f32.mrf.mxu1 }
 0x437   : > { %v10263_v31 = vadd.f32 %v4824_v57, %v10160_v62 }
 0x438   : > { %v7855_v21 = vpop.f32.mrf.mxu0  ;;  %v7815_v17 = vpop.f32.mrf.mxu1 }
 0x439   : > { %v10257_v34 = vadd.f32 %v7855_v21, %v4874_v44  ;;  %11004 = vst [vmem:[#allocation51_spill] sm:$0xff] %v10263_v31  ;;  %v4882_v16 = vadd.f32 %v7815_v17, %v10163_v0 }
 0x43a   : > { %v10259_v50 = vpop.f32.mrf.mxu0  ;;  %v4827_v3 = vpop.f32.mrf.mxu1 }
 0x43b   : > { %v10271_v37 = vadd.f32 %v4827_v3, %v10166_v42 }
 0x43c   : > { %v7858_v15 = vpop.f32.mrf.mxu0  ;;  %v7818_v18 = vpop.f32.mrf.mxu1 }
 0x43d   : > { %v10265_v13 = vadd.f32 %v7858_v15, %v4877_v54  ;;  %11006 = vst [vmem:[#allocation47_spill] sm:$0xff] %v10271_v37  ;;  %v4885_v62 = vadd.f32 %v7818_v18, %v10169_v32 }
 0x43e   : > { %v10267_v6 = vpop.f32.mrf.mxu0  ;;  %v4840_v44 = vpop.f32.mrf.mxu1 }
 0x43f   : > { %11005 = vst [vmem:[#allocation20_spill] sm:$0xff] %v10267_v6  ;;  %v10279_v11 = vadd.f32 %v4840_v44, %v10172_v58 }
 0x440   : > { %v7859_v60 = vpop.f32.mrf.mxu0  ;;  %v7819_v0 = vpop.f32.mrf.mxu1 }
 0x441   : > { %v10273_v36 = vadd.f32 %v7859_v60, %v4878_v33  ;;  %11008 = vst [vmem:[#allocation15_spill] sm:$0xff] %v10279_v11  ;;  %v4886_v42 = vadd.f32 %v7819_v0, %v10177_v28 }
 0x442   : > { %v10275_v20 = vpop.f32.mrf.mxu0  ;;  %v4843_v45 = vpop.f32.mrf.mxu1 }
 0x443   : > { %11007 = vst [vmem:[#allocation14_spill] sm:$0xff] %v10275_v20  ;;  %v10287_v39 = vadd.f32 %v4843_v45, %v10180_v24 }
 0x444   : > { %v7862_v12 = vpop.f32.mrf.mxu0  ;;  %v7886_v32 = vpop.f32.mrf.mxu1 }
 0x445   : > { %v10281_v41 = vadd.f32 %v7862_v12, %v4881_v35  ;;  %11010 = vst [vmem:[#allocation29_spill] sm:$0xff] %v10287_v39  ;;  %v10294_v58 = vadd.f32 %v7886_v32, %v10185_v14 }
 0x446   : > { %v10283_v54 = vpop.f32.mrf.mxu0  ;;  %v5338_v21 = vpop.f32.mrf.mxu1 }
 0x447   : > { %11009 = vst [vmem:[#allocation28_spill] sm:$0xff] %v10283_v54  ;;  %v10297_v35 = vadd.f32 %v5338_v21, %v10188_v43 }
 0x448   : > { %v7863_v46 = vpop.f32.mrf.mxu0  ;;  %v7887_v28 = vpop.f32.mrf.mxu1 }
 0x449   : > { %v10289_v33 = vadd.f32 %v7863_v46, %v4882_v16  ;;  %v10302_v24 = vadd.f32 %v7887_v28, %v10193_v59 }
 0x44a   : > { %v10291_v63 = vpop.f32.mrf.mxu0  ;;  %v10304_v17 = vpop.f32.mrf.mxu1 }
 0x44b   : > { %11011 = vst [vmem:[#allocation30_spill] sm:$0xff] %v10291_v63 }
 0x44c   : > { %v7866_v47 = vpop.f32.mrf.mxu0  ;;  %v7890_v60 = vpop.f32.mrf.mxu1 }
 0x44d   : > { %v5190_v57 = vadd.f32 %v7866_v47, %v4885_v62  ;;  %v10309_v14 = vadd.f32 %v7890_v60, %v10201_v30 }
 0x44e   : > { %v10299_v15 = vpop.f32.mrf.mxu0  ;;  %v10311_v44 = vpop.f32.mrf.mxu1 }
 0x44f   : > { %11012 = vst [vmem:[#allocation21_spill] sm:$0xff] %v10299_v15 }
 0x450   : > { %v7867_v16 = vpop.f32.mrf.mxu0  ;;  %v7891_v62 = vpop.f32.mrf.mxu1 }
 0x451   : > { %v5191_v3 = vadd.f32 %v7867_v16, %v4886_v42  ;;  %v10316_v0 = vadd.f32 %v7891_v62, %v10209_v27 }
 0x452   : > { %v10306_v18 = vpop.f32.mrf.mxu0  ;;  %v10318_v59 = vpop.f32.mrf.mxu1 }
 0x453   : > { %11013 = vst [vmem:[#allocation45_spill] sm:$0xff] %v10306_v18 }
 0x454   : > { %v10313_v43 = vpop.f32.mrf.mxu0  ;;  %v7894_v42 = vpop.f32.mrf.mxu1 }
 0x455   : > { %v10323_v32 = vadd.f32 %v7894_v42, %v10217_v25 }
 0x456   : > { %v5643_v12 = vpop.f32.mrf.mxu0  ;;  %v10325_v30 = vpop.f32.mrf.mxu1 }
 0x458   : > { %v10320_v45 = vpop.f32.mrf.mxu0  ;;  %v7895_v47 = vpop.f32.mrf.mxu1 }
 0x459   : > { %v10330_v16 = vadd.f32 %v7895_v47, %v10225_v38 }
 0x45a   : > { %v5646_v46 = vpop.f32.mrf.mxu0  ;;  %v10332_v27 = vpop.f32.mrf.mxu1 }
 0x45c   : > { %v10327_v21 = vpop.f32.mrf.mxu0  ;;  %v7898_v62 = vpop.f32.mrf.mxu1 }
 0x45d   : > { %v10337_v18 = vadd.f32 %v7898_v62, %v10233_v29 }
 0x45e   : > { %v5659_v28 = vpop.f32.mrf.mxu0  ;;  %v10341_v25 = vpop.f32.mrf.mxu1 }
 0x460   : > { %v10334_v60 = vpop.f32.mrf.mxu0  ;;  %v7899_v42 = vpop.f32.mrf.mxu1 }
 0x461   : > { %v10344_v15 = vadd.f32 %v7899_v42, %v10241_v55 }
 0x462   : > { %v10339_v39 = vpop.f32.mrf.mxu0  ;;  %v10348_v38 = vpop.f32.mrf.mxu1 }
 0x464   : > { %v10346_v11 = vpop.f32.mrf.mxu0  ;;  %v7902_v47 = vpop.f32.mrf.mxu1 }
 0x465   : > { %v10351_v63 = vadd.f32 %v7902_v47, %v10249_v52 }
 0x466   : > { %v10353_v37 = vpop.f32.mrf.mxu0  ;;  %v10355_v29 = vpop.f32.mrf.mxu1 }
 0x467   : > { %11014 = vst [vmem:[#allocation49_spill] sm:$0xff] %v10351_v63 }
 0x468   : > { %v7903_v62 = vpop.f32.mrf.mxu1  ;;  %v10360_v31 = vpop.f32.mrf.mxu0 }
 0x469   : > { %v10358_v54 = vadd.f32 %v7903_v62, %v10257_v34 }
 0x46a   : > { %v10362_v55 = vpop.f32.mrf.mxu1  ;;  %v10367_v2 = vpop.f32.mrf.mxu0 }
 0x46b   : > { %11015 = vst [vmem:[#allocation31_spill] sm:$0xff] %v10358_v54  ;;  %11016 = vst [vmem:[#allocation46_spill] sm:$0xff] %v10362_v55 }
 0x46c   : > { %v7906_v42 = vpop.f32.mrf.mxu1  ;;  %v10374_v6 = vpop.f32.mrf.mxu0 }
 0x46d   : > { %v10365_v20 = vadd.f32 %v7906_v42, %v10265_v13 }
 0x46e   : > { %v10369_v52 = vpop.f32.mrf.mxu1  ;;  %v10381_v19 = vpop.f32.mrf.mxu0 }
 0x46f   : > { %11017 = vst [vmem:[#allocation22_spill] sm:$0xff] %v10365_v20  ;;  %11018 = vst [vmem:[#allocation52_spill] sm:$0xff] %v10369_v52 }
 0x470   : > { %v7907_v47 = vpop.f32.mrf.mxu1  ;;  %v10388_v52 = vpop.f32.mrf.mxu0 }
 0x471   : > { %v10372_v63 = vadd.f32 %v7907_v47, %v10273_v36 }
 0x472   : > { %v10376_v34 = vpop.f32.mrf.mxu1 }
 0x473   : > { %11019 = vst [vmem:[#allocation16_spill] sm:$0xff] %v10372_v63  ;;  %11020 = vst [vmem:[#allocation17_spill] sm:$0xff] %v10376_v34  ;;  %v10394_v34 = vpop.f32.mrf.mxu0 }
 0x474   : > { %v7910_v62 = vpop.f32.mrf.mxu1 }
 0x475   : > { %v10379_v54 = vadd.f32 %v7910_v62, %v10281_v41 }
 0x476   : > { %v10383_v13 = vpop.f32.mrf.mxu1 }
 0x477   : > { %11021 = vst [vmem:[#allocation32_spill] sm:$0xff] %v10379_v54  ;;  %11022 = vst [vmem:[#allocation33_spill] sm:$0xff] %v10383_v13  ;;  %v10400_v54 = vpop.f32.mrf.mxu0 }
 0x478   : > { %v7911_v42 = vpop.f32.mrf.mxu1 }
 0x479   : > { %v10386_v20 = vadd.f32 %v7911_v42, %v10289_v33  ;;  %v5161_v42 = vadd.f32 %v10195_v1, %v10175_v8 }
 0x47a   : > { %v10390_v36 = vpop.f32.mrf.mxu1 }
 0x47b   : > { %11023 = vst [vmem:[#allocation34_spill] sm:$0xff] %v10386_v20  ;;  %11024 = vst [vmem:[#allocation23_spill] sm:$0xff] %v10390_v36  ;;  %v10406_v20 = vpop.f32.mrf.mxu0 }
 0x47c   : > { %v7914_v47 = vpop.f32.mrf.mxu1 }
 0x47d   : > { %v10392_v63 = vadd.f32 %v7914_v47, %v5190_v57  ;;  %v5466_v57 = vadd.f32 %v10304_v17, %v5161_v42  ;;  %v5770_v47 = vadd.f32 %v5643_v12, %v10297_v35  ;;  %v10417_v8 = vpop.f32.mrf.mxu0  ;;  %v5773_v17 = vadd.f32 %v10320_v45, %v10302_v24 }
 0x47e   : > { %v10396_v55 = vpop.f32.mrf.mxu1 }
 0x47f   : > { %11025 = vst [vmem:[#allocation48_spill] sm:$0xff] %v10392_v63  ;;  %11026 = vst [vmem:[#allocation54_spill] sm:$0xff] %v10396_v55  ;;  %v5164_v63 = vadd.f32 %v10203_v56, %v10183_v9  ;;  %v5165_v9 = vadd.f32 %v10211_v10, %v10191_v49  ;;  %v10436_v45 = vpop.f32.mrf.mxu0 }
 0x480   : > { %v7915_v41 = vpop.f32.mrf.mxu1 }
 0x481   : > { %v10398_v62 = vadd.f32 %v7915_v41, %v5191_v3  ;;  %v5772_v41 = vadd.f32 %v10313_v43, %v10294_v58  ;;  %v5469_v55 = vadd.f32 %v10311_v44, %v5164_v63  ;;  %v5470_v44 = vadd.f32 %v10318_v59, %v5165_v9 }
 0x482   : > { %v10402_v13 = vpop.f32.mrf.mxu1 }
 0x483   : > { %11027 = vst [vmem:[#allocation35_spill] sm:$0xff] %v10398_v62  ;;  %11028 = vst [vmem:[#allocation50_spill] sm:$0xff] %v10402_v13  ;;  %v5771_v62 = vadd.f32 %v5646_v46, %v5466_v57  ;;  %v5774_v56 = vadd.f32 %v5659_v28, %v5469_v55  ;;  %v5775_v59 = vadd.f32 %v10339_v39, %v5470_v44 }
 0x484   : > { %v7982_v33 = vpop.f32.mrf.mxu1 }
 0x485   : > { %v10421_v42 = vadd.f32 %v7982_v33, %v5772_v41 }
 0x486   : > { %v5948_v36 = vpop.f32.mrf.mxu1 }
 0x487   : > { %v10414_v13 = vadd.f32 %v5948_v36, %v5770_v47  ;;  %v6211_v49 = vmul.f32 %v10421_v42, %v10421_v42  ;;  %v5168_v36 = vadd.f32 %v10219_v48, %v10199_v7 }
 0x488   : > { %v7983_v3 = vpop.f32.mrf.mxu1 }
 0x489   : > { %v6209_v43 = vmul.f32 %v10414_v13, %v10414_v13  ;;  %v10429_v12 = vadd.f32 %v7983_v3, %v5773_v17  ;;  %v5473_v41 = vadd.f32 %v10325_v30, %v5168_v36  ;;  %v10454_v17 = vpop.f32.mrf.mxu0 }
 0x48a   : > { %v5951_v1 = vpop.f32.mrf.mxu1 }
 0x48b   : > { %v10423_v35 = vadd.f32 %v5951_v1, %v5771_v62  ;;  %v5776_v62 = vadd.f32 %v10327_v21, %v10309_v14  ;;  %v6212_v57 = vmul.f32 %v10429_v12, %v10429_v12  ;;  %v5777_v1 = vadd.f32 %v10334_v60, %v10316_v0  ;;  %v10472_v44 = vpop.f32.mrf.mxu0 }
 0x48c   : > { %v7986_v58 = vpop.f32.mrf.mxu1  ;;  %v5778_v30 = vadd.f32 %v10353_v37, %v5473_v41 }
 0x48d   : > { %v6171_v63 = vadd.f32 %v10423_v35, %v10414_v13  ;;  %v6210_v24 = vmul.f32 %v10423_v35, %v10423_v35  ;;  %v10456_v7 = vadd.f32 %v7986_v58, %v5776_v62 }
 0x48e   : > { %v5964_v46 = vpop.f32.mrf.mxu1 }
 0x48f   : > { %v6172_v10 = vadd.f32 %v6171_v63, %v10421_v42  ;;  %v6241_v28 = vadd.f32 %v6210_v24, %v6209_v43  ;;  %v10441_v55 = vadd.f32 %v5964_v46, %v5774_v56  ;;  %v5169_v56 = vadd.f32 %v10227_v5, %v10207_v53 }
 0x490   : > { %v7987_v33 = vpop.f32.mrf.mxu1 }
 0x491   : > { %v6242_v47 = vadd.f32 %v6241_v28, %v6211_v49  ;;  %v6173_v3 = vadd.f32 %v6172_v10, %v10429_v12  ;;  %v6213_v39 = vmul.f32 %v10441_v55, %v10441_v55  ;;  %v10466_v60 = vadd.f32 %v7987_v33, %v5777_v1 }
 0x492   : > { %v5967_v48 = vpop.f32.mrf.mxu1  ;;  %v5474_v24 = vadd.f32 %v10332_v27, %v5169_v56  ;;  %v6215_v49 = vmul.f32 %v10456_v7, %v10456_v7  ;;  %v5172_v10 = vadd.f32 %v10235_v4, %v10215_v22  ;;  %v5780_v28 = vadd.f32 %v10346_v11, %v10323_v32 }
 0x493   : > { %v6174_v14 = vadd.f32 %v6173_v3, %v10441_v55  ;;  %v6243_v21 = vadd.f32 %v6242_v47, %v6212_v57  ;;  %v10461_v9 = vadd.f32 %v5967_v48, %v5775_v59  ;;  %v6216_v62 = vmul.f32 %v10466_v60, %v10466_v60  ;;  %v10490_v3 = vpop.f32.mrf.mxu0 }
 0x494   : > { %v7990_v43 = vpop.f32.mrf.mxu1  ;;  %v5779_v27 = vadd.f32 %v10367_v2, %v5474_v24  ;;  %v5477_v57 = vadd.f32 %v10341_v25, %v5172_v10  ;;  %v5781_v47 = vadd.f32 %v10360_v31, %v10330_v16  ;;  %v5173_v1 = vadd.f32 %v10243_v23, %v10223_v26 }
 0x495   : > { %v6244_v0 = vadd.f32 %v6243_v21, %v6213_v39  ;;  %v6175_v58 = vadd.f32 %v6174_v14, %v10461_v9  ;;  %v6214_v63 = vmul.f32 %v10461_v9, %v10461_v9  ;;  %v10492_v22 = vadd.f32 %v7990_v43, %v5780_v28  ;;  %v10508_v56 = vpop.f32.mrf.mxu0 }
 0x496   : > { %v5980_v46 = vpop.f32.mrf.mxu1  ;;  %v5782_v25 = vadd.f32 %v10381_v19, %v5477_v57  ;;  %v5478_v21 = vadd.f32 %v10348_v38, %v5173_v1 }
 0x497   : > { %v6176_v53 = vadd.f32 %v6175_v58, %v10456_v7  ;;  %v6245_v5 = vadd.f32 %v6244_v0, %v6214_v63  ;;  %v10477_v37 = vadd.f32 %v5980_v46, %v5778_v30  ;;  %v6219_v43 = vmul.f32 %v10492_v22, %v10492_v22  ;;  %v10526_v10 = vpop.f32.mrf.mxu0 }
 0x498   : > { %v7991_v36 = vpop.f32.mrf.mxu1  ;;  %v5176_v0 = vadd.f32 %v10251_v40, %v10231_v51  ;;  %v5784_v58 = vadd.f32 %v10374_v6, %v10337_v18  ;;  %v5783_v38 = vadd.f32 %v10394_v34, %v5478_v21 }
 0x499   : > { %v6246_v33 = vadd.f32 %v6245_v5, %v6215_v49  ;;  %v6177_v59 = vadd.f32 %v6176_v53, %v10466_v60  ;;  %v6217_v2 = vmul.f32 %v10477_v37, %v10477_v37  ;;  %v10502_v16 = vadd.f32 %v7991_v36, %v5781_v47  ;;  %v5739_v47 = vpop.f32.mrf.mxu0 }
 0x49a   : > { %v5983_v4 = vpop.f32.mrf.mxu1  ;;  %v5481_v53 = vadd.f32 %v10355_v29, %v5176_v0  ;;  %v5785_v5 = vadd.f32 %v10388_v52, %v10344_v15  ;;  %v5177_v36 = vadd.f32 %v10259_v50, %v10239_v61 }
 0x49b   : > { %v6178_v11 = vadd.f32 %v6177_v59, %v10477_v37  ;;  %v6247_v32 = vadd.f32 %v6246_v33, %v6216_v62  ;;  %v10497_v41 = vadd.f32 %v5983_v4, %v5779_v27  ;;  %v6220_v24 = vmul.f32 %v10502_v16, %v10502_v16  ;;  %v11029_v59 = vld [vmem:[#allocation46_spill] sm:$0xff] }
 0x49c   : > { %v7994_v48 = vpop.f32.mrf.mxu1  ;;  %v5786_v29 = vadd.f32 %v10406_v20, %v5481_v53  ;;  %v5482_v57 = vadd.f32 %v11029_v59, %v5177_v36  ;;  %v11036_v53 = vld [vmem:[#allocation14_spill] sm:$0xff] }
 0x49d   : > { %v6248_v31 = vadd.f32 %v6247_v32, %v6217_v2  ;;  %v6179_v14 = vadd.f32 %v6178_v11, %v10497_v41  ;;  %v6218_v39 = vmul.f32 %v10497_v41, %v10497_v41  ;;  %v10528_v51 = vadd.f32 %v7994_v48, %v5784_v58  ;;  %v11030_v2 = vld [vmem:[#allocation27_spill] sm:$0xff]  ;;  %v11031_v32 = vld [vmem:[#allocation20_spill] sm:$0xff]  ;;  %v7959_v58 = vpop.f32.mrf.mxu0 }
 0x49e   : > { %v5996_v30 = vpop.f32.mrf.mxu1  ;;  %v5180_v1 = vadd.f32 %v11031_v32, %v11030_v2 }
 0x49f   : > { %v6180_v26 = vadd.f32 %v6179_v14, %v10492_v22  ;;  %v6249_v23 = vadd.f32 %v6248_v31, %v6218_v39  ;;  %v10513_v19 = vadd.f32 %v5996_v30, %v5782_v25  ;;  %v6223_v11 = vmul.f32 %v10528_v51, %v10528_v51  ;;  %v11032_v25 = vld [vmem:[#allocation49_spill] sm:$0xff] }
 0x4a0   : > { %v7995_v63 = vpop.f32.mrf.mxu1  ;;  %v5788_v48 = vadd.f32 %v10400_v54, %v11032_v25  ;;  %v5787_v14 = vadd.f32 %v10436_v45, %v5482_v57 }
 0x4a1   : > { %v6250_v46 = vadd.f32 %v6249_v23, %v6219_v43  ;;  %v6181_v49 = vadd.f32 %v6180_v26, %v10502_v16  ;;  %v6221_v18 = vmul.f32 %v10513_v19, %v10513_v19  ;;  %v10538_v52 = vadd.f32 %v7995_v63, %v5785_v5  ;;  %v11033_v43 = vld [vmem:[#allocation52_spill] sm:$0xff]  ;;  %v11034_v23 = vld [vmem:[#allocation31_spill] sm:$0xff] }
 0x4a2   : > { %v5999_v40 = vpop.f32.mrf.mxu1  ;;  %v5485_v26 = vadd.f32 %v11033_v43, %v5180_v1  ;;  %v5789_v0 = vadd.f32 %v10417_v8, %v11034_v23 }
 0x4a3   : > { %v6182_v6 = vadd.f32 %v6181_v49, %v10513_v19  ;;  %v6251_v34 = vadd.f32 %v6250_v46, %v6220_v24  ;;  %v10533_v28 = vadd.f32 %v5999_v40, %v5783_v38  ;;  %v6224_v39 = vmul.f32 %v10538_v52, %v10538_v52  ;;  %v11035_v49 = vld [vmem:[#allocation44_spill] sm:$0xff] }
 0x4a4   : > { %v7998_v27 = vpop.f32.mrf.mxu1  ;;  %v5181_v5 = vadd.f32 %v11036_v53, %v11035_v49  ;;  %v5790_v40 = vadd.f32 %v10472_v44, %v5485_v26 }
 0x4a5   : > { %v6252_v15 = vadd.f32 %v6251_v34, %v6221_v18  ;;  %v6183_v62 = vadd.f32 %v6182_v6, %v10533_v28  ;;  %v6222_v33 = vmul.f32 %v10533_v28, %v10533_v28  ;;  %v10560_v63 = vadd.f32 %v7998_v27, %v5788_v48 }
 0x4a6   : > { %v6012_v4 = vpop.f32.mrf.mxu1 }
 0x4a7   : > { %v6184_v61 = vadd.f32 %v6183_v62, %v10528_v51  ;;  %v6253_v50 = vadd.f32 %v6252_v15, %v6222_v33  ;;  %v10547_v20 = vadd.f32 %v6012_v4, %v5786_v29  ;;  %v11037_v29 = vld [vmem:[#allocation17_spill] sm:$0xff]  ;;  %v5742_v15 = vpop.f32.mrf.mxu0  ;;  %v6227_v33 = vmul.f32 %v10560_v63, %v10560_v63  ;;  %v11038_v4 = vld [vmem:[#allocation51_spill] sm:$0xff] }
 0x4a8   : > { %v7999_v31 = vpop.f32.mrf.mxu1  ;;  %v5486_v27 = vadd.f32 %v11037_v29, %v5181_v5 }
 0x4a9   : > { %v6254_v21 = vadd.f32 %v6253_v50, %v6223_v11  ;;  %v6185_v30 = vadd.f32 %v6184_v61, %v10538_v52  ;;  %v6225_v45 = vmul.f32 %v10547_v20, %v10547_v20  ;;  %v10570_v8 = vadd.f32 %v7999_v31, %v5789_v0  ;;  %v11039_v11 = vld [vmem:[#allocation28_spill] sm:$0xff]  ;;  %v11040_v50 = vld [vmem:[#allocation22_spill] sm:$0xff]  ;;  %v7962_v43 = vpop.f32.mrf.mxu0 }
 0x4aa   : > { %v6015_v38 = vpop.f32.mrf.mxu1  ;;  %v5184_v61 = vadd.f32 %v11039_v11, %v11038_v4  ;;  %v5792_v2 = vadd.f32 %v10454_v17, %v11040_v50  ;;  %v5791_v1 = vadd.f32 %v10508_v56, %v5486_v27  ;;  %v11048_v11 = vld [vmem:[#allocation32_spill] sm:$0xff] }
 0x4ab   : > { %v6186_v54 = vadd.f32 %v6185_v30, %v10547_v20  ;;  %v6255_v24 = vadd.f32 %v6254_v21, %v6224_v39  ;;  %v10565_v46 = vadd.f32 %v6015_v38, %v5787_v14  ;;  %v6228_v25 = vmul.f32 %v10570_v8, %v10570_v8  ;;  %v11041_v14 = vld [vmem:[#allocation33_spill] sm:$0xff]  ;;  %v11042_v21 = vld [vmem:[#allocation16_spill] sm:$0xff] }
 0x4ac   : > { %v8002_v6 = vpop.f32.mrf.mxu1  ;;  %v5489_v39 = vadd.f32 %v11041_v14, %v5184_v61  ;;  %v5793_v30 = vadd.f32 %v10490_v3, %v11042_v21  ;;  %v5796_v61 = vadd.f32 %v10526_v10, %v11048_v11  ;;  %v11050_v14 = vld [vmem:[#allocation34_spill] sm:$0xff] }
 0x4ad   : > { %v6256_v18 = vadd.f32 %v6255_v24, %v6225_v45  ;;  %v6187_v34 = vadd.f32 %v6186_v54, %v10565_v46  ;;  %v6226_v36 = vmul.f32 %v10565_v46, %v10565_v46  ;;  %v10592_v26 = vadd.f32 %v8002_v6, %v5792_v2  ;;  %v11043_v54 = vld [vmem:[#allocation47_spill] sm:$0xff]  ;;  %v11044_v45 = vld [vmem:[#allocation30_spill] sm:$0xff] }
 0x4ae   : > { %v6028_v62 = vpop.f32.mrf.mxu1  ;;  %v5185_v24 = vadd.f32 %v11044_v45, %v11043_v54  ;;  %v5794_v49 = vadd.f32 %v5739_v47, %v5489_v39  ;;  %v5797_v39 = vadd.f32 %v7959_v58, %v11050_v14  ;;  %v11052_v54 = vld [vmem:[#allocation45_spill] sm:$0xff] }
 0x4af   : > { %v6188_v59 = vadd.f32 %v6187_v34, %v10560_v63  ;;  %v6257_v57 = vadd.f32 %v6256_v18, %v6226_v36  ;;  %v10579_v44 = vadd.f32 %v6028_v62, %v5790_v40  ;;  %v11045_v18 = vld [vmem:[#allocation23_spill] sm:$0xff]  ;;  %v5755_v36 = vpop.f32.mrf.mxu0  ;;  %v6231_v27 = vmul.f32 %v10592_v26, %v10592_v26 }
 0x4b0   : > { %v8003_v32 = vpop.f32.mrf.mxu1  ;;  %v5490_v34 = vadd.f32 %v11045_v18, %v5185_v24 }
 0x4b1   : > { %v6258_v48 = vadd.f32 %v6257_v57, %v6227_v33  ;;  %v6189_v31 = vadd.f32 %v6188_v59, %v10570_v8  ;;  %v6229_v56 = vmul.f32 %v10579_v44, %v10579_v44  ;;  %v10601_v40 = vadd.f32 %v8003_v32, %v5793_v30  ;;  %v11046_v59 = vld [vmem:[#allocation15_spill] sm:$0xff]  ;;  %v11047_v57 = vld [vmem:[#allocation21_spill] sm:$0xff]  ;;  %v7963_v21 = vpop.f32.mrf.mxu0 }
 0x4b2   : > { %v6031_v23 = vpop.f32.mrf.mxu1  ;;  %v5188_v4 = vadd.f32 %v11047_v57, %v11046_v59  ;;  %v5795_v2 = vadd.f32 %v5742_v15, %v5490_v34  ;;  %v11054_v59 = vld [vmem:[#allocation48_spill] sm:$0xff] }
 0x4b3   : > { %v6190_v17 = vadd.f32 %v6189_v31, %v10579_v44  ;;  %v6259_v0 = vadd.f32 %v6258_v48, %v6228_v25  ;;  %v10597_v38 = vadd.f32 %v6031_v23, %v5791_v1  ;;  %v6232_v32 = vmul.f32 %v10601_v40, %v10601_v40  ;;  %v11049_v48 = vld [vmem:[#allocation54_spill] sm:$0xff]  ;;  %v5758_v34 = vpop.f32.mrf.mxu0 }
 0x4b4   : > { %v8006_v53 = vpop.f32.mrf.mxu1  ;;  %v5493_v31 = vadd.f32 %v11049_v48, %v5188_v4  ;;  %v5800_v57 = vadd.f32 %v7962_v43, %v11054_v59 }
 0x4b5   : > { %v6260_v5 = vadd.f32 %v6259_v0, %v6229_v56  ;;  %v6191_v3 = vadd.f32 %v6190_v17, %v10597_v38  ;;  %v6230_v6 = vmul.f32 %v10597_v38, %v10597_v38  ;;  %v10621_v30 = vadd.f32 %v8006_v53, %v5796_v61  ;;  %v11051_v0 = vld [vmem:[#allocation29_spill] sm:$0xff] }
 0x4b6   : > { %v6044_v29 = vpop.f32.mrf.mxu1  ;;  %v5189_v45 = vadd.f32 %v11052_v54, %v11051_v0  ;;  %v5798_v24 = vadd.f32 %v5755_v36, %v5493_v31 }
 0x4b7   : > { %v6192_v62 = vadd.f32 %v6191_v3, %v10592_v26  ;;  %v6261_v33 = vadd.f32 %v6260_v5, %v6230_v6  ;;  %v10610_v47 = vadd.f32 %v6044_v29, %v5794_v49  ;;  %v11053_v6 = vld [vmem:[#allocation50_spill] sm:$0xff] }
 0x4b8   : > { %v8007_v50 = vpop.f32.mrf.mxu1  ;;  %v5494_v18 = vadd.f32 %v11053_v6, %v5189_v45 }
 0x4b9   : > { %v6262_v1 = vadd.f32 %v6261_v33, %v6231_v27  ;;  %v6193_v25 = vadd.f32 %v6192_v62, %v10601_v40  ;;  %v6233_v10 = vmul.f32 %v10610_v47, %v10610_v47  ;;  %v10630_v3 = vadd.f32 %v8007_v50, %v5797_v39 }
 0x4ba   : > { %v6047_v23 = vpop.f32.mrf.mxu1  ;;  %v6235_v27 = vmul.f32 %v10621_v30, %v10621_v30  ;;  %v5799_v11 = vadd.f32 %v5758_v34, %v5494_v18 }
 0x4bb   : > { %v6194_v17 = vadd.f32 %v6193_v25, %v10610_v47  ;;  %v6263_v15 = vadd.f32 %v6262_v1, %v6232_v32  ;;  %v10626_v56 = vadd.f32 %v6047_v23, %v5795_v2  ;;  %v6236_v61 = vmul.f32 %v10630_v3, %v10630_v3  ;;  %v11055_v32 = vld [vmem:[#allocation35_spill] sm:$0xff] }
 0x4bc   : > { %v8010_v49 = vpop.f32.mrf.mxu1  ;;  %v5801_v1 = vadd.f32 %v7963_v21, %v11055_v32 }
 0x4bd   : > { %v6264_v5 = vadd.f32 %v6263_v15, %v6233_v10  ;;  %v6195_v58 = vadd.f32 %v6194_v17, %v10626_v56  ;;  %v6234_v53 = vmul.f32 %v10626_v56, %v10626_v56  ;;  %v10646_v25 = vadd.f32 %v8010_v49, %v5800_v57 }
 0x4be   : > { %v6060_v29 = vpop.f32.mrf.mxu1 }
 0x4bf   : > { %v6196_v62 = vadd.f32 %v6195_v58, %v10621_v30  ;;  %v6265_v33 = vadd.f32 %v6264_v5, %v6234_v53  ;;  %v10639_v36 = vadd.f32 %v6060_v29, %v5798_v24  ;;  %v6239_v0 = vmul.f32 %v10646_v25, %v10646_v25 }
 0x4c0   : > { %v8011_v4 = vpop.f32.mrf.mxu1 }
 0x4c1   : > { %v6266_v50 = vadd.f32 %v6265_v33, %v6235_v27  ;;  %v6197_v2 = vadd.f32 %v6196_v62, %v10630_v3  ;;  %v6237_v14 = vmul.f32 %v10639_v36, %v10639_v36  ;;  %v10651_v17 = vadd.f32 %v8011_v4, %v5801_v1 }
 0x4c2   : > { %v6063_v48 = vpop.f32.mrf.mxu1 }
 0x4c3   : > { %v6198_v31 = vadd.f32 %v6197_v2, %v10639_v36  ;;  %v6267_v39 = vadd.f32 %v6266_v50, %v6236_v61  ;;  %v6104_v43 = vadd.f32 %v6063_v48, %v5799_v11  ;;  %v6240_v45 = vmul.f32 %v10651_v17, %v10651_v17 }
 0x4c5   : > { %v6268_v23 = vadd.f32 %v6267_v39, %v6237_v14  ;;  %v6199_v10 = vadd.f32 %v6198_v31, %v6104_v43  ;;  %v6238_v15 = vmul.f32 %v6104_v43, %v6104_v43 }
 0x4c7   : > { %v6200_v21 = vadd.f32 %v6199_v10, %v10646_v25  ;;  %v6269_v54 = vadd.f32 %v6268_v23, %v6238_v15  ;;  %v6315_v15 = vld [vmem:[%s8546_s6 + $0xe8] sm:$0xff] }
 0x4c9   : > { %v6201_v24 = vadd.f32 %v6200_v21, %v10651_v17  ;;  %v6270_v49 = vadd.f32 %v6269_v54, %v6239_v0 }
 0x4cb   : > { %v6202_v5 = vrot.slane %v6201_v24, 4  ;;  %v6271_v58 = vadd.f32 %v6270_v49, %v6240_v45 }
 0x4cd   : > { %v6203_v53 = vadd.f32 %v6202_v5, %v6201_v24  ;;  %v6272_v6 = vrot.slane %v6271_v58, 4 }
 0x4cf   : > { %v6204_v18 = vrot.slane %v6203_v53, 2  ;;  %v6273_v34 = vadd.f32 %v6272_v6, %v6271_v58 }
 0x4d1   : > { %v6205_v29 = vadd.f32 %v6204_v18, %v6203_v53  ;;  %v6274_v27 = vrot.slane %v6273_v34, 2 }
 0x4d3   : > { %v6206_v62 = vrot.slane %v6205_v29, 1  ;;  %v6275_v33 = vadd.f32 %v6274_v27, %v6273_v34  ;;  %v6286_v27 = vld [vmem:[%s8546_s6] sm:$0xff] }
 0x4d5   : > { %v6207_v59 = vadd.f32 %v6206_v62, %v6205_v29  ;;  %v6276_v57 = vrot.slane %v6275_v33, 1  ;;  %v6288_v29 = vld [vmem:[%s8546_s6 + $0x10] sm:$0xff]  ;;  %v6289_v62 = vld [vmem:[%s8546_s6 + $0x18] sm:$0xff] }
 0x4d7   : > { %v6208_v4 = vmul.f32 0.00390625, %v6207_v59  ;;  %v6277_v11 = vadd.f32 %v6276_v57, %v6275_v33  ;;  %v6287_v33 = vld [vmem:[%s8546_s6 + $0x8] sm:$0xff] }
 0x4d9   : > { %v6278_v61 = vmul.f32 0.00390625, %v6277_v11  ;;  %v6279_v50 = vmul.f32 %v6208_v4, %v6208_v4  ;;  %v6284_v48 = vsub.f32 0.0, %v6208_v4 }
 0x4db   : > { %v6280_v2 = vsub.f32 %v6278_v61, %v6279_v50  ;;  %v6292_v61 = vld [vmem:[%s8546_s6 + $0x30] sm:$0xff]  ;;  %v6290_v50 = vld [vmem:[%s8546_s6 + $0x20] sm:$0xff] }
 0x4dd   : > { %v6281_v32 = vmax.f32 %v6280_v2, 0.0  ;;  %v6293_v2 = vld [vmem:[%s8546_s6 + $0x38] sm:$0xff] }
 0x4df   : > { %v6282_v1 = vadd.f32 1e-05, %v6281_v32  ;;  %v6291_v32 = vld [vmem:[%s8546_s6 + $0x28] sm:$0xff] }
 0x4e1   : > { %8231 = vrsqrt.f32 %v6282_v1 }
 0x4ee   : > { %v8232_v31 = vpop.eup %8231 }
 0x4ef   : > { %v10659_v14 = vmul.f32 %v8232_v31, %v6284_v48  ;;  %v6347_v39 = vmul.f32 %v8232_v31, %v6104_v43  ;;  %v6318_v23 = vmul.f32 %v8232_v31, %v10414_v13  ;;  %v6319_v10 = vmul.f32 %v8232_v31, %v10423_v35 }
 0x4f0   : > { %v6320_v0 = vmul.f32 %v8232_v31, %v10421_v42  ;;  %v6321_v21 = vmul.f32 %v8232_v31, %v10429_v12  ;;  %v6322_v54 = vmul.f32 %v8232_v31, %v10441_v55  ;;  %v6323_v45 = vmul.f32 %v8232_v31, %v10461_v9 }
 0x4f1   : > { %v6379_v24 = vadd.f32 %v6347_v39, %v10659_v14  ;;  %v6324_v49 = vmul.f32 %v8232_v31, %v10456_v7  ;;  %v6325_v43 = vmul.f32 %v8232_v31, %v10466_v60  ;;  %v6326_v13 = vmul.f32 %v8232_v31, %v10477_v37 }
 0x4f2   : > { %v6327_v35 = vmul.f32 %v8232_v31, %v10497_v41  ;;  %v6328_v5 = vmul.f32 %v8232_v31, %v10492_v22  ;;  %v6329_v42 = vmul.f32 %v8232_v31, %v10502_v16  ;;  %v6330_v12 = vmul.f32 %v8232_v31, %v10513_v19 }
 0x4f3   : > { %v6411_v55 = vadd.f32 %v6379_v24, %v6315_v15  ;;  %v6331_v9 = vmul.f32 %v8232_v31, %v10533_v28  ;;  %v6332_v58 = vmul.f32 %v8232_v31, %v10528_v51  ;;  %v6333_v53 = vmul.f32 %v8232_v31, %v10538_v52  ;;  %v6297_v15 = vld [vmem:[%s8546_s6 + $0x58] sm:$0xff] }
 0x4f4   : > { %v6334_v7 = vmul.f32 %v8232_v31, %v10547_v20  ;;  %v6335_v60 = vmul.f32 %v8232_v31, %v10565_v46  ;;  %v6336_v37 = vmul.f32 %v8232_v31, %v10560_v63  ;;  %v6337_v41 = vmul.f32 %v8232_v31, %v10570_v8 }
 0x4f5   : > { %6443 = vst [vmem:[%s10685_s18 + $0xe8] sm:$0xff] %v6411_v55  ;;  %v6338_v22 = vmul.f32 %v8232_v31, %v10579_v44  ;;  %v6339_v16 = vmul.f32 %v8232_v31, %v10597_v38  ;;  %v6340_v19 = vmul.f32 %v8232_v31, %v10592_v26  ;;  %v6341_v51 = vmul.f32 %v8232_v31, %v10601_v40  ;;  %v6299_v55 = vld [vmem:[%s8546_s6 + $0x68] sm:$0xff] }
 0x4f6   : > { %v6342_v28 = vmul.f32 %v8232_v31, %v10610_v47  ;;  %v6343_v52 = vmul.f32 %v8232_v31, %v10626_v56  ;;  %v6344_v20 = vmul.f32 %v8232_v31, %v10621_v30  ;;  %v6345_v63 = vmul.f32 %v8232_v31, %v10630_v3 }
 0x4f7   : > { %v6346_v46 = vmul.f32 %v8232_v31, %v10639_v36  ;;  %v6348_v8 = vmul.f32 %v8232_v31, %v10646_v25  ;;  %v6349_v44 = vmul.f32 %v8232_v31, %v10651_v17  ;;  %v6350_v26 = vadd.f32 %v6318_v23, %v10659_v14  ;;  %v6296_v23 = vld [vmem:[%s8546_s6 + $0x50] sm:$0xff] }
 0x4f8   : > { %v6351_v38 = vadd.f32 %v6319_v10, %v10659_v14  ;;  %v6352_v40 = vadd.f32 %v6320_v0, %v10659_v14  ;;  %v6353_v47 = vadd.f32 %v6321_v21, %v10659_v14  ;;  %v6354_v30 = vadd.f32 %v6322_v54, %v10659_v14  ;;  %v6294_v10 = vld [vmem:[%s8546_s6 + $0x40] sm:$0xff]  ;;  %v6295_v0 = vld [vmem:[%s8546_s6 + $0x48] sm:$0xff] }
 0x4f9   : > { %v6355_v56 = vadd.f32 %v6323_v45, %v10659_v14  ;;  %v6356_v3 = vadd.f32 %v6324_v49, %v10659_v14  ;;  %v6357_v36 = vadd.f32 %v6325_v43, %v10659_v14  ;;  %v6358_v25 = vadd.f32 %v6326_v13, %v10659_v14  ;;  %v6300_v49 = vld [vmem:[%s8546_s6 + $0x70] sm:$0xff]  ;;  %v6298_v43 = vld [vmem:[%s8546_s6 + $0x60] sm:$0xff]  ;;  %v6301_v13 = vld [vmem:[%s8546_s6 + $0x78] sm:$0xff] }
 0x4fa   : > { %v6359_v17 = vadd.f32 %v6327_v35, %v10659_v14  ;;  %v6360_v6 = vadd.f32 %v6328_v5, %v10659_v14  ;;  %v6361_v18 = vadd.f32 %v6329_v42, %v10659_v14  ;;  %v6362_v34 = vadd.f32 %v6330_v12, %v10659_v14 }
 0x4fb   : > { %v6363_v59 = vadd.f32 %v6331_v9, %v10659_v14  ;;  %v10718_v57 = vadd.f32 %v6332_v58, %v10659_v14  ;;  %v10721_v4 = vadd.f32 %v6333_v53, %v10659_v14  ;;  %v10724_v11 = vadd.f32 %v6334_v7, %v10659_v14  ;;  %v6304_v9 = vld [vmem:[%s8546_s6 + $0x90] sm:$0xff]  ;;  %v6302_v58 = vld [vmem:[%s8546_s6 + $0x80] sm:$0xff] }
 0x4fc   : > { %v6367_v1 = vadd.f32 %v6335_v60, %v10659_v14  ;;  %v10732_v48 = vadd.f32 %v6336_v37, %v10659_v14  ;;  %v10735_v31 = vadd.f32 %v6337_v41, %v10659_v14  ;;  %v10738_v39 = vadd.f32 %v6338_v22, %v10659_v14  ;;  %v6305_v41 = vld [vmem:[%s8546_s6 + $0x98] sm:$0xff]  ;;  %v6303_v22 = vld [vmem:[%s8546_s6 + $0x88] sm:$0xff] }
 0x4fd   : > { %v6371_v21 = vadd.f32 %v6339_v16, %v10659_v14  ;;  %v10746_v54 = vadd.f32 %v6340_v19, %v10659_v14  ;;  %v10749_v45 = vadd.f32 %v6341_v51, %v10659_v14  ;;  %v10752_v24 = vadd.f32 %v6342_v28, %v10659_v14  ;;  %v6308_v16 = vld [vmem:[%s8546_s6 + $0xb0] sm:$0xff] }
 0x4fe   : > { %v10758_v35 = vadd.f32 %v6343_v52, %v10659_v14  ;;  %v10761_v5 = vadd.f32 %v6344_v20, %v10659_v14  ;;  %v10764_v42 = vadd.f32 %v6345_v63, %v10659_v14  ;;  %v10767_v12 = vadd.f32 %v6346_v46, %v10659_v14  ;;  %v6306_v20 = vld [vmem:[%s8546_s6 + $0xa0] sm:$0xff]  ;;  %v6309_v63 = vld [vmem:[%s8546_s6 + $0xb8] sm:$0xff] }
 0x4ff   : > { %v10773_v53 = vadd.f32 %v6348_v8, %v10659_v14  ;;  %v10776_v7 = vadd.f32 %v6349_v44, %v10659_v14  ;;  %v6382_v60 = vadd.f32 %v6350_v26, %v6286_v27  ;;  %v6383_v37 = vadd.f32 %v6351_v38, %v6287_v33  ;;  %v6307_v14 = vld [vmem:[%s8546_s6 + $0xa8] sm:$0xff]  ;;  %v6312_v38 = vld [vmem:[%s8546_s6 + $0xd0] sm:$0xff] }
 0x500   : > { %v6384_v19 = vadd.f32 %v6352_v40, %v6288_v29  ;;  %v6385_v51 = vadd.f32 %v6353_v47, %v6289_v62  ;;  %v6386_v28 = vadd.f32 %v6354_v30, %v6290_v50  ;;  %v6387_v52 = vadd.f32 %v6355_v56, %v6291_v32  ;;  %v6310_v40 = vld [vmem:[%s8546_s6 + $0xc0] sm:$0xff]  ;;  %v6311_v47 = vld [vmem:[%s8546_s6 + $0xc8] sm:$0xff]  ;;  %v6317_v62 = vld [vmem:[%s8546_s6 + $0xf8] sm:$0xff] }
 0x501   : > { %v6388_v46 = vadd.f32 %v6356_v3, %v6292_v61  ;;  %v6389_v8 = vadd.f32 %v6357_v36, %v6293_v2  ;;  %v6390_v44 = vadd.f32 %v6358_v25, %v6294_v10  ;;  %v6391_v26 = vadd.f32 %v6359_v17, %v6295_v0  ;;  %6414 = vst [vmem:[%s10685_s18] sm:$0xff] %v6382_v60  ;;  %v6313_v36 = vld [vmem:[%s8546_s6 + $0xd8] sm:$0xff]  ;;  %v6316_v25 = vld [vmem:[%s8546_s6 + $0xf0] sm:$0xff]  ;;  %v6314_v17 = vld [vmem:[%s8546_s6 + $0xe0] sm:$0xff] }
 0x502   : > { %6415 = vst [vmem:[%s10685_s18 + $0x8] sm:$0xff] %v6383_v37  ;;  %v6392_v30 = vadd.f32 %v6360_v6, %v6296_v23  ;;  %v6393_v56 = vadd.f32 %v6361_v18, %v6297_v15  ;;  %v6394_v29 = vadd.f32 %v6362_v34, %v6298_v43  ;;  %v6395_v3 = vadd.f32 %v6363_v59, %v6299_v55 }
 0x503   : > { %6416 = vst [vmem:[%s10685_s18 + $0x10] sm:$0xff] %v6384_v19  ;;  %6417 = vst [vmem:[%s10685_s18 + $0x18] sm:$0xff] %v6385_v51  ;;  %v6396_v27 = vadd.f32 %v10718_v57, %v6300_v49  ;;  %v6397_v6 = vadd.f32 %v10721_v4, %v6301_v13  ;;  %v6398_v18 = vadd.f32 %v10724_v11, %v6302_v58 }
 0x504   : > { %6418 = vst [vmem:[%s10685_s18 + $0x20] sm:$0xff] %v6386_v28  ;;  %6419 = vst [vmem:[%s10685_s18 + $0x28] sm:$0xff] %v6387_v52  ;;  %v6399_v34 = vadd.f32 %v6367_v1, %v6303_v22  ;;  %v6400_v33 = vadd.f32 %v10732_v48, %v6304_v9  ;;  %v6401_v59 = vadd.f32 %v10735_v31, %v6305_v41 }
 0x505   : > { %6420 = vst [vmem:[%s10685_s18 + $0x30] sm:$0xff] %v6388_v46  ;;  %6421 = vst [vmem:[%s10685_s18 + $0x38] sm:$0xff] %v6389_v8  ;;  %v6402_v57 = vadd.f32 %v10738_v39, %v6306_v20  ;;  %v6403_v4 = vadd.f32 %v6371_v21, %v6307_v14  ;;  %v6404_v11 = vadd.f32 %v10746_v54, %v6308_v16 }
 0x506   : > { %6422 = vst [vmem:[%s10685_s18 + $0x40] sm:$0xff] %v6390_v44  ;;  %6423 = vst [vmem:[%s10685_s18 + $0x48] sm:$0xff] %v6391_v26  ;;  %v6405_v61 = vadd.f32 %v10749_v45, %v6309_v63  ;;  %v6406_v50 = vadd.f32 %v10752_v24, %v6310_v40  ;;  %v6407_v2 = vadd.f32 %v10758_v35, %v6311_v47 }
 0x507   : > { %6424 = vst [vmem:[%s10685_s18 + $0x50] sm:$0xff] %v6392_v30  ;;  %6425 = vst [vmem:[%s10685_s18 + $0x58] sm:$0xff] %v6393_v56  ;;  %v6408_v32 = vadd.f32 %v10761_v5, %v6312_v38  ;;  %v6409_v1 = vadd.f32 %v10764_v42, %v6313_v36  ;;  %v6410_v48 = vadd.f32 %v10767_v12, %v6314_v17 }
 0x508   : > { %6426 = vst [vmem:[%s10685_s18 + $0x60] sm:$0xff] %v6394_v29  ;;  %6427 = vst [vmem:[%s10685_s18 + $0x68] sm:$0xff] %v6395_v3  ;;  %v6412_v31 = vadd.f32 %v10773_v53, %v6316_v25  ;;  %v6413_v39 = vadd.f32 %v10776_v7, %v6317_v62 }
 0x509   : > { %6428 = vst [vmem:[%s10685_s18 + $0x70] sm:$0xff] %v6396_v27  ;;  %6429 = vst [vmem:[%s10685_s18 + $0x78] sm:$0xff] %v6397_v6 }
 0x50a   : > { %6430 = vst [vmem:[%s10685_s18 + $0x80] sm:$0xff] %v6398_v18  ;;  %6431 = vst [vmem:[%s10685_s18 + $0x88] sm:$0xff] %v6399_v34 }
 0x50b   : > { %6432 = vst [vmem:[%s10685_s18 + $0x90] sm:$0xff] %v6400_v33  ;;  %6433 = vst [vmem:[%s10685_s18 + $0x98] sm:$0xff] %v6401_v59 }
 0x50c   : > { %6434 = vst [vmem:[%s10685_s18 + $0xa0] sm:$0xff] %v6402_v57  ;;  %6435 = vst [vmem:[%s10685_s18 + $0xa8] sm:$0xff] %v6403_v4 }
 0x50d   : > { %6436 = vst [vmem:[%s10685_s18 + $0xb0] sm:$0xff] %v6404_v11  ;;  %6437 = vst [vmem:[%s10685_s18 + $0xb8] sm:$0xff] %v6405_v61 }
 0x50e   : > { %6438 = vst [vmem:[%s10685_s18 + $0xc0] sm:$0xff] %v6406_v50  ;;  %6439 = vst [vmem:[%s10685_s18 + $0xc8] sm:$0xff] %v6407_v2 }
 0x50f   : > { %6440 = vst [vmem:[%s10685_s18 + $0xd0] sm:$0xff] %v6408_v32  ;;  %6441 = vst [vmem:[%s10685_s18 + $0xd8] sm:$0xff] %v6409_v1 }
 0x510   : > { %6442 = vst [vmem:[%s10685_s18 + $0xe0] sm:$0xff] %v6410_v48  ;;  %6444 = vst [vmem:[%s10685_s18 + $0xf0] sm:$0xff] %v6412_v31 }
 0x511   : > { %6445 = vst [vmem:[%s10685_s18 + $0xf8] sm:$0xff] %v6413_v39 }
 0x512   : > { %8326 = shalt.err (!%p8323_p9)
}
 0x513   : > { %s8327_s22 = scalar_lea.hbm %s10832_s28, 4096  ;;  %s8331_s26 = scalar_lea.hbm %s10890_s3, 8192 }
 0x514   : > { %p8328_p13 = scmp.ne.s32.totalorder %s10832_s28, %s8327_s22  ;;  %p8332_p4 = scmp.lt.s32.totalorder %s10832_s28, %s10890_s3 }
 0x515   : > { %p8333_p8 = scmp.lt.s32.totalorder %s8331_s26, %s8327_s22 }
 0x516   : > { %p8329_p5 = pnand %p8328_p13, %p11056_p10 }
 0x517   : > { %p8334_p3 = por %p8333_p8, %p8332_p4 }
 0x518   : > { %p8330_p0 = pneg %p8329_p5 }
 0x51a   : > { %p8335_p11 = pnand %p8334_p3, %p8330_p0 }
 0x51c   : > { %8338 = shalt.err (!%p8335_p11)
}
 0x51d   : > { %s8391_s6 = smov 128   ;;  %s8392_s18 = smov 8  }
 0x51e   : > { %8022 = dma.vmem_to_hbm [thread:$0]  (%p11056_p10), %s10834_s25, 4096, %s10832_s28, %s6447_s29, %s8391_s6, %s8391_s6, %s8392_s18  }
 0x51f PF: > { %s6475_s20 = sand.u32 1, %s8369_s12   ;;  %p11057_p1 = scmp.ne.s32.totalorder %s10896_s19, 0 }
 0x520   : > { %p11058_p2 = scmp.ge.s32.totalorder %s8381_s15, 2  ;;  %s6476_s16 = scalar_lea.sflag [#allocation6], %s6475_s20 }
 0x522   : > { %p8036_p6 = pnand %p11058_p2, %p11057_p1 }
 0x524   : > { %p8037_p12 = pneg %p8036_p6 }
 0x526   : > { %8364 = dma.done.wait (%p8037_p12), %s6476_s16, 4096  }
 0x527   : > { %8366 = vsyncadd (%p8037_p12), %s6476_s16, 4294963200  ;;  %p17_p7 = scmp.ge.s32.totalorder %s8485_s7, 4   ;;  %s11059_s12 = smov %s8373_s13 }
 0x528   : > { %s11060_s13 = smov %s8377_s14  ;;  %s11061_s14 = smov %s8501_s11 }
 0x529   : > { %s11062_s15 = smov %s8485_s7  ;;  %19 = sbr.rel (!%p17_p7) target bundleno = 6 (0x6), region = 88 }
 0x52e   :  { %6481 = vsyncpa [#allocation5], 1 }
 0x52f   :  { %6483 = vsyncpa [#allocation5 + $0x1], 1 }
 0x530   :  { %6484 = vsyncpa [#allocation8], 1 }
 0x531   :  { %6485 = vsyncpa [#allocation6], 1 }
 0x532   :  { %6487 = vsyncpa [#allocation6 + $0x1], 1 }

</bundles_post_ra>
